<compile_context>
chip_gen: v7x
topology: tpu7x:2x2x1
jax: 0.10.0
libtpu: 0.0.40
codegen_flags: <defaults>
</compile_context>

<pallas_src>
import functools

import jax
import jax.numpy as jnp
from jax.experimental import pallas as pl
from jax.experimental.pallas import tpu as pltpu


# ---------------------------------------------------------------------------
# In-kernel helpers
# ---------------------------------------------------------------------------
def _im2col(pat_ref, src, cin, H, W):
    """Scatter the 9 taps of a 3x3 / pad-1 conv input into the K-concatenated
    patches buffer pat_ref (tb, H, W, 9*cin).  The out-of-image halo of every
    tap is written as explicit zeros, so each lane of pat_ref is rewritten on
    every grid step (correct under megacore grid splitting)."""
    tb = src.shape[0]
    zrow = jnp.zeros((tb, 1, W, cin), jnp.float32)
    zcol = jnp.zeros((tb, H, 1, cin), jnp.float32)
    for kh in range(3):
        oh0, oh1 = max(0, 1 - kh), min(H, H + 1 - kh)   # valid output rows
        ih0, ih1 = oh0 + kh - 1, oh1 + kh - 1           # matching input rows
        for kw in range(3):
            ow0, ow1 = max(0, 1 - kw), min(W, W + 1 - kw)
            iw0, iw1 = ow0 + kw - 1, ow1 + kw - 1
            c0 = (kh * 3 + kw) * cin
            c1 = c0 + cin
            if oh0 > 0:                                  # top halo row
                pat_ref[:, 0:1, :, c0:c1] = zrow
            if oh1 < H:                                  # bottom halo row
                pat_ref[:, H - 1:H, :, c0:c1] = zrow
            if ow0 > 0:                                  # left halo col
                pat_ref[:, :, 0:1, c0:c1] = zcol
            if ow1 < W:                                  # right halo col
                pat_ref[:, :, W - 1:W, c0:c1] = zcol
            pat_ref[:, oh0:oh1, ow0:ow1, c0:c1] = src[:, ih0:ih1, iw0:iw1, :]


def _net_fused_kernel(x_ref, w1, b1, w2, b2, w3, b3, hw, hb, wfc, bfc, w2v, b2v,
                      o_ref, pat1, pat2, pat3, ha_ref, flat_ref, *, H, W, n_pol):
    tb = x_ref.shape[0]
    rows = tb * H * W

    def conv(pat_ref, w_ref, b_ref):
        k = pat_ref.shape[-1]
        # (tb,H,W,K) -> (tb*H*W,K): exact sublane collapse in f32 (W == 8),
        # then a single bf16 cast of the whole patches matrix (MXU operand).
        p = pat_ref[...].reshape(rows, k).astype(jnp.bfloat16)
        acc = jnp.dot(p, w_ref[...], preferred_element_type=jnp.float32)
        return jnp.maximum(acc + b_ref[...], 0.0)        # (rows, Cout) f32

    # --- common trunk: three 3x3 convs, each as one K-concatenated matmul ---
    _im2col(pat1, x_ref[...], 4, H, W)
    y = conv(pat1, w1, b1)                               # (rows, 32)
    _im2col(pat2, y.reshape(tb, H, W, 32), 32, H, W)
    y = conv(pat2, w2, b2)                               # (rows, 64)
    _im2col(pat3, y.reshape(tb, H, W, 64), 64, H, W)
    y = conv(pat3, w3, b3)                               # (rows, 128)

    # --- fused 1x1 policy(4) / value(2) head convs (padded to 8 ch) + ReLU ---
    pv = jnp.dot(y.astype(jnp.bfloat16), hw[...],
                 preferred_element_type=jnp.float32) + hb[...]
    ha_ref[...] = jnp.maximum(pv, 0.0).reshape(tb, H * W, 8)

    # --- NHWC flatten entirely in VMEM: (tb, H*W, 8) rows -> (tb, H*W*8) lanes
    for s in range(H * W):
        flat_ref[:, s * 8:(s + 1) * 8] = ha_ref[:, s, :]

    # --- fused heads: [policy logits | value hidden] in a single matmul ------
    z = jnp.dot(flat_ref[...].astype(jnp.bfloat16), wfc[...],
                preferred_element_type=jnp.float32) + bfc[...]

    logits = z[:, :n_pol]                                # (tb, n_pol)
    m = jnp.max(logits, axis=1, keepdims=True)
    e = logits - m
    logp = e - jnp.log(jnp.sum(jnp.exp(e), axis=1, keepdims=True))

    hv = jnp.maximum(z[:, n_pol:], 0.0)                  # (tb, 64) value hidden
    v = jnp.tanh(jnp.sum(hv * w2v[...], axis=1, keepdims=True) + b2v[...])

    # lane-dense output slab: [:n_pol] = log-probs, [n_pol] = value, rest = 0
    o_ref[0, :, :n_pol] = logp
    o_ref[0, :, n_pol:n_pol + 1] = v
    if n_pol + 1 < o_ref.shape[2]:
        o_ref[0, :, n_pol + 1:] = jnp.zeros(
            (tb, o_ref.shape[2] - n_pol - 1), jnp.float32)


# ---------------------------------------------------------------------------
# Wrapper
# ---------------------------------------------------------------------------
def _pick_batch_tile(batch, cap=16):
    """<= cap keeps scratch (~0.33 MB / image) well under scoped VMEM on all
    generations; <= batch//2 guarantees >=2 grid steps so v7x's second
    TensorCore gets work on the "parallel" batch axis."""
    limit = max(1, min(cap, batch // 2 if batch > 1 else 1))
    tb = limit
    while batch % tb:
        tb -= 1
    return tb


def net_forward(params, state_input_nchw):
    """== Net.forward: returns (log_softmax policy (B, H*W), value (B, 1))."""
    B, _, H, W = state_input_nchw.shape
    n_pol = H * W
    out_w = n_pol + 64
    # tiny input transpose NCHW -> NHWC (a few KB); everything else is fused.
    x = jnp.transpose(state_input_nchw.astype(jnp.float32), (0, 2, 3, 1))

    tb = _pick_batch_tile(B)
    grid = (B // tb,)

    flops = (2 * B * H * W * (9 * 4 * 32 + 9 * 32 * 64 + 9 * 64 * 128 + 128 * 8)
             + 2 * B * (H * W * 8 * out_w + 64))
    bytes_accessed = (4 * B * H * W * 4 + 4 * B * out_w
                      + 2 * (36 * 32 + 288 * 64 + 576 * 128 + 128 * 8
                             + H * W * 8 * out_w))

    out = pl.pallas_call(
        functools.partial(_net_fused_kernel, H=H, W=W, n_pol=n_pol),
        out_shape=jax.ShapeDtypeStruct((B // tb, tb, out_w), jnp.float32),
        grid=grid,
        in_specs=[
            pl.BlockSpec((tb, H, W, 4), lambda i: (i, 0, 0, 0)),   # input tile
            pl.BlockSpec((9 * 4, 32), lambda i: (0, 0)),           # conv1 W
            pl.BlockSpec((1, 32), lambda i: (0, 0)),               # conv1 b
            pl.BlockSpec((9 * 32, 64), lambda i: (0, 0)),          # conv2 W
            pl.BlockSpec((1, 64), lambda i: (0, 0)),               # conv2 b
            pl.BlockSpec((9 * 64, 128), lambda i: (0, 0)),         # conv3 W
            pl.BlockSpec((1, 128), lambda i: (0, 0)),              # conv3 b
            pl.BlockSpec((128, 8), lambda i: (0, 0)),              # 1x1 heads W
            pl.BlockSpec((1, 8), lambda i: (0, 0)),                # 1x1 heads b
            pl.BlockSpec((H * W * 8, out_w), lambda i: (0, 0)),    # fused FC W
            pl.BlockSpec((1, out_w), lambda i: (0, 0)),            # fused FC b
            pl.BlockSpec((1, 64), lambda i: (0, 0)),               # value FC2 W
            pl.BlockSpec((1, 1), lambda i: (0, 0)),                # value FC2 b
        ],
        out_specs=pl.BlockSpec((1, tb, out_w), lambda i: (i, 0, 0)),
        scratch_shapes=[
            pltpu.VMEM((tb, H, W, 9 * 4), jnp.float32),    # conv1 patches
            pltpu.VMEM((tb, H, W, 9 * 32), jnp.float32),   # conv2 patches
            pltpu.VMEM((tb, H, W, 9 * 64), jnp.float32),   # conv3 patches
            pltpu.VMEM((tb, H * W, 8), jnp.float32),       # head activations
            pltpu.VMEM((tb, H * W * 8), jnp.float32),      # NHWC flatten
        ],
        compiler_params=pltpu.CompilerParams(dimension_semantics=("parallel",)),
        cost_estimate=pl.CostEstimate(flops=flops,
                                      transcendentals=B * (n_pol + 2),
                                      bytes_accessed=bytes_accessed),
    )(x, params["c1_w"], params["c1_b"], params["c2_w"], params["c2_b"],
      params["c3_w"], params["c3_b"], params["head_w"], params["head_b"],
      params["fc_w"], params["fc_b"], params["vf2_w"], params["vf2_b"])

    out = out.reshape(B, out_w)
    return out[:, :n_pol], out[:, n_pol:n_pol + 1]


# ---------------------------------------------------------------------------
# Parameters
# ---------------------------------------------------------------------------
def init_params(board_width, board_height, key):
    """Deterministic synthetic init in PyTorch layouts (OIHW conv, (in,out) FC)."""
    bw, bh = board_width, board_height
    ks = jax.random.split(key, 16)
    s = 0.05

    def nrm(k, shape):
        return s * jax.random.normal(k, shape, dtype=jnp.float32)

    return {
        "c1_w": nrm(ks[0], (32, 4, 3, 3)),   "c1_b": nrm(ks[1], (32,)),
        "c2_w": nrm(ks[2], (64, 32, 3, 3)),  "c2_b": nrm(ks[3], (64,)),
        "c3_w": nrm(ks[4], (128, 64, 3, 3)), "c3_b": nrm(ks[5], (128,)),
        "pc_w": nrm(ks[6], (4, 128, 1, 1)),  "pc_b": nrm(ks[7], (4,)),
        "pf_w": nrm(ks[8], (4 * bw * bh, bw * bh)), "pf_b": nrm(ks[9], (bw * bh,)),
        "vc_w": nrm(ks[10], (2, 128, 1, 1)), "vc_b": nrm(ks[11], (2,)),
        "vf1_w": nrm(ks[12], (2 * bw * bh, 64)), "vf1_b": nrm(ks[13], (64,)),
        "vf2_w": nrm(ks[14], (64, 1)),           "vf2_b": nrm(ks[15], (1,)),
    }


def prepare_params(p, board_width, board_height):
    """One-time transform of PyTorch-layout params into kernel-friendly layouts."""
    bw, bh = board_width, board_height

    def conv_k(w_oihw):
        # (O,I,3,3) -> K-concatenated (9*I, O) bf16, row = (kh*3+kw)*I + i
        o, i = w_oihw.shape[0], w_oihw.shape[1]
        return jnp.transpose(w_oihw, (2, 3, 1, 0)).reshape(9 * i, o).astype(jnp.bfloat16)

    def row(b):
        return b.reshape(1, -1).astype(jnp.float32)

    # Fused 1x1 head conv: policy(4) + value(2), zero-padded to 8 channels.
    pc = p["pc_w"].reshape(4, 128)
    vc = p["vc_w"].reshape(2, 128)
    head_w = jnp.concatenate([pc, vc, jnp.zeros((2, 128), jnp.float32)], axis=0)
    head_b = jnp.concatenate([p["pc_b"], p["vc_b"], jnp.zeros((2,), jnp.float32)])

    def expand_fc(w_in_out, c_in, c_off):
        # FC rows are torch-flatten (c,h,w); re-index to NHWC flatten (h,w,c8),
        # zero rows for the other head's channels / pads.
        n_out = w_in_out.shape[1]
        w_r = w_in_out.reshape(c_in, bh, bw, n_out)
        w_e = jnp.zeros((8, bh, bw, n_out), jnp.float32).at[c_off:c_off + c_in].set(w_r)
        return jnp.transpose(w_e, (1, 2, 0, 3)).reshape(bh * bw * 8, n_out)

    pf_x = expand_fc(p["pf_w"], 4, 0)        # (H*W*8, H*W)
    vf1_x = expand_fc(p["vf1_w"], 2, 4)      # (H*W*8, 64)

    return {
        "c1_w": conv_k(p["c1_w"]), "c1_b": row(p["c1_b"]),
        "c2_w": conv_k(p["c2_w"]), "c2_b": row(p["c2_b"]),
        "c3_w": conv_k(p["c3_w"]), "c3_b": row(p["c3_b"]),
        "head_w": jnp.transpose(head_w).astype(jnp.bfloat16),     # (128, 8)
        "head_b": row(head_b),                                    # (1, 8)
        "fc_w": jnp.concatenate([pf_x, vf1_x], axis=1).astype(jnp.bfloat16),
        "fc_b": jnp.concatenate([p["pf_b"], p["vf1_b"]]).reshape(1, -1).astype(jnp.float32),
        "vf2_w": p["vf2_w"].reshape(1, 64).astype(jnp.float32),
        "vf2_b": p["vf2_b"].reshape(1, 1).astype(jnp.float32),
    }


# ---------------------------------------------------------------------------
# Pure-JAX reference (mirrors the PyTorch module, NCHW / OIHW, f32)
# ---------------------------------------------------------------------------
def net_reference(raw, x_nchw):
    def conv(x, w, b):
        y = jax.lax.conv_general_dilated(
            x, w, (1, 1), "SAME", dimension_numbers=("NCHW", "OIHW", "NCHW"))
        return jax.nn.relu(y + b.reshape(1, -1, 1, 1))

    B = x_nchw.shape[0]
    y = conv(x_nchw, raw["c1_w"], raw["c1_b"])
    y = conv(y, raw["c2_w"], raw["c2_b"])
    y = conv(y, raw["c3_w"], raw["c3_b"])
    p = conv(y, raw["pc_w"], raw["pc_b"]).reshape(B, -1)
    v = conv(y, raw["vc_w"], raw["vc_b"]).reshape(B, -1)
    x_act = jax.nn.log_softmax(p @ raw["pf_w"] + raw["pf_b"], axis=1)
    h = jax.nn.relu(v @ raw["vf1_w"] + raw["vf1_b"])
    x_val = jnp.tanh(h @ raw["vf2_w"] + raw["vf2_b"])
    return x_act, x_val


if __name__ == "__main__":
    board_width = board_height = 8
    batch = 2

    key = jax.random.PRNGKey(0)
    k_in, k_par = jax.random.split(key)
    raw_params = init_params(board_width, board_height, k_par)
    params = prepare_params(raw_params, board_width, board_height)

    # input: (N, 4, H, W) like PyTorch
    state = jax.random.normal(k_in, (batch, 4, board_height, board_width),
                              dtype=jnp.float32)

    fwd = jax.jit(net_forward)
    x_act, x_val = fwd(params, state)
    jax.block_until_ready((x_act, x_val))

    assert x_act.shape == (batch, board_width * board_height)
    assert x_val.shape == (batch, 1)
    # log_softmax rows must exponentiate-sum to ~1, value in [-1, 1]
    assert jnp.allclose(jnp.sum(jnp.exp(x_act), axis=1), 1.0, atol=1e-4)
    assert bool(jnp.all(jnp.abs(x_val) <= 1.0))

    # cross-check against the pure-JAX f32 reference (bf16 MXU tolerance)
    ref_act, ref_val = net_reference(raw_params, state)
    assert jnp.allclose(x_act, ref_act, atol=3e-2), \
        float(jnp.max(jnp.abs(x_act - ref_act)))
    assert jnp.allclose(x_val, ref_val, atol=3e-2), \
        float(jnp.max(jnp.abs(x_val - ref_val)))

    print("KERNEL_OK")
</pallas_src>

<mosaic_0001>
module attributes {stable_mosaic.version = 11 : i64} {
  func.func @_net_fused_kernel(%arg0: i32, %arg1: memref<1x8x8x4xf32, #tpu.memory_space<vmem>>, %arg2: memref<36x32xbf16, #tpu.memory_space<vmem>>, %arg3: memref<1x32xf32, #tpu.memory_space<vmem>>, %arg4: memref<288x64xbf16, #tpu.memory_space<vmem>>, %arg5: memref<1x64xf32, #tpu.memory_space<vmem>>, %arg6: memref<576x128xbf16, #tpu.memory_space<vmem>>, %arg7: memref<1x128xf32, #tpu.memory_space<vmem>>, %arg8: memref<128x8xbf16, #tpu.memory_space<vmem>>, %arg9: memref<1x8xf32, #tpu.memory_space<vmem>>, %arg10: memref<512x128xbf16, #tpu.memory_space<vmem>>, %arg11: memref<1x128xf32, #tpu.memory_space<vmem>>, %arg12: memref<1x64xf32, #tpu.memory_space<vmem>>, %arg13: memref<1x1xf32, #tpu.memory_space<vmem>>, %arg14: memref<1x1x128xf32, #tpu.memory_space<vmem>>, %arg15: memref<1x8x8x36xf32, #tpu.memory_space<vmem>>, %arg16: memref<1x8x8x288xf32, #tpu.memory_space<vmem>>, %arg17: memref<1x8x8x576xf32, #tpu.memory_space<vmem>>, %arg18: memref<1x64x8xf32, #tpu.memory_space<vmem>>, %arg19: memref<1x512xf32, #tpu.memory_space<vmem>>) attributes {dimension_semantics = [#tpu.dimension_semantics<parallel>], iteration_bounds = array<i64: 2>, scalar_prefetch = 0 : i64, scratch_operands = 5 : i64, tpu.core_type = #tpu.core_type<tc>, window_params = [{transform_indices = @transform_0, window_bounds = array<i64: 1, 8, 8, 4>}, {pipeline_mode = #tpu.pipeline_mode<synchronous>, transform_indices = @transform_1, window_bounds = array<i64: 36, 32>}, {pipeline_mode = #tpu.pipeline_mode<synchronous>, transform_indices = @transform_2, window_bounds = array<i64: 1, 32>}, {pipeline_mode = #tpu.pipeline_mode<synchronous>, transform_indices = @transform_3, window_bounds = array<i64: 288, 64>}, {pipeline_mode = #tpu.pipeline_mode<synchronous>, transform_indices = @transform_4, window_bounds = array<i64: 1, 64>}, {pipeline_mode = #tpu.pipeline_mode<synchronous>, transform_indices = @transform_5, window_bounds = array<i64: 576, 128>}, {pipeline_mode = #tpu.pipeline_mode<synchronous>, transform_indices = @transform_6, window_bounds = array<i64: 1, 128>}, {pipeline_mode = #tpu.pipeline_mode<synchronous>, transform_indices = @transform_7, window_bounds = array<i64: 128, 8>}, {pipeline_mode = #tpu.pipeline_mode<synchronous>, transform_indices = @transform_8, window_bounds = array<i64: 1, 8>}, {pipeline_mode = #tpu.pipeline_mode<synchronous>, transform_indices = @transform_9, window_bounds = array<i64: 512, 128>}, {pipeline_mode = #tpu.pipeline_mode<synchronous>, transform_indices = @transform_10, window_bounds = array<i64: 1, 128>}, {pipeline_mode = #tpu.pipeline_mode<synchronous>, transform_indices = @transform_11, window_bounds = array<i64: 1, 64>}, {pipeline_mode = #tpu.pipeline_mode<synchronous>, transform_indices = @transform_12, window_bounds = array<i64: 1, 1>}, {transform_indices = @transform_13, window_bounds = array<i64: 1, 1, 128>}]} {
    %c0 = arith.constant 0 : index
    %c0_0 = arith.constant 0 : index
    %c0_1 = arith.constant 0 : index
    %c0_2 = arith.constant 0 : index
    %0 = vector.load %arg1[%c0, %c0_0, %c0_1, %c0_2] : memref<1x8x8x4xf32, #tpu.memory_space<vmem>>, vector<1x8x8x4xf32>
    %cst = arith.constant 0.000000e+00 : f32
    %1 = vector.broadcast %cst : f32 to vector<1x1x8x4xf32>
    %cst_3 = arith.constant 0.000000e+00 : f32
    %2 = vector.broadcast %cst_3 : f32 to vector<1x8x1x4xf32>
    %c0_4 = arith.constant 0 : index
    %c0_5 = arith.constant 0 : index
    %c0_6 = arith.constant 0 : index
    %c0_7 = arith.constant 0 : index
    %3 = vector.load %arg15[%c0_4, %c0_5, %c0_6, %c0_7] : memref<1x8x8x36xf32, #tpu.memory_space<vmem>>, vector<1x1x8x4xf32>
    tpu.vector_store %arg15[%c0_4, %c0_5, %c0_6, %c0_7], %1 {strides = array<i32>} : memref<1x8x8x36xf32, #tpu.memory_space<vmem>>, vector<1x1x8x4xf32>,
    %c0_8 = arith.constant 0 : index
    %c0_9 = arith.constant 0 : index
    %c0_10 = arith.constant 0 : index
    %c0_11 = arith.constant 0 : index
    %4 = vector.load %arg15[%c0_8, %c0_9, %c0_10, %c0_11] : memref<1x8x8x36xf32, #tpu.memory_space<vmem>>, vector<1x8x1x4xf32>
    tpu.vector_store %arg15[%c0_8, %c0_9, %c0_10, %c0_11], %2 {strides = array<i32>} : memref<1x8x8x36xf32, #tpu.memory_space<vmem>>, vector<1x8x1x4xf32>,
    %5 = vector.extract_strided_slice %0 {offsets = [0, 0, 0, 0], sizes = [1, 7, 7, 4], strides = [1, 1, 1, 1]} : vector<1x8x8x4xf32> to vector<1x7x7x4xf32>
    %c0_12 = arith.constant 0 : index
    %c1 = arith.constant 1 : index
    %c1_13 = arith.constant 1 : index
    %c0_14 = arith.constant 0 : index
    %6 = vector.load %arg15[%c0_12, %c1, %c1_13, %c0_14] : memref<1x8x8x36xf32, #tpu.memory_space<vmem>>, vector<1x7x7x4xf32>
    tpu.vector_store %arg15[%c0_12, %c1, %c1_13, %c0_14], %5 {strides = array<i32>} : memref<1x8x8x36xf32, #tpu.memory_space<vmem>>, vector<1x7x7x4xf32>,
    %c0_15 = arith.constant 0 : index
    %c0_16 = arith.constant 0 : index
    %c0_17 = arith.constant 0 : index
    %c4 = arith.constant 4 : index
    %7 = vector.load %arg15[%c0_15, %c0_16, %c0_17, %c4] : memref<1x8x8x36xf32, #tpu.memory_space<vmem>>, vector<1x1x8x4xf32>
    tpu.vector_store %arg15[%c0_15, %c0_16, %c0_17, %c4], %1 {strides = array<i32>} : memref<1x8x8x36xf32, #tpu.memory_space<vmem>>, vector<1x1x8x4xf32>,
    %8 = vector.extract_strided_slice %0 {offsets = [0, 0, 0, 0], sizes = [1, 7, 8, 4], strides = [1, 1, 1, 1]} : vector<1x8x8x4xf32> to vector<1x7x8x4xf32>
    %c0_18 = arith.constant 0 : index
    %c1_19 = arith.constant 1 : index
    %c0_20 = arith.constant 0 : index
    %c4_21 = arith.constant 4 : index
    %9 = vector.load %arg15[%c0_18, %c1_19, %c0_20, %c4_21] : memref<1x8x8x36xf32, #tpu.memory_space<vmem>>, vector<1x7x8x4xf32>
    tpu.vector_store %arg15[%c0_18, %c1_19, %c0_20, %c4_21], %8 {strides = array<i32>} : memref<1x8x8x36xf32, #tpu.memory_space<vmem>>, vector<1x7x8x4xf32>,
    %c0_22 = arith.constant 0 : index
    %c0_23 = arith.constant 0 : index
    %c0_24 = arith.constant 0 : index
    %c8 = arith.constant 8 : index
    %10 = vector.load %arg15[%c0_22, %c0_23, %c0_24, %c8] : memref<1x8x8x36xf32, #tpu.memory_space<vmem>>, vector<1x1x8x4xf32>
    tpu.vector_store %arg15[%c0_22, %c0_23, %c0_24, %c8], %1 {strides = array<i32>} : memref<1x8x8x36xf32, #tpu.memory_space<vmem>>, vector<1x1x8x4xf32>,
    %c0_25 = arith.constant 0 : index
    %c0_26 = arith.constant 0 : index
    %c7 = arith.constant 7 : index
    %c8_27 = arith.constant 8 : index
    %11 = vector.load %arg15[%c0_25, %c0_26, %c7, %c8_27] : memref<1x8x8x36xf32, #tpu.memory_space<vmem>>, vector<1x8x1x4xf32>
    tpu.vector_store %arg15[%c0_25, %c0_26, %c7, %c8_27], %2 {strides = array<i32>} : memref<1x8x8x36xf32, #tpu.memory_space<vmem>>, vector<1x8x1x4xf32>,
    %12 = vector.extract_strided_slice %0 {offsets = [0, 0, 1, 0], sizes = [1, 7, 7, 4], strides = [1, 1, 1, 1]} : vector<1x8x8x4xf32> to vector<1x7x7x4xf32>
    %c0_28 = arith.constant 0 : index
    %c1_29 = arith.constant 1 : index
    %c0_30 = arith.constant 0 : index
    %c8_31 = arith.constant 8 : index
    %13 = vector.load %arg15[%c0_28, %c1_29, %c0_30, %c8_31] : memref<1x8x8x36xf32, #tpu.memory_space<vmem>>, vector<1x7x7x4xf32>
    tpu.vector_store %arg15[%c0_28, %c1_29, %c0_30, %c8_31], %12 {strides = array<i32>} : memref<1x8x8x36xf32, #tpu.memory_space<vmem>>, vector<1x7x7x4xf32>,
    %c0_32 = arith.constant 0 : index
    %c0_33 = arith.constant 0 : index
    %c0_34 = arith.constant 0 : index
    %c12 = arith.constant 12 : index
    %14 = vector.load %arg15[%c0_32, %c0_33, %c0_34, %c12] : memref<1x8x8x36xf32, #tpu.memory_space<vmem>>, vector<1x8x1x4xf32>
    tpu.vector_store %arg15[%c0_32, %c0_33, %c0_34, %c12], %2 {strides = array<i32>} : memref<1x8x8x36xf32, #tpu.memory_space<vmem>>, vector<1x8x1x4xf32>,
    %15 = vector.extract_strided_slice %0 {offsets = [0, 0, 0, 0], sizes = [1, 8, 7, 4], strides = [1, 1, 1, 1]} : vector<1x8x8x4xf32> to vector<1x8x7x4xf32>
    %c0_35 = arith.constant 0 : index
    %c0_36 = arith.constant 0 : index
    %c1_37 = arith.constant 1 : index
    %c12_38 = arith.constant 12 : index
    %16 = vector.load %arg15[%c0_35, %c0_36, %c1_37, %c12_38] : memref<1x8x8x36xf32, #tpu.memory_space<vmem>>, vector<1x8x7x4xf32>
    tpu.vector_store %arg15[%c0_35, %c0_36, %c1_37, %c12_38], %15 {strides = array<i32>} : memref<1x8x8x36xf32, #tpu.memory_space<vmem>>, vector<1x8x7x4xf32>,
    %c0_39 = arith.constant 0 : index
    %c0_40 = arith.constant 0 : index
    %c0_41 = arith.constant 0 : index
    %c16 = arith.constant 16 : index
    %17 = vector.load %arg15[%c0_39, %c0_40, %c0_41, %c16] : memref<1x8x8x36xf32, #tpu.memory_space<vmem>>, vector<1x8x8x4xf32>
    tpu.vector_store %arg15[%c0_39, %c0_40, %c0_41, %c16], %0 {strides = array<i32>} : memref<1x8x8x36xf32, #tpu.memory_space<vmem>>, vector<1x8x8x4xf32>,
    %c0_42 = arith.constant 0 : index
    %c0_43 = arith.constant 0 : index
    %c7_44 = arith.constant 7 : index
    %c20 = arith.constant 20 : index
    %18 = vector.load %arg15[%c0_42, %c0_43, %c7_44, %c20] : memref<1x8x8x36xf32, #tpu.memory_space<vmem>>, vector<1x8x1x4xf32>
    tpu.vector_store %arg15[%c0_42, %c0_43, %c7_44, %c20], %2 {strides = array<i32>} : memref<1x8x8x36xf32, #tpu.memory_space<vmem>>, vector<1x8x1x4xf32>,
    %19 = vector.extract_strided_slice %0 {offsets = [0, 0, 1, 0], sizes = [1, 8, 7, 4], strides = [1, 1, 1, 1]} : vector<1x8x8x4xf32> to vector<1x8x7x4xf32>
    %c0_45 = arith.constant 0 : index
    %c0_46 = arith.constant 0 : index
    %c0_47 = arith.constant 0 : index
    %c20_48 = arith.constant 20 : index
    %20 = vector.load %arg15[%c0_45, %c0_46, %c0_47, %c20_48] : memref<1x8x8x36xf32, #tpu.memory_space<vmem>>, vector<1x8x7x4xf32>
    tpu.vector_store %arg15[%c0_45, %c0_46, %c0_47, %c20_48], %19 {strides = array<i32>} : memref<1x8x8x36xf32, #tpu.memory_space<vmem>>, vector<1x8x7x4xf32>,
    %c0_49 = arith.constant 0 : index
    %c7_50 = arith.constant 7 : index
    %c0_51 = arith.constant 0 : index
    %c24 = arith.constant 24 : index
    %21 = vector.load %arg15[%c0_49, %c7_50, %c0_51, %c24] : memref<1x8x8x36xf32, #tpu.memory_space<vmem>>, vector<1x1x8x4xf32>
    tpu.vector_store %arg15[%c0_49, %c7_50, %c0_51, %c24], %1 {strides = array<i32>} : memref<1x8x8x36xf32, #tpu.memory_space<vmem>>, vector<1x1x8x4xf32>,
    %c0_52 = arith.constant 0 : index
    %c0_53 = arith.constant 0 : index
    %c0_54 = arith.constant 0 : index
    %c24_55 = arith.constant 24 : index
    %22 = vector.load %arg15[%c0_52, %c0_53, %c0_54, %c24_55] : memref<1x8x8x36xf32, #tpu.memory_space<vmem>>, vector<1x8x1x4xf32>
    tpu.vector_store %arg15[%c0_52, %c0_53, %c0_54, %c24_55], %2 {strides = array<i32>} : memref<1x8x8x36xf32, #tpu.memory_space<vmem>>, vector<1x8x1x4xf32>,
    %23 = vector.extract_strided_slice %0 {offsets = [0, 1, 0, 0], sizes = [1, 7, 7, 4], strides = [1, 1, 1, 1]} : vector<1x8x8x4xf32> to vector<1x7x7x4xf32>
    %c0_56 = arith.constant 0 : index
    %c0_57 = arith.constant 0 : index
    %c1_58 = arith.constant 1 : index
    %c24_59 = arith.constant 24 : index
    %24 = vector.load %arg15[%c0_56, %c0_57, %c1_58, %c24_59] : memref<1x8x8x36xf32, #tpu.memory_space<vmem>>, vector<1x7x7x4xf32>
    tpu.vector_store %arg15[%c0_56, %c0_57, %c1_58, %c24_59], %23 {strides = array<i32>} : memref<1x8x8x36xf32, #tpu.memory_space<vmem>>, vector<1x7x7x4xf32>,
    %c0_60 = arith.constant 0 : index
    %c7_61 = arith.constant 7 : index
    %c0_62 = arith.constant 0 : index
    %c28 = arith.constant 28 : index
    %25 = vector.load %arg15[%c0_60, %c7_61, %c0_62, %c28] : memref<1x8x8x36xf32, #tpu.memory_space<vmem>>, vector<1x1x8x4xf32>
    tpu.vector_store %arg15[%c0_60, %c7_61, %c0_62, %c28], %1 {strides = array<i32>} : memref<1x8x8x36xf32, #tpu.memory_space<vmem>>, vector<1x1x8x4xf32>,
    %26 = vector.extract_strided_slice %0 {offsets = [0, 1, 0, 0], sizes = [1, 7, 8, 4], strides = [1, 1, 1, 1]} : vector<1x8x8x4xf32> to vector<1x7x8x4xf32>
    %c0_63 = arith.constant 0 : index
    %c0_64 = arith.constant 0 : index
    %c0_65 = arith.constant 0 : index
    %c28_66 = arith.constant 28 : index
    %27 = vector.load %arg15[%c0_63, %c0_64, %c0_65, %c28_66] : memref<1x8x8x36xf32, #tpu.memory_space<vmem>>, vector<1x7x8x4xf32>
    tpu.vector_store %arg15[%c0_63, %c0_64, %c0_65, %c28_66], %26 {strides = array<i32>} : memref<1x8x8x36xf32, #tpu.memory_space<vmem>>, vector<1x7x8x4xf32>,
    %c0_67 = arith.constant 0 : index
    %c7_68 = arith.constant 7 : index
    %c0_69 = arith.constant 0 : index
    %c32 = arith.constant 32 : index
    %28 = vector.load %arg15[%c0_67, %c7_68, %c0_69, %c32] : memref<1x8x8x36xf32, #tpu.memory_space<vmem>>, vector<1x1x8x4xf32>
    tpu.vector_store %arg15[%c0_67, %c7_68, %c0_69, %c32], %1 {strides = array<i32>} : memref<1x8x8x36xf32, #tpu.memory_space<vmem>>, vector<1x1x8x4xf32>,
    %c0_70 = arith.constant 0 : index
    %c0_71 = arith.constant 0 : index
    %c7_72 = arith.constant 7 : index
    %c32_73 = arith.constant 32 : index
    %29 = vector.load %arg15[%c0_70, %c0_71, %c7_72, %c32_73] : memref<1x8x8x36xf32, #tpu.memory_space<vmem>>, vector<1x8x1x4xf32>
    tpu.vector_store %arg15[%c0_70, %c0_71, %c7_72, %c32_73], %2 {strides = array<i32>} : memref<1x8x8x36xf32, #tpu.memory_space<vmem>>, vector<1x8x1x4xf32>,
    %30 = vector.extract_strided_slice %0 {offsets = [0, 1, 1, 0], sizes = [1, 7, 7, 4], strides = [1, 1, 1, 1]} : vector<1x8x8x4xf32> to vector<1x7x7x4xf32>
    %c0_74 = arith.constant 0 : index
    %c0_75 = arith.constant 0 : index
    %c0_76 = arith.constant 0 : index
    %c32_77 = arith.constant 32 : index
    %31 = vector.load %arg15[%c0_74, %c0_75, %c0_76, %c32_77] : memref<1x8x8x36xf32, #tpu.memory_space<vmem>>, vector<1x7x7x4xf32>
    tpu.vector_store %arg15[%c0_74, %c0_75, %c0_76, %c32_77], %30 {strides = array<i32>} : memref<1x8x8x36xf32, #tpu.memory_space<vmem>>, vector<1x7x7x4xf32>,
    %c0_78 = arith.constant 0 : index
    %c0_79 = arith.constant 0 : index
    %c0_80 = arith.constant 0 : index
    %c0_81 = arith.constant 0 : index
    %32 = vector.load %arg15[%c0_78, %c0_79, %c0_80, %c0_81] : memref<1x8x8x36xf32, #tpu.memory_space<vmem>>, vector<1x8x8x36xf32>
    %33 = vector.shape_cast %32 : vector<1x8x8x36xf32> to vector<64x36xf32>
    %34 = arith.truncf %33 : vector<64x36xf32> to vector<64x36xbf16>
    %c0_82 = arith.constant 0 : index
    %c0_83 = arith.constant 0 : index
    %35 = vector.load %arg2[%c0_82, %c0_83] : memref<36x32xbf16, #tpu.memory_space<vmem>>, vector<36x32xbf16>
    %cst_84 = arith.constant dense<0.000000e+00> : vector<64x32xf32>
    %36 = tpu.matmul %34, %35, %cst_84 {dimension_numbers = #tpu.dot_dimension_numbers<[1], [0], [0], [1], [0, 0, 1, 1], [], []>} : vector<64x36xbf16>, vector<36x32xbf16>, vector<64x32xf32> -> vector<64x32xf32>
    %c0_85 = arith.constant 0 : index
    %c0_86 = arith.constant 0 : index
    %37 = vector.load %arg3[%c0_85, %c0_86] : memref<1x32xf32, #tpu.memory_space<vmem>>, vector<1x32xf32>
    %38 = vector.broadcast %37 : vector<1x32xf32> to vector<64x32xf32>
    %39 = arith.addf %36, %38 : vector<64x32xf32>
    %cst_87 = arith.constant 0.000000e+00 : f32
    %40 = vector.broadcast %cst_87 : f32 to vector<64x32xf32>
    %41 = arith.maximumf %39, %40 : vector<64x32xf32>
    %42 = vector.shape_cast %41 : vector<64x32xf32> to vector<1x8x8x32xf32>
    %cst_88 = arith.constant 0.000000e+00 : f32
    %43 = vector.broadcast %cst_88 : f32 to vector<1x1x8x32xf32>
    %cst_89 = arith.constant 0.000000e+00 : f32
    %44 = vector.broadcast %cst_89 : f32 to vector<1x8x1x32xf32>
    %c0_90 = arith.constant 0 : index
    %c0_91 = arith.constant 0 : index
    %c0_92 = arith.constant 0 : index
    %c0_93 = arith.constant 0 : index
    %45 = vector.load %arg16[%c0_90, %c0_91, %c0_92, %c0_93] : memref<1x8x8x288xf32, #tpu.memory_space<vmem>>, vector<1x1x8x32xf32>
    tpu.vector_store %arg16[%c0_90, %c0_91, %c0_92, %c0_93], %43 {strides = array<i32>} : memref<1x8x8x288xf32, #tpu.memory_space<vmem>>, vector<1x1x8x32xf32>,
    %c0_94 = arith.constant 0 : index
    %c0_95 = arith.constant 0 : index
    %c0_96 = arith.constant 0 : index
    %c0_97 = arith.constant 0 : index
    %46 = vector.load %arg16[%c0_94, %c0_95, %c0_96, %c0_97] : memref<1x8x8x288xf32, #tpu.memory_space<vmem>>, vector<1x8x1x32xf32>
    tpu.vector_store %arg16[%c0_94, %c0_95, %c0_96, %c0_97], %44 {strides = array<i32>} : memref<1x8x8x288xf32, #tpu.memory_space<vmem>>, vector<1x8x1x32xf32>,
    %47 = vector.extract_strided_slice %42 {offsets = [0, 0, 0, 0], sizes = [1, 7, 7, 32], strides = [1, 1, 1, 1]} : vector<1x8x8x32xf32> to vector<1x7x7x32xf32>
    %c0_98 = arith.constant 0 : index
    %c1_99 = arith.constant 1 : index
    %c1_100 = arith.constant 1 : index
    %c0_101 = arith.constant 0 : index
    %48 = vector.load %arg16[%c0_98, %c1_99, %c1_100, %c0_101] : memref<1x8x8x288xf32, #tpu.memory_space<vmem>>, vector<1x7x7x32xf32>
    tpu.vector_store %arg16[%c0_98, %c1_99, %c1_100, %c0_101], %47 {strides = array<i32>} : memref<1x8x8x288xf32, #tpu.memory_space<vmem>>, vector<1x7x7x32xf32>,
    %c0_102 = arith.constant 0 : index
    %c0_103 = arith.constant 0 : index
    %c0_104 = arith.constant 0 : index
    %c32_105 = arith.constant 32 : index
    %49 = vector.load %arg16[%c0_102, %c0_103, %c0_104, %c32_105] : memref<1x8x8x288xf32, #tpu.memory_space<vmem>>, vector<1x1x8x32xf32>
    tpu.vector_store %arg16[%c0_102, %c0_103, %c0_104, %c32_105], %43 {strides = array<i32>} : memref<1x8x8x288xf32, #tpu.memory_space<vmem>>, vector<1x1x8x32xf32>,
    %50 = vector.extract_strided_slice %42 {offsets = [0, 0, 0, 0], sizes = [1, 7, 8, 32], strides = [1, 1, 1, 1]} : vector<1x8x8x32xf32> to vector<1x7x8x32xf32>
    %c0_106 = arith.constant 0 : index
    %c1_107 = arith.constant 1 : index
    %c0_108 = arith.constant 0 : index
    %c32_109 = arith.constant 32 : index
    %51 = vector.load %arg16[%c0_106, %c1_107, %c0_108, %c32_109] : memref<1x8x8x288xf32, #tpu.memory_space<vmem>>, vector<1x7x8x32xf32>
    tpu.vector_store %arg16[%c0_106, %c1_107, %c0_108, %c32_109], %50 {strides = array<i32>} : memref<1x8x8x288xf32, #tpu.memory_space<vmem>>, vector<1x7x8x32xf32>,
    %c0_110 = arith.constant 0 : index
    %c0_111 = arith.constant 0 : index
    %c0_112 = arith.constant 0 : index
    %c64 = arith.constant 64 : index
    %52 = vector.load %arg16[%c0_110, %c0_111, %c0_112, %c64] : memref<1x8x8x288xf32, #tpu.memory_space<vmem>>, vector<1x1x8x32xf32>
    tpu.vector_store %arg16[%c0_110, %c0_111, %c0_112, %c64], %43 {strides = array<i32>} : memref<1x8x8x288xf32, #tpu.memory_space<vmem>>, vector<1x1x8x32xf32>,
    %c0_113 = arith.constant 0 : index
    %c0_114 = arith.constant 0 : index
    %c7_115 = arith.constant 7 : index
    %c64_116 = arith.constant 64 : index
    %53 = vector.load %arg16[%c0_113, %c0_114, %c7_115, %c64_116] : memref<1x8x8x288xf32, #tpu.memory_space<vmem>>, vector<1x8x1x32xf32>
    tpu.vector_store %arg16[%c0_113, %c0_114, %c7_115, %c64_116], %44 {strides = array<i32>} : memref<1x8x8x288xf32, #tpu.memory_space<vmem>>, vector<1x8x1x32xf32>,
    %54 = vector.extract_strided_slice %42 {offsets = [0, 0, 1, 0], sizes = [1, 7, 7, 32], strides = [1, 1, 1, 1]} : vector<1x8x8x32xf32> to vector<1x7x7x32xf32>
    %c0_117 = arith.constant 0 : index
    %c1_118 = arith.constant 1 : index
    %c0_119 = arith.constant 0 : index
    %c64_120 = arith.constant 64 : index
    %55 = vector.load %arg16[%c0_117, %c1_118, %c0_119, %c64_120] : memref<1x8x8x288xf32, #tpu.memory_space<vmem>>, vector<1x7x7x32xf32>
    tpu.vector_store %arg16[%c0_117, %c1_118, %c0_119, %c64_120], %54 {strides = array<i32>} : memref<1x8x8x288xf32, #tpu.memory_space<vmem>>, vector<1x7x7x32xf32>,
    %c0_121 = arith.constant 0 : index
    %c0_122 = arith.constant 0 : index
    %c0_123 = arith.constant 0 : index
    %c96 = arith.constant 96 : index
    %56 = vector.load %arg16[%c0_121, %c0_122, %c0_123, %c96] : memref<1x8x8x288xf32, #tpu.memory_space<vmem>>, vector<1x8x1x32xf32>
    tpu.vector_store %arg16[%c0_121, %c0_122, %c0_123, %c96], %44 {strides = array<i32>} : memref<1x8x8x288xf32, #tpu.memory_space<vmem>>, vector<1x8x1x32xf32>,
    %57 = vector.extract_strided_slice %42 {offsets = [0, 0, 0, 0], sizes = [1, 8, 7, 32], strides = [1, 1, 1, 1]} : vector<1x8x8x32xf32> to vector<1x8x7x32xf32>
    %c0_124 = arith.constant 0 : index
    %c0_125 = arith.constant 0 : index
    %c1_126 = arith.constant 1 : index
    %c96_127 = arith.constant 96 : index
    %58 = vector.load %arg16[%c0_124, %c0_125, %c1_126, %c96_127] : memref<1x8x8x288xf32, #tpu.memory_space<vmem>>, vector<1x8x7x32xf32>
    tpu.vector_store %arg16[%c0_124, %c0_125, %c1_126, %c96_127], %57 {strides = array<i32>} : memref<1x8x8x288xf32, #tpu.memory_space<vmem>>, vector<1x8x7x32xf32>,
    %c0_128 = arith.constant 0 : index
    %c0_129 = arith.constant 0 : index
    %c0_130 = arith.constant 0 : index
    %c128 = arith.constant 128 : index
    %59 = vector.load %arg16[%c0_128, %c0_129, %c0_130, %c128] : memref<1x8x8x288xf32, #tpu.memory_space<vmem>>, vector<1x8x8x32xf32>
    tpu.vector_store %arg16[%c0_128, %c0_129, %c0_130, %c128], %42 {strides = array<i32>} : memref<1x8x8x288xf32, #tpu.memory_space<vmem>>, vector<1x8x8x32xf32>,
    %c0_131 = arith.constant 0 : index
    %c0_132 = arith.constant 0 : index
    %c7_133 = arith.constant 7 : index
    %c160 = arith.constant 160 : index
    %60 = vector.load %arg16[%c0_131, %c0_132, %c7_133, %c160] : memref<1x8x8x288xf32, #tpu.memory_space<vmem>>, vector<1x8x1x32xf32>
    tpu.vector_store %arg16[%c0_131, %c0_132, %c7_133, %c160], %44 {strides = array<i32>} : memref<1x8x8x288xf32, #tpu.memory_space<vmem>>, vector<1x8x1x32xf32>,
    %61 = vector.extract_strided_slice %42 {offsets = [0, 0, 1, 0], sizes = [1, 8, 7, 32], strides = [1, 1, 1, 1]} : vector<1x8x8x32xf32> to vector<1x8x7x32xf32>
    %c0_134 = arith.constant 0 : index
    %c0_135 = arith.constant 0 : index
    %c0_136 = arith.constant 0 : index
    %c160_137 = arith.constant 160 : index
    %62 = vector.load %arg16[%c0_134, %c0_135, %c0_136, %c160_137] : memref<1x8x8x288xf32, #tpu.memory_space<vmem>>, vector<1x8x7x32xf32>
    tpu.vector_store %arg16[%c0_134, %c0_135, %c0_136, %c160_137], %61 {strides = array<i32>} : memref<1x8x8x288xf32, #tpu.memory_space<vmem>>, vector<1x8x7x32xf32>,
    %c0_138 = arith.constant 0 : index
    %c7_139 = arith.constant 7 : index
    %c0_140 = arith.constant 0 : index
    %c192 = arith.constant 192 : index
    %63 = vector.load %arg16[%c0_138, %c7_139, %c0_140, %c192] : memref<1x8x8x288xf32, #tpu.memory_space<vmem>>, vector<1x1x8x32xf32>
    tpu.vector_store %arg16[%c0_138, %c7_139, %c0_140, %c192], %43 {strides = array<i32>} : memref<1x8x8x288xf32, #tpu.memory_space<vmem>>, vector<1x1x8x32xf32>,
    %c0_141 = arith.constant 0 : index
    %c0_142 = arith.constant 0 : index
    %c0_143 = arith.constant 0 : index
    %c192_144 = arith.constant 192 : index
    %64 = vector.load %arg16[%c0_141, %c0_142, %c0_143, %c192_144] : memref<1x8x8x288xf32, #tpu.memory_space<vmem>>, vector<1x8x1x32xf32>
    tpu.vector_store %arg16[%c0_141, %c0_142, %c0_143, %c192_144], %44 {strides = array<i32>} : memref<1x8x8x288xf32, #tpu.memory_space<vmem>>, vector<1x8x1x32xf32>,
    %65 = vector.extract_strided_slice %42 {offsets = [0, 1, 0, 0], sizes = [1, 7, 7, 32], strides = [1, 1, 1, 1]} : vector<1x8x8x32xf32> to vector<1x7x7x32xf32>
    %c0_145 = arith.constant 0 : index
    %c0_146 = arith.constant 0 : index
    %c1_147 = arith.constant 1 : index
    %c192_148 = arith.constant 192 : index
    %66 = vector.load %arg16[%c0_145, %c0_146, %c1_147, %c192_148] : memref<1x8x8x288xf32, #tpu.memory_space<vmem>>, vector<1x7x7x32xf32>
    tpu.vector_store %arg16[%c0_145, %c0_146, %c1_147, %c192_148], %65 {strides = array<i32>} : memref<1x8x8x288xf32, #tpu.memory_space<vmem>>, vector<1x7x7x32xf32>,
    %c0_149 = arith.constant 0 : index
    %c7_150 = arith.constant 7 : index
    %c0_151 = arith.constant 0 : index
    %c224 = arith.constant 224 : index
    %67 = vector.load %arg16[%c0_149, %c7_150, %c0_151, %c224] : memref<1x8x8x288xf32, #tpu.memory_space<vmem>>, vector<1x1x8x32xf32>
    tpu.vector_store %arg16[%c0_149, %c7_150, %c0_151, %c224], %43 {strides = array<i32>} : memref<1x8x8x288xf32, #tpu.memory_space<vmem>>, vector<1x1x8x32xf32>,
    %68 = vector.extract_strided_slice %42 {offsets = [0, 1, 0, 0], sizes = [1, 7, 8, 32], strides = [1, 1, 1, 1]} : vector<1x8x8x32xf32> to vector<1x7x8x32xf32>
    %c0_152 = arith.constant 0 : index
    %c0_153 = arith.constant 0 : index
    %c0_154 = arith.constant 0 : index
    %c224_155 = arith.constant 224 : index
    %69 = vector.load %arg16[%c0_152, %c0_153, %c0_154, %c224_155] : memref<1x8x8x288xf32, #tpu.memory_space<vmem>>, vector<1x7x8x32xf32>
    tpu.vector_store %arg16[%c0_152, %c0_153, %c0_154, %c224_155], %68 {strides = array<i32>} : memref<1x8x8x288xf32, #tpu.memory_space<vmem>>, vector<1x7x8x32xf32>,
    %c0_156 = arith.constant 0 : index
    %c7_157 = arith.constant 7 : index
    %c0_158 = arith.constant 0 : index
    %c256 = arith.constant 256 : index
    %70 = vector.load %arg16[%c0_156, %c7_157, %c0_158, %c256] : memref<1x8x8x288xf32, #tpu.memory_space<vmem>>, vector<1x1x8x32xf32>
    tpu.vector_store %arg16[%c0_156, %c7_157, %c0_158, %c256], %43 {strides = array<i32>} : memref<1x8x8x288xf32, #tpu.memory_space<vmem>>, vector<1x1x8x32xf32>,
    %c0_159 = arith.constant 0 : index
    %c0_160 = arith.constant 0 : index
    %c7_161 = arith.constant 7 : index
    %c256_162 = arith.constant 256 : index
    %71 = vector.load %arg16[%c0_159, %c0_160, %c7_161, %c256_162] : memref<1x8x8x288xf32, #tpu.memory_space<vmem>>, vector<1x8x1x32xf32>
    tpu.vector_store %arg16[%c0_159, %c0_160, %c7_161, %c256_162], %44 {strides = array<i32>} : memref<1x8x8x288xf32, #tpu.memory_space<vmem>>, vector<1x8x1x32xf32>,
    %72 = vector.extract_strided_slice %42 {offsets = [0, 1, 1, 0], sizes = [1, 7, 7, 32], strides = [1, 1, 1, 1]} : vector<1x8x8x32xf32> to vector<1x7x7x32xf32>
    %c0_163 = arith.constant 0 : index
    %c0_164 = arith.constant 0 : index
    %c0_165 = arith.constant 0 : index
    %c256_166 = arith.constant 256 : index
    %73 = vector.load %arg16[%c0_163, %c0_164, %c0_165, %c256_166] : memref<1x8x8x288xf32, #tpu.memory_space<vmem>>, vector<1x7x7x32xf32>
    tpu.vector_store %arg16[%c0_163, %c0_164, %c0_165, %c256_166], %72 {strides = array<i32>} : memref<1x8x8x288xf32, #tpu.memory_space<vmem>>, vector<1x7x7x32xf32>,
    %c0_167 = arith.constant 0 : index
    %c0_168 = arith.constant 0 : index
    %c0_169 = arith.constant 0 : index
    %c0_170 = arith.constant 0 : index
    %74 = vector.load %arg16[%c0_167, %c0_168, %c0_169, %c0_170] : memref<1x8x8x288xf32, #tpu.memory_space<vmem>>, vector<1x8x8x288xf32>
    %75 = vector.shape_cast %74 : vector<1x8x8x288xf32> to vector<64x288xf32>
    %76 = arith.truncf %75 : vector<64x288xf32> to vector<64x288xbf16>
    %c0_171 = arith.constant 0 : index
    %c0_172 = arith.constant 0 : index
    %77 = vector.load %arg4[%c0_171, %c0_172] : memref<288x64xbf16, #tpu.memory_space<vmem>>, vector<288x64xbf16>
    %cst_173 = arith.constant dense<0.000000e+00> : vector<64x64xf32>
    %78 = tpu.matmul %76, %77, %cst_173 {dimension_numbers = #tpu.dot_dimension_numbers<[1], [0], [0], [1], [0, 0, 1, 1], [], []>} : vector<64x288xbf16>, vector<288x64xbf16>, vector<64x64xf32> -> vector<64x64xf32>
    %c0_174 = arith.constant 0 : index
    %c0_175 = arith.constant 0 : index
    %79 = vector.load %arg5[%c0_174, %c0_175] : memref<1x64xf32, #tpu.memory_space<vmem>>, vector<1x64xf32>
    %80 = vector.broadcast %79 : vector<1x64xf32> to vector<64x64xf32>
    %81 = arith.addf %78, %80 : vector<64x64xf32>
    %cst_176 = arith.constant 0.000000e+00 : f32
    %82 = vector.broadcast %cst_176 : f32 to vector<64x64xf32>
    %83 = arith.maximumf %81, %82 : vector<64x64xf32>
    %84 = vector.shape_cast %83 : vector<64x64xf32> to vector<1x8x8x64xf32>
    %cst_177 = arith.constant 0.000000e+00 : f32
    %85 = vector.broadcast %cst_177 : f32 to vector<1x1x8x64xf32>
    %cst_178 = arith.constant 0.000000e+00 : f32
    %86 = vector.broadcast %cst_178 : f32 to vector<1x8x1x64xf32>
    %c0_179 = arith.constant 0 : index
    %c0_180 = arith.constant 0 : index
    %c0_181 = arith.constant 0 : index
    %c0_182 = arith.constant 0 : index
    %87 = vector.load %arg17[%c0_179, %c0_180, %c0_181, %c0_182] : memref<1x8x8x576xf32, #tpu.memory_space<vmem>>, vector<1x1x8x64xf32>
    tpu.vector_store %arg17[%c0_179, %c0_180, %c0_181, %c0_182], %85 {strides = array<i32>} : memref<1x8x8x576xf32, #tpu.memory_space<vmem>>, vector<1x1x8x64xf32>,
    %c0_183 = arith.constant 0 : index
    %c0_184 = arith.constant 0 : index
    %c0_185 = arith.constant 0 : index
    %c0_186 = arith.constant 0 : index
    %88 = vector.load %arg17[%c0_183, %c0_184, %c0_185, %c0_186] : memref<1x8x8x576xf32, #tpu.memory_space<vmem>>, vector<1x8x1x64xf32>
    tpu.vector_store %arg17[%c0_183, %c0_184, %c0_185, %c0_186], %86 {strides = array<i32>} : memref<1x8x8x576xf32, #tpu.memory_space<vmem>>, vector<1x8x1x64xf32>,
    %89 = vector.extract_strided_slice %84 {offsets = [0, 0, 0, 0], sizes = [1, 7, 7, 64], strides = [1, 1, 1, 1]} : vector<1x8x8x64xf32> to vector<1x7x7x64xf32>
    %c0_187 = arith.constant 0 : index
    %c1_188 = arith.constant 1 : index
    %c1_189 = arith.constant 1 : index
    %c0_190 = arith.constant 0 : index
    %90 = vector.load %arg17[%c0_187, %c1_188, %c1_189, %c0_190] : memref<1x8x8x576xf32, #tpu.memory_space<vmem>>, vector<1x7x7x64xf32>
    tpu.vector_store %arg17[%c0_187, %c1_188, %c1_189, %c0_190], %89 {strides = array<i32>} : memref<1x8x8x576xf32, #tpu.memory_space<vmem>>, vector<1x7x7x64xf32>,
    %c0_191 = arith.constant 0 : index
    %c0_192 = arith.constant 0 : index
    %c0_193 = arith.constant 0 : index
    %c64_194 = arith.constant 64 : index
    %91 = vector.load %arg17[%c0_191, %c0_192, %c0_193, %c64_194] : memref<1x8x8x576xf32, #tpu.memory_space<vmem>>, vector<1x1x8x64xf32>
    tpu.vector_store %arg17[%c0_191, %c0_192, %c0_193, %c64_194], %85 {strides = array<i32>} : memref<1x8x8x576xf32, #tpu.memory_space<vmem>>, vector<1x1x8x64xf32>,
    %92 = vector.extract_strided_slice %84 {offsets = [0, 0, 0, 0], sizes = [1, 7, 8, 64], strides = [1, 1, 1, 1]} : vector<1x8x8x64xf32> to vector<1x7x8x64xf32>
    %c0_195 = arith.constant 0 : index
    %c1_196 = arith.constant 1 : index
    %c0_197 = arith.constant 0 : index
    %c64_198 = arith.constant 64 : index
    %93 = vector.load %arg17[%c0_195, %c1_196, %c0_197, %c64_198] : memref<1x8x8x576xf32, #tpu.memory_space<vmem>>, vector<1x7x8x64xf32>
    tpu.vector_store %arg17[%c0_195, %c1_196, %c0_197, %c64_198], %92 {strides = array<i32>} : memref<1x8x8x576xf32, #tpu.memory_space<vmem>>, vector<1x7x8x64xf32>,
    %c0_199 = arith.constant 0 : index
    %c0_200 = arith.constant 0 : index
    %c0_201 = arith.constant 0 : index
    %c128_202 = arith.constant 128 : index
    %94 = vector.load %arg17[%c0_199, %c0_200, %c0_201, %c128_202] : memref<1x8x8x576xf32, #tpu.memory_space<vmem>>, vector<1x1x8x64xf32>
    tpu.vector_store %arg17[%c0_199, %c0_200, %c0_201, %c128_202], %85 {strides = array<i32>} : memref<1x8x8x576xf32, #tpu.memory_space<vmem>>, vector<1x1x8x64xf32>,
    %c0_203 = arith.constant 0 : index
    %c0_204 = arith.constant 0 : index
    %c7_205 = arith.constant 7 : index
    %c128_206 = arith.constant 128 : index
    %95 = vector.load %arg17[%c0_203, %c0_204, %c7_205, %c128_206] : memref<1x8x8x576xf32, #tpu.memory_space<vmem>>, vector<1x8x1x64xf32>
    tpu.vector_store %arg17[%c0_203, %c0_204, %c7_205, %c128_206], %86 {strides = array<i32>} : memref<1x8x8x576xf32, #tpu.memory_space<vmem>>, vector<1x8x1x64xf32>,
    %96 = vector.extract_strided_slice %84 {offsets = [0, 0, 1, 0], sizes = [1, 7, 7, 64], strides = [1, 1, 1, 1]} : vector<1x8x8x64xf32> to vector<1x7x7x64xf32>
    %c0_207 = arith.constant 0 : index
    %c1_208 = arith.constant 1 : index
    %c0_209 = arith.constant 0 : index
    %c128_210 = arith.constant 128 : index
    %97 = vector.load %arg17[%c0_207, %c1_208, %c0_209, %c128_210] : memref<1x8x8x576xf32, #tpu.memory_space<vmem>>, vector<1x7x7x64xf32>
    tpu.vector_store %arg17[%c0_207, %c1_208, %c0_209, %c128_210], %96 {strides = array<i32>} : memref<1x8x8x576xf32, #tpu.memory_space<vmem>>, vector<1x7x7x64xf32>,
    %c0_211 = arith.constant 0 : index
    %c0_212 = arith.constant 0 : index
    %c0_213 = arith.constant 0 : index
    %c192_214 = arith.constant 192 : index
    %98 = vector.load %arg17[%c0_211, %c0_212, %c0_213, %c192_214] : memref<1x8x8x576xf32, #tpu.memory_space<vmem>>, vector<1x8x1x64xf32>
    tpu.vector_store %arg17[%c0_211, %c0_212, %c0_213, %c192_214], %86 {strides = array<i32>} : memref<1x8x8x576xf32, #tpu.memory_space<vmem>>, vector<1x8x1x64xf32>,
    %99 = vector.extract_strided_slice %84 {offsets = [0, 0, 0, 0], sizes = [1, 8, 7, 64], strides = [1, 1, 1, 1]} : vector<1x8x8x64xf32> to vector<1x8x7x64xf32>
    %c0_215 = arith.constant 0 : index
    %c0_216 = arith.constant 0 : index
    %c1_217 = arith.constant 1 : index
    %c192_218 = arith.constant 192 : index
    %100 = vector.load %arg17[%c0_215, %c0_216, %c1_217, %c192_218] : memref<1x8x8x576xf32, #tpu.memory_space<vmem>>, vector<1x8x7x64xf32>
    tpu.vector_store %arg17[%c0_215, %c0_216, %c1_217, %c192_218], %99 {strides = array<i32>} : memref<1x8x8x576xf32, #tpu.memory_space<vmem>>, vector<1x8x7x64xf32>,
    %c0_219 = arith.constant 0 : index
    %c0_220 = arith.constant 0 : index
    %c0_221 = arith.constant 0 : index
    %c256_222 = arith.constant 256 : index
    %101 = vector.load %arg17[%c0_219, %c0_220, %c0_221, %c256_222] : memref<1x8x8x576xf32, #tpu.memory_space<vmem>>, vector<1x8x8x64xf32>
    tpu.vector_store %arg17[%c0_219, %c0_220, %c0_221, %c256_222], %84 {strides = array<i32>} : memref<1x8x8x576xf32, #tpu.memory_space<vmem>>, vector<1x8x8x64xf32>,
    %c0_223 = arith.constant 0 : index
    %c0_224 = arith.constant 0 : index
    %c7_225 = arith.constant 7 : index
    %c320 = arith.constant 320 : index
    %102 = vector.load %arg17[%c0_223, %c0_224, %c7_225, %c320] : memref<1x8x8x576xf32, #tpu.memory_space<vmem>>, vector<1x8x1x64xf32>
    tpu.vector_store %arg17[%c0_223, %c0_224, %c7_225, %c320], %86 {strides = array<i32>} : memref<1x8x8x576xf32, #tpu.memory_space<vmem>>, vector<1x8x1x64xf32>,
    %103 = vector.extract_strided_slice %84 {offsets = [0, 0, 1, 0], sizes = [1, 8, 7, 64], strides = [1, 1, 1, 1]} : vector<1x8x8x64xf32> to vector<1x8x7x64xf32>
    %c0_226 = arith.constant 0 : index
    %c0_227 = arith.constant 0 : index
    %c0_228 = arith.constant 0 : index
    %c320_229 = arith.constant 320 : index
    %104 = vector.load %arg17[%c0_226, %c0_227, %c0_228, %c320_229] : memref<1x8x8x576xf32, #tpu.memory_space<vmem>>, vector<1x8x7x64xf32>
    tpu.vector_store %arg17[%c0_226, %c0_227, %c0_228, %c320_229], %103 {strides = array<i32>} : memref<1x8x8x576xf32, #tpu.memory_space<vmem>>, vector<1x8x7x64xf32>,
    %c0_230 = arith.constant 0 : index
    %c7_231 = arith.constant 7 : index
    %c0_232 = arith.constant 0 : index
    %c384 = arith.constant 384 : index
    %105 = vector.load %arg17[%c0_230, %c7_231, %c0_232, %c384] : memref<1x8x8x576xf32, #tpu.memory_space<vmem>>, vector<1x1x8x64xf32>
    tpu.vector_store %arg17[%c0_230, %c7_231, %c0_232, %c384], %85 {strides = array<i32>} : memref<1x8x8x576xf32, #tpu.memory_space<vmem>>, vector<1x1x8x64xf32>,
    %c0_233 = arith.constant 0 : index
    %c0_234 = arith.constant 0 : index
    %c0_235 = arith.constant 0 : index
    %c384_236 = arith.constant 384 : index
    %106 = vector.load %arg17[%c0_233, %c0_234, %c0_235, %c384_236] : memref<1x8x8x576xf32, #tpu.memory_space<vmem>>, vector<1x8x1x64xf32>
    tpu.vector_store %arg17[%c0_233, %c0_234, %c0_235, %c384_236], %86 {strides = array<i32>} : memref<1x8x8x576xf32, #tpu.memory_space<vmem>>, vector<1x8x1x64xf32>,
    %107 = vector.extract_strided_slice %84 {offsets = [0, 1, 0, 0], sizes = [1, 7, 7, 64], strides = [1, 1, 1, 1]} : vector<1x8x8x64xf32> to vector<1x7x7x64xf32>
    %c0_237 = arith.constant 0 : index
    %c0_238 = arith.constant 0 : index
    %c1_239 = arith.constant 1 : index
    %c384_240 = arith.constant 384 : index
    %108 = vector.load %arg17[%c0_237, %c0_238, %c1_239, %c384_240] : memref<1x8x8x576xf32, #tpu.memory_space<vmem>>, vector<1x7x7x64xf32>
    tpu.vector_store %arg17[%c0_237, %c0_238, %c1_239, %c384_240], %107 {strides = array<i32>} : memref<1x8x8x576xf32, #tpu.memory_space<vmem>>, vector<1x7x7x64xf32>,
    %c0_241 = arith.constant 0 : index
    %c7_242 = arith.constant 7 : index
    %c0_243 = arith.constant 0 : index
    %c448 = arith.constant 448 : index
    %109 = vector.load %arg17[%c0_241, %c7_242, %c0_243, %c448] : memref<1x8x8x576xf32, #tpu.memory_space<vmem>>, vector<1x1x8x64xf32>
    tpu.vector_store %arg17[%c0_241, %c7_242, %c0_243, %c448], %85 {strides = array<i32>} : memref<1x8x8x576xf32, #tpu.memory_space<vmem>>, vector<1x1x8x64xf32>,
    %110 = vector.extract_strided_slice %84 {offsets = [0, 1, 0, 0], sizes = [1, 7, 8, 64], strides = [1, 1, 1, 1]} : vector<1x8x8x64xf32> to vector<1x7x8x64xf32>
    %c0_244 = arith.constant 0 : index
    %c0_245 = arith.constant 0 : index
    %c0_246 = arith.constant 0 : index
    %c448_247 = arith.constant 448 : index
    %111 = vector.load %arg17[%c0_244, %c0_245, %c0_246, %c448_247] : memref<1x8x8x576xf32, #tpu.memory_space<vmem>>, vector<1x7x8x64xf32>
    tpu.vector_store %arg17[%c0_244, %c0_245, %c0_246, %c448_247], %110 {strides = array<i32>} : memref<1x8x8x576xf32, #tpu.memory_space<vmem>>, vector<1x7x8x64xf32>,
    %c0_248 = arith.constant 0 : index
    %c7_249 = arith.constant 7 : index
    %c0_250 = arith.constant 0 : index
    %c512 = arith.constant 512 : index
    %112 = vector.load %arg17[%c0_248, %c7_249, %c0_250, %c512] : memref<1x8x8x576xf32, #tpu.memory_space<vmem>>, vector<1x1x8x64xf32>
    tpu.vector_store %arg17[%c0_248, %c7_249, %c0_250, %c512], %85 {strides = array<i32>} : memref<1x8x8x576xf32, #tpu.memory_space<vmem>>, vector<1x1x8x64xf32>,
    %c0_251 = arith.constant 0 : index
    %c0_252 = arith.constant 0 : index
    %c7_253 = arith.constant 7 : index
    %c512_254 = arith.constant 512 : index
    %113 = vector.load %arg17[%c0_251, %c0_252, %c7_253, %c512_254] : memref<1x8x8x576xf32, #tpu.memory_space<vmem>>, vector<1x8x1x64xf32>
    tpu.vector_store %arg17[%c0_251, %c0_252, %c7_253, %c512_254], %86 {strides = array<i32>} : memref<1x8x8x576xf32, #tpu.memory_space<vmem>>, vector<1x8x1x64xf32>,
    %114 = vector.extract_strided_slice %84 {offsets = [0, 1, 1, 0], sizes = [1, 7, 7, 64], strides = [1, 1, 1, 1]} : vector<1x8x8x64xf32> to vector<1x7x7x64xf32>
    %c0_255 = arith.constant 0 : index
    %c0_256 = arith.constant 0 : index
    %c0_257 = arith.constant 0 : index
    %c512_258 = arith.constant 512 : index
    %115 = vector.load %arg17[%c0_255, %c0_256, %c0_257, %c512_258] : memref<1x8x8x576xf32, #tpu.memory_space<vmem>>, vector<1x7x7x64xf32>
    tpu.vector_store %arg17[%c0_255, %c0_256, %c0_257, %c512_258], %114 {strides = array<i32>} : memref<1x8x8x576xf32, #tpu.memory_space<vmem>>, vector<1x7x7x64xf32>,
    %c0_259 = arith.constant 0 : index
    %c0_260 = arith.constant 0 : index
    %c0_261 = arith.constant 0 : index
    %c0_262 = arith.constant 0 : index
    %116 = vector.load %arg17[%c0_259, %c0_260, %c0_261, %c0_262] : memref<1x8x8x576xf32, #tpu.memory_space<vmem>>, vector<1x8x8x576xf32>
    %117 = vector.shape_cast %116 : vector<1x8x8x576xf32> to vector<64x576xf32>
    %118 = arith.truncf %117 : vector<64x576xf32> to vector<64x576xbf16>
    %c0_263 = arith.constant 0 : index
    %c0_264 = arith.constant 0 : index
    %119 = vector.load %arg6[%c0_263, %c0_264] : memref<576x128xbf16, #tpu.memory_space<vmem>>, vector<576x128xbf16>
    %cst_265 = arith.constant dense<0.000000e+00> : vector<64x128xf32>
    %120 = tpu.matmul %118, %119, %cst_265 {dimension_numbers = #tpu.dot_dimension_numbers<[1], [0], [0], [1], [0, 0, 1, 1], [], []>} : vector<64x576xbf16>, vector<576x128xbf16>, vector<64x128xf32> -> vector<64x128xf32>
    %c0_266 = arith.constant 0 : index
    %c0_267 = arith.constant 0 : index
    %121 = vector.load %arg7[%c0_266, %c0_267] : memref<1x128xf32, #tpu.memory_space<vmem>>, vector<1x128xf32>
    %122 = vector.broadcast %121 : vector<1x128xf32> to vector<64x128xf32>
    %123 = arith.addf %120, %122 : vector<64x128xf32>
    %cst_268 = arith.constant 0.000000e+00 : f32
    %124 = vector.broadcast %cst_268 : f32 to vector<64x128xf32>
    %125 = arith.maximumf %123, %124 : vector<64x128xf32>
    %126 = arith.truncf %125 : vector<64x128xf32> to vector<64x128xbf16>
    %c0_269 = arith.constant 0 : index
    %c0_270 = arith.constant 0 : index
    %127 = vector.load %arg8[%c0_269, %c0_270] : memref<128x8xbf16, #tpu.memory_space<vmem>>, vector<128x8xbf16>
    %cst_271 = arith.constant dense<0.000000e+00> : vector<64x8xf32>
    %128 = tpu.matmul %126, %127, %cst_271 {dimension_numbers = #tpu.dot_dimension_numbers<[1], [0], [0], [1], [0, 0, 1, 1], [], []>} : vector<64x128xbf16>, vector<128x8xbf16>, vector<64x8xf32> -> vector<64x8xf32>
    %c0_272 = arith.constant 0 : index
    %c0_273 = arith.constant 0 : index
    %129 = vector.load %arg9[%c0_272, %c0_273] : memref<1x8xf32, #tpu.memory_space<vmem>>, vector<1x8xf32>
    %130 = vector.broadcast %129 : vector<1x8xf32> to vector<64x8xf32>
    %131 = arith.addf %128, %130 : vector<64x8xf32>
    %cst_274 = arith.constant 0.000000e+00 : f32
    %132 = vector.broadcast %cst_274 : f32 to vector<64x8xf32>
    %133 = arith.maximumf %131, %132 : vector<64x8xf32>
    %134 = vector.shape_cast %133 : vector<64x8xf32> to vector<1x64x8xf32>
    %c0_275 = arith.constant 0 : index
    %c0_276 = arith.constant 0 : index
    %c0_277 = arith.constant 0 : index
    %135 = vector.load %arg18[%c0_275, %c0_276, %c0_277] : memref<1x64x8xf32, #tpu.memory_space<vmem>>, vector<1x64x8xf32>
    tpu.vector_store %arg18[%c0_275, %c0_276, %c0_277], %134 {strides = array<i32>} : memref<1x64x8xf32, #tpu.memory_space<vmem>>, vector<1x64x8xf32>,
    %c0_278 = arith.constant 0 : index
    %c0_279 = arith.constant 0 : index
    %c0_280 = arith.constant 0 : index
    %136 = vector.load %arg18[%c0_278, %c0_279, %c0_280] : memref<1x64x8xf32, #tpu.memory_space<vmem>>, vector<1x1x8xf32>
    %137 = vector.shape_cast %136 : vector<1x1x8xf32> to vector<1x8xf32>
    %c0_281 = arith.constant 0 : index
    %c0_282 = arith.constant 0 : index
    %138 = vector.load %arg19[%c0_281, %c0_282] : memref<1x512xf32, #tpu.memory_space<vmem>>, vector<1x8xf32>
    tpu.vector_store %arg19[%c0_281, %c0_282], %137 {strides = array<i32>} : memref<1x512xf32, #tpu.memory_space<vmem>>, vector<1x8xf32>,
    %c0_283 = arith.constant 0 : index
    %c1_284 = arith.constant 1 : index
    %c0_285 = arith.constant 0 : index
    %139 = vector.load %arg18[%c0_283, %c1_284, %c0_285] : memref<1x64x8xf32, #tpu.memory_space<vmem>>, vector<1x1x8xf32>
    %140 = vector.shape_cast %139 : vector<1x1x8xf32> to vector<1x8xf32>
    %c0_286 = arith.constant 0 : index
    %c8_287 = arith.constant 8 : index
    %141 = vector.load %arg19[%c0_286, %c8_287] : memref<1x512xf32, #tpu.memory_space<vmem>>, vector<1x8xf32>
    tpu.vector_store %arg19[%c0_286, %c8_287], %140 {strides = array<i32>} : memref<1x512xf32, #tpu.memory_space<vmem>>, vector<1x8xf32>,
    %c0_288 = arith.constant 0 : index
    %c2 = arith.constant 2 : index
    %c0_289 = arith.constant 0 : index
    %142 = vector.load %arg18[%c0_288, %c2, %c0_289] : memref<1x64x8xf32, #tpu.memory_space<vmem>>, vector<1x1x8xf32>
    %143 = vector.shape_cast %142 : vector<1x1x8xf32> to vector<1x8xf32>
    %c0_290 = arith.constant 0 : index
    %c16_291 = arith.constant 16 : index
    %144 = vector.load %arg19[%c0_290, %c16_291] : memref<1x512xf32, #tpu.memory_space<vmem>>, vector<1x8xf32>
    tpu.vector_store %arg19[%c0_290, %c16_291], %143 {strides = array<i32>} : memref<1x512xf32, #tpu.memory_space<vmem>>, vector<1x8xf32>,
    %c0_292 = arith.constant 0 : index
    %c3 = arith.constant 3 : index
    %c0_293 = arith.constant 0 : index
    %145 = vector.load %arg18[%c0_292, %c3, %c0_293] : memref<1x64x8xf32, #tpu.memory_space<vmem>>, vector<1x1x8xf32>
    %146 = vector.shape_cast %145 : vector<1x1x8xf32> to vector<1x8xf32>
    %c0_294 = arith.constant 0 : index
    %c24_295 = arith.constant 24 : index
    %147 = vector.load %arg19[%c0_294, %c24_295] : memref<1x512xf32, #tpu.memory_space<vmem>>, vector<1x8xf32>
    tpu.vector_store %arg19[%c0_294, %c24_295], %146 {strides = array<i32>} : memref<1x512xf32, #tpu.memory_space<vmem>>, vector<1x8xf32>,
    %c0_296 = arith.constant 0 : index
    %c4_297 = arith.constant 4 : index
    %c0_298 = arith.constant 0 : index
    %148 = vector.load %arg18[%c0_296, %c4_297, %c0_298] : memref<1x64x8xf32, #tpu.memory_space<vmem>>, vector<1x1x8xf32>
    %149 = vector.shape_cast %148 : vector<1x1x8xf32> to vector<1x8xf32>
    %c0_299 = arith.constant 0 : index
    %c32_300 = arith.constant 32 : index
    %150 = vector.load %arg19[%c0_299, %c32_300] : memref<1x512xf32, #tpu.memory_space<vmem>>, vector<1x8xf32>
    tpu.vector_store %arg19[%c0_299, %c32_300], %149 {strides = array<i32>} : memref<1x512xf32, #tpu.memory_space<vmem>>, vector<1x8xf32>,
    %c0_301 = arith.constant 0 : index
    %c5 = arith.constant 5 : index
    %c0_302 = arith.constant 0 : index
    %151 = vector.load %arg18[%c0_301, %c5, %c0_302] : memref<1x64x8xf32, #tpu.memory_space<vmem>>, vector<1x1x8xf32>
    %152 = vector.shape_cast %151 : vector<1x1x8xf32> to vector<1x8xf32>
    %c0_303 = arith.constant 0 : index
    %c40 = arith.constant 40 : index
    %153 = vector.load %arg19[%c0_303, %c40] : memref<1x512xf32, #tpu.memory_space<vmem>>, vector<1x8xf32>
    tpu.vector_store %arg19[%c0_303, %c40], %152 {strides = array<i32>} : memref<1x512xf32, #tpu.memory_space<vmem>>, vector<1x8xf32>,
    %c0_304 = arith.constant 0 : index
    %c6 = arith.constant 6 : index
    %c0_305 = arith.constant 0 : index
    %154 = vector.load %arg18[%c0_304, %c6, %c0_305] : memref<1x64x8xf32, #tpu.memory_space<vmem>>, vector<1x1x8xf32>
    %155 = vector.shape_cast %154 : vector<1x1x8xf32> to vector<1x8xf32>
    %c0_306 = arith.constant 0 : index
    %c48 = arith.constant 48 : index
    %156 = vector.load %arg19[%c0_306, %c48] : memref<1x512xf32, #tpu.memory_space<vmem>>, vector<1x8xf32>
    tpu.vector_store %arg19[%c0_306, %c48], %155 {strides = array<i32>} : memref<1x512xf32, #tpu.memory_space<vmem>>, vector<1x8xf32>,
    %c0_307 = arith.constant 0 : index
    %c7_308 = arith.constant 7 : index
    %c0_309 = arith.constant 0 : index
    %157 = vector.load %arg18[%c0_307, %c7_308, %c0_309] : memref<1x64x8xf32, #tpu.memory_space<vmem>>, vector<1x1x8xf32>
    %158 = vector.shape_cast %157 : vector<1x1x8xf32> to vector<1x8xf32>
    %c0_310 = arith.constant 0 : index
    %c56 = arith.constant 56 : index
    %159 = vector.load %arg19[%c0_310, %c56] : memref<1x512xf32, #tpu.memory_space<vmem>>, vector<1x8xf32>
    tpu.vector_store %arg19[%c0_310, %c56], %158 {strides = array<i32>} : memref<1x512xf32, #tpu.memory_space<vmem>>, vector<1x8xf32>,
    %c0_311 = arith.constant 0 : index
    %c8_312 = arith.constant 8 : index
    %c0_313 = arith.constant 0 : index
    %160 = vector.load %arg18[%c0_311, %c8_312, %c0_313] : memref<1x64x8xf32, #tpu.memory_space<vmem>>, vector<1x1x8xf32>
    %161 = vector.shape_cast %160 : vector<1x1x8xf32> to vector<1x8xf32>
    %c0_314 = arith.constant 0 : index
    %c64_315 = arith.constant 64 : index
    %162 = vector.load %arg19[%c0_314, %c64_315] : memref<1x512xf32, #tpu.memory_space<vmem>>, vector<1x8xf32>
    tpu.vector_store %arg19[%c0_314, %c64_315], %161 {strides = array<i32>} : memref<1x512xf32, #tpu.memory_space<vmem>>, vector<1x8xf32>,
    %c0_316 = arith.constant 0 : index
    %c9 = arith.constant 9 : index
    %c0_317 = arith.constant 0 : index
    %163 = vector.load %arg18[%c0_316, %c9, %c0_317] : memref<1x64x8xf32, #tpu.memory_space<vmem>>, vector<1x1x8xf32>
    %164 = vector.shape_cast %163 : vector<1x1x8xf32> to vector<1x8xf32>
    %c0_318 = arith.constant 0 : index
    %c72 = arith.constant 72 : index
    %165 = vector.load %arg19[%c0_318, %c72] : memref<1x512xf32, #tpu.memory_space<vmem>>, vector<1x8xf32>
    tpu.vector_store %arg19[%c0_318, %c72], %164 {strides = array<i32>} : memref<1x512xf32, #tpu.memory_space<vmem>>, vector<1x8xf32>,
    %c0_319 = arith.constant 0 : index
    %c10 = arith.constant 10 : index
    %c0_320 = arith.constant 0 : index
    %166 = vector.load %arg18[%c0_319, %c10, %c0_320] : memref<1x64x8xf32, #tpu.memory_space<vmem>>, vector<1x1x8xf32>
    %167 = vector.shape_cast %166 : vector<1x1x8xf32> to vector<1x8xf32>
    %c0_321 = arith.constant 0 : index
    %c80 = arith.constant 80 : index
    %168 = vector.load %arg19[%c0_321, %c80] : memref<1x512xf32, #tpu.memory_space<vmem>>, vector<1x8xf32>
    tpu.vector_store %arg19[%c0_321, %c80], %167 {strides = array<i32>} : memref<1x512xf32, #tpu.memory_space<vmem>>, vector<1x8xf32>,
    %c0_322 = arith.constant 0 : index
    %c11 = arith.constant 11 : index
    %c0_323 = arith.constant 0 : index
    %169 = vector.load %arg18[%c0_322, %c11, %c0_323] : memref<1x64x8xf32, #tpu.memory_space<vmem>>, vector<1x1x8xf32>
    %170 = vector.shape_cast %169 : vector<1x1x8xf32> to vector<1x8xf32>
    %c0_324 = arith.constant 0 : index
    %c88 = arith.constant 88 : index
    %171 = vector.load %arg19[%c0_324, %c88] : memref<1x512xf32, #tpu.memory_space<vmem>>, vector<1x8xf32>
    tpu.vector_store %arg19[%c0_324, %c88], %170 {strides = array<i32>} : memref<1x512xf32, #tpu.memory_space<vmem>>, vector<1x8xf32>,
    %c0_325 = arith.constant 0 : index
    %c12_326 = arith.constant 12 : index
    %c0_327 = arith.constant 0 : index
    %172 = vector.load %arg18[%c0_325, %c12_326, %c0_327] : memref<1x64x8xf32, #tpu.memory_space<vmem>>, vector<1x1x8xf32>
    %173 = vector.shape_cast %172 : vector<1x1x8xf32> to vector<1x8xf32>
    %c0_328 = arith.constant 0 : index
    %c96_329 = arith.constant 96 : index
    %174 = vector.load %arg19[%c0_328, %c96_329] : memref<1x512xf32, #tpu.memory_space<vmem>>, vector<1x8xf32>
    tpu.vector_store %arg19[%c0_328, %c96_329], %173 {strides = array<i32>} : memref<1x512xf32, #tpu.memory_space<vmem>>, vector<1x8xf32>,
    %c0_330 = arith.constant 0 : index
    %c13 = arith.constant 13 : index
    %c0_331 = arith.constant 0 : index
    %175 = vector.load %arg18[%c0_330, %c13, %c0_331] : memref<1x64x8xf32, #tpu.memory_space<vmem>>, vector<1x1x8xf32>
    %176 = vector.shape_cast %175 : vector<1x1x8xf32> to vector<1x8xf32>
    %c0_332 = arith.constant 0 : index
    %c104 = arith.constant 104 : index
    %177 = vector.load %arg19[%c0_332, %c104] : memref<1x512xf32, #tpu.memory_space<vmem>>, vector<1x8xf32>
    tpu.vector_store %arg19[%c0_332, %c104], %176 {strides = array<i32>} : memref<1x512xf32, #tpu.memory_space<vmem>>, vector<1x8xf32>,
    %c0_333 = arith.constant 0 : index
    %c14 = arith.constant 14 : index
    %c0_334 = arith.constant 0 : index
    %178 = vector.load %arg18[%c0_333, %c14, %c0_334] : memref<1x64x8xf32, #tpu.memory_space<vmem>>, vector<1x1x8xf32>
    %179 = vector.shape_cast %178 : vector<1x1x8xf32> to vector<1x8xf32>
    %c0_335 = arith.constant 0 : index
    %c112 = arith.constant 112 : index
    %180 = vector.load %arg19[%c0_335, %c112] : memref<1x512xf32, #tpu.memory_space<vmem>>, vector<1x8xf32>
    tpu.vector_store %arg19[%c0_335, %c112], %179 {strides = array<i32>} : memref<1x512xf32, #tpu.memory_space<vmem>>, vector<1x8xf32>,
    %c0_336 = arith.constant 0 : index
    %c15 = arith.constant 15 : index
    %c0_337 = arith.constant 0 : index
    %181 = vector.load %arg18[%c0_336, %c15, %c0_337] : memref<1x64x8xf32, #tpu.memory_space<vmem>>, vector<1x1x8xf32>
    %182 = vector.shape_cast %181 : vector<1x1x8xf32> to vector<1x8xf32>
    %c0_338 = arith.constant 0 : index
    %c120 = arith.constant 120 : index
    %183 = vector.load %arg19[%c0_338, %c120] : memref<1x512xf32, #tpu.memory_space<vmem>>, vector<1x8xf32>
    tpu.vector_store %arg19[%c0_338, %c120], %182 {strides = array<i32>} : memref<1x512xf32, #tpu.memory_space<vmem>>, vector<1x8xf32>,
    %c0_339 = arith.constant 0 : index
    %c16_340 = arith.constant 16 : index
    %c0_341 = arith.constant 0 : index
    %184 = vector.load %arg18[%c0_339, %c16_340, %c0_341] : memref<1x64x8xf32, #tpu.memory_space<vmem>>, vector<1x1x8xf32>
    %185 = vector.shape_cast %184 : vector<1x1x8xf32> to vector<1x8xf32>
    %c0_342 = arith.constant 0 : index
    %c128_343 = arith.constant 128 : index
    %186 = vector.load %arg19[%c0_342, %c128_343] : memref<1x512xf32, #tpu.memory_space<vmem>>, vector<1x8xf32>
    tpu.vector_store %arg19[%c0_342, %c128_343], %185 {strides = array<i32>} : memref<1x512xf32, #tpu.memory_space<vmem>>, vector<1x8xf32>,
    %c0_344 = arith.constant 0 : index
    %c17 = arith.constant 17 : index
    %c0_345 = arith.constant 0 : index
    %187 = vector.load %arg18[%c0_344, %c17, %c0_345] : memref<1x64x8xf32, #tpu.memory_space<vmem>>, vector<1x1x8xf32>
    %188 = vector.shape_cast %187 : vector<1x1x8xf32> to vector<1x8xf32>
    %c0_346 = arith.constant 0 : index
    %c136 = arith.constant 136 : index
    %189 = vector.load %arg19[%c0_346, %c136] : memref<1x512xf32, #tpu.memory_space<vmem>>, vector<1x8xf32>
    tpu.vector_store %arg19[%c0_346, %c136], %188 {strides = array<i32>} : memref<1x512xf32, #tpu.memory_space<vmem>>, vector<1x8xf32>,
    %c0_347 = arith.constant 0 : index
    %c18 = arith.constant 18 : index
    %c0_348 = arith.constant 0 : index
    %190 = vector.load %arg18[%c0_347, %c18, %c0_348] : memref<1x64x8xf32, #tpu.memory_space<vmem>>, vector<1x1x8xf32>
    %191 = vector.shape_cast %190 : vector<1x1x8xf32> to vector<1x8xf32>
    %c0_349 = arith.constant 0 : index
    %c144 = arith.constant 144 : index
    %192 = vector.load %arg19[%c0_349, %c144] : memref<1x512xf32, #tpu.memory_space<vmem>>, vector<1x8xf32>
    tpu.vector_store %arg19[%c0_349, %c144], %191 {strides = array<i32>} : memref<1x512xf32, #tpu.memory_space<vmem>>, vector<1x8xf32>,
    %c0_350 = arith.constant 0 : index
    %c19 = arith.constant 19 : index
    %c0_351 = arith.constant 0 : index
    %193 = vector.load %arg18[%c0_350, %c19, %c0_351] : memref<1x64x8xf32, #tpu.memory_space<vmem>>, vector<1x1x8xf32>
    %194 = vector.shape_cast %193 : vector<1x1x8xf32> to vector<1x8xf32>
    %c0_352 = arith.constant 0 : index
    %c152 = arith.constant 152 : index
    %195 = vector.load %arg19[%c0_352, %c152] : memref<1x512xf32, #tpu.memory_space<vmem>>, vector<1x8xf32>
    tpu.vector_store %arg19[%c0_352, %c152], %194 {strides = array<i32>} : memref<1x512xf32, #tpu.memory_space<vmem>>, vector<1x8xf32>,
    %c0_353 = arith.constant 0 : index
    %c20_354 = arith.constant 20 : index
    %c0_355 = arith.constant 0 : index
    %196 = vector.load %arg18[%c0_353, %c20_354, %c0_355] : memref<1x64x8xf32, #tpu.memory_space<vmem>>, vector<1x1x8xf32>
    %197 = vector.shape_cast %196 : vector<1x1x8xf32> to vector<1x8xf32>
    %c0_356 = arith.constant 0 : index
    %c160_357 = arith.constant 160 : index
    %198 = vector.load %arg19[%c0_356, %c160_357] : memref<1x512xf32, #tpu.memory_space<vmem>>, vector<1x8xf32>
    tpu.vector_store %arg19[%c0_356, %c160_357], %197 {strides = array<i32>} : memref<1x512xf32, #tpu.memory_space<vmem>>, vector<1x8xf32>,
    %c0_358 = arith.constant 0 : index
    %c21 = arith.constant 21 : index
    %c0_359 = arith.constant 0 : index
    %199 = vector.load %arg18[%c0_358, %c21, %c0_359] : memref<1x64x8xf32, #tpu.memory_space<vmem>>, vector<1x1x8xf32>
    %200 = vector.shape_cast %199 : vector<1x1x8xf32> to vector<1x8xf32>
    %c0_360 = arith.constant 0 : index
    %c168 = arith.constant 168 : index
    %201 = vector.load %arg19[%c0_360, %c168] : memref<1x512xf32, #tpu.memory_space<vmem>>, vector<1x8xf32>
    tpu.vector_store %arg19[%c0_360, %c168], %200 {strides = array<i32>} : memref<1x512xf32, #tpu.memory_space<vmem>>, vector<1x8xf32>,
    %c0_361 = arith.constant 0 : index
    %c22 = arith.constant 22 : index
    %c0_362 = arith.constant 0 : index
    %202 = vector.load %arg18[%c0_361, %c22, %c0_362] : memref<1x64x8xf32, #tpu.memory_space<vmem>>, vector<1x1x8xf32>
    %203 = vector.shape_cast %202 : vector<1x1x8xf32> to vector<1x8xf32>
    %c0_363 = arith.constant 0 : index
    %c176 = arith.constant 176 : index
    %204 = vector.load %arg19[%c0_363, %c176] : memref<1x512xf32, #tpu.memory_space<vmem>>, vector<1x8xf32>
    tpu.vector_store %arg19[%c0_363, %c176], %203 {strides = array<i32>} : memref<1x512xf32, #tpu.memory_space<vmem>>, vector<1x8xf32>,
    %c0_364 = arith.constant 0 : index
    %c23 = arith.constant 23 : index
    %c0_365 = arith.constant 0 : index
    %205 = vector.load %arg18[%c0_364, %c23, %c0_365] : memref<1x64x8xf32, #tpu.memory_space<vmem>>, vector<1x1x8xf32>
    %206 = vector.shape_cast %205 : vector<1x1x8xf32> to vector<1x8xf32>
    %c0_366 = arith.constant 0 : index
    %c184 = arith.constant 184 : index
    %207 = vector.load %arg19[%c0_366, %c184] : memref<1x512xf32, #tpu.memory_space<vmem>>, vector<1x8xf32>
    tpu.vector_store %arg19[%c0_366, %c184], %206 {strides = array<i32>} : memref<1x512xf32, #tpu.memory_space<vmem>>, vector<1x8xf32>,
    %c0_367 = arith.constant 0 : index
    %c24_368 = arith.constant 24 : index
    %c0_369 = arith.constant 0 : index
    %208 = vector.load %arg18[%c0_367, %c24_368, %c0_369] : memref<1x64x8xf32, #tpu.memory_space<vmem>>, vector<1x1x8xf32>
    %209 = vector.shape_cast %208 : vector<1x1x8xf32> to vector<1x8xf32>
    %c0_370 = arith.constant 0 : index
    %c192_371 = arith.constant 192 : index
    %210 = vector.load %arg19[%c0_370, %c192_371] : memref<1x512xf32, #tpu.memory_space<vmem>>, vector<1x8xf32>
    tpu.vector_store %arg19[%c0_370, %c192_371], %209 {strides = array<i32>} : memref<1x512xf32, #tpu.memory_space<vmem>>, vector<1x8xf32>,
    %c0_372 = arith.constant 0 : index
    %c25 = arith.constant 25 : index
    %c0_373 = arith.constant 0 : index
    %211 = vector.load %arg18[%c0_372, %c25, %c0_373] : memref<1x64x8xf32, #tpu.memory_space<vmem>>, vector<1x1x8xf32>
    %212 = vector.shape_cast %211 : vector<1x1x8xf32> to vector<1x8xf32>
    %c0_374 = arith.constant 0 : index
    %c200 = arith.constant 200 : index
    %213 = vector.load %arg19[%c0_374, %c200] : memref<1x512xf32, #tpu.memory_space<vmem>>, vector<1x8xf32>
    tpu.vector_store %arg19[%c0_374, %c200], %212 {strides = array<i32>} : memref<1x512xf32, #tpu.memory_space<vmem>>, vector<1x8xf32>,
    %c0_375 = arith.constant 0 : index
    %c26 = arith.constant 26 : index
    %c0_376 = arith.constant 0 : index
    %214 = vector.load %arg18[%c0_375, %c26, %c0_376] : memref<1x64x8xf32, #tpu.memory_space<vmem>>, vector<1x1x8xf32>
    %215 = vector.shape_cast %214 : vector<1x1x8xf32> to vector<1x8xf32>
    %c0_377 = arith.constant 0 : index
    %c208 = arith.constant 208 : index
    %216 = vector.load %arg19[%c0_377, %c208] : memref<1x512xf32, #tpu.memory_space<vmem>>, vector<1x8xf32>
    tpu.vector_store %arg19[%c0_377, %c208], %215 {strides = array<i32>} : memref<1x512xf32, #tpu.memory_space<vmem>>, vector<1x8xf32>,
    %c0_378 = arith.constant 0 : index
    %c27 = arith.constant 27 : index
    %c0_379 = arith.constant 0 : index
    %217 = vector.load %arg18[%c0_378, %c27, %c0_379] : memref<1x64x8xf32, #tpu.memory_space<vmem>>, vector<1x1x8xf32>
    %218 = vector.shape_cast %217 : vector<1x1x8xf32> to vector<1x8xf32>
    %c0_380 = arith.constant 0 : index
    %c216 = arith.constant 216 : index
    %219 = vector.load %arg19[%c0_380, %c216] : memref<1x512xf32, #tpu.memory_space<vmem>>, vector<1x8xf32>
    tpu.vector_store %arg19[%c0_380, %c216], %218 {strides = array<i32>} : memref<1x512xf32, #tpu.memory_space<vmem>>, vector<1x8xf32>,
    %c0_381 = arith.constant 0 : index
    %c28_382 = arith.constant 28 : index
    %c0_383 = arith.constant 0 : index
    %220 = vector.load %arg18[%c0_381, %c28_382, %c0_383] : memref<1x64x8xf32, #tpu.memory_space<vmem>>, vector<1x1x8xf32>
    %221 = vector.shape_cast %220 : vector<1x1x8xf32> to vector<1x8xf32>
    %c0_384 = arith.constant 0 : index
    %c224_385 = arith.constant 224 : index
    %222 = vector.load %arg19[%c0_384, %c224_385] : memref<1x512xf32, #tpu.memory_space<vmem>>, vector<1x8xf32>
    tpu.vector_store %arg19[%c0_384, %c224_385], %221 {strides = array<i32>} : memref<1x512xf32, #tpu.memory_space<vmem>>, vector<1x8xf32>,
    %c0_386 = arith.constant 0 : index
    %c29 = arith.constant 29 : index
    %c0_387 = arith.constant 0 : index
    %223 = vector.load %arg18[%c0_386, %c29, %c0_387] : memref<1x64x8xf32, #tpu.memory_space<vmem>>, vector<1x1x8xf32>
    %224 = vector.shape_cast %223 : vector<1x1x8xf32> to vector<1x8xf32>
    %c0_388 = arith.constant 0 : index
    %c232 = arith.constant 232 : index
    %225 = vector.load %arg19[%c0_388, %c232] : memref<1x512xf32, #tpu.memory_space<vmem>>, vector<1x8xf32>
    tpu.vector_store %arg19[%c0_388, %c232], %224 {strides = array<i32>} : memref<1x512xf32, #tpu.memory_space<vmem>>, vector<1x8xf32>,
    %c0_389 = arith.constant 0 : index
    %c30 = arith.constant 30 : index
    %c0_390 = arith.constant 0 : index
    %226 = vector.load %arg18[%c0_389, %c30, %c0_390] : memref<1x64x8xf32, #tpu.memory_space<vmem>>, vector<1x1x8xf32>
    %227 = vector.shape_cast %226 : vector<1x1x8xf32> to vector<1x8xf32>
    %c0_391 = arith.constant 0 : index
    %c240 = arith.constant 240 : index
    %228 = vector.load %arg19[%c0_391, %c240] : memref<1x512xf32, #tpu.memory_space<vmem>>, vector<1x8xf32>
    tpu.vector_store %arg19[%c0_391, %c240], %227 {strides = array<i32>} : memref<1x512xf32, #tpu.memory_space<vmem>>, vector<1x8xf32>,
    %c0_392 = arith.constant 0 : index
    %c31 = arith.constant 31 : index
    %c0_393 = arith.constant 0 : index
    %229 = vector.load %arg18[%c0_392, %c31, %c0_393] : memref<1x64x8xf32, #tpu.memory_space<vmem>>, vector<1x1x8xf32>
    %230 = vector.shape_cast %229 : vector<1x1x8xf32> to vector<1x8xf32>
    %c0_394 = arith.constant 0 : index
    %c248 = arith.constant 248 : index
    %231 = vector.load %arg19[%c0_394, %c248] : memref<1x512xf32, #tpu.memory_space<vmem>>, vector<1x8xf32>
    tpu.vector_store %arg19[%c0_394, %c248], %230 {strides = array<i32>} : memref<1x512xf32, #tpu.memory_space<vmem>>, vector<1x8xf32>,
    %c0_395 = arith.constant 0 : index
    %c32_396 = arith.constant 32 : index
    %c0_397 = arith.constant 0 : index
    %232 = vector.load %arg18[%c0_395, %c32_396, %c0_397] : memref<1x64x8xf32, #tpu.memory_space<vmem>>, vector<1x1x8xf32>
    %233 = vector.shape_cast %232 : vector<1x1x8xf32> to vector<1x8xf32>
    %c0_398 = arith.constant 0 : index
    %c256_399 = arith.constant 256 : index
    %234 = vector.load %arg19[%c0_398, %c256_399] : memref<1x512xf32, #tpu.memory_space<vmem>>, vector<1x8xf32>
    tpu.vector_store %arg19[%c0_398, %c256_399], %233 {strides = array<i32>} : memref<1x512xf32, #tpu.memory_space<vmem>>, vector<1x8xf32>,
    %c0_400 = arith.constant 0 : index
    %c33 = arith.constant 33 : index
    %c0_401 = arith.constant 0 : index
    %235 = vector.load %arg18[%c0_400, %c33, %c0_401] : memref<1x64x8xf32, #tpu.memory_space<vmem>>, vector<1x1x8xf32>
    %236 = vector.shape_cast %235 : vector<1x1x8xf32> to vector<1x8xf32>
    %c0_402 = arith.constant 0 : index
    %c264 = arith.constant 264 : index
    %237 = vector.load %arg19[%c0_402, %c264] : memref<1x512xf32, #tpu.memory_space<vmem>>, vector<1x8xf32>
    tpu.vector_store %arg19[%c0_402, %c264], %236 {strides = array<i32>} : memref<1x512xf32, #tpu.memory_space<vmem>>, vector<1x8xf32>,
    %c0_403 = arith.constant 0 : index
    %c34 = arith.constant 34 : index
    %c0_404 = arith.constant 0 : index
    %238 = vector.load %arg18[%c0_403, %c34, %c0_404] : memref<1x64x8xf32, #tpu.memory_space<vmem>>, vector<1x1x8xf32>
    %239 = vector.shape_cast %238 : vector<1x1x8xf32> to vector<1x8xf32>
    %c0_405 = arith.constant 0 : index
    %c272 = arith.constant 272 : index
    %240 = vector.load %arg19[%c0_405, %c272] : memref<1x512xf32, #tpu.memory_space<vmem>>, vector<1x8xf32>
    tpu.vector_store %arg19[%c0_405, %c272], %239 {strides = array<i32>} : memref<1x512xf32, #tpu.memory_space<vmem>>, vector<1x8xf32>,
    %c0_406 = arith.constant 0 : index
    %c35 = arith.constant 35 : index
    %c0_407 = arith.constant 0 : index
    %241 = vector.load %arg18[%c0_406, %c35, %c0_407] : memref<1x64x8xf32, #tpu.memory_space<vmem>>, vector<1x1x8xf32>
    %242 = vector.shape_cast %241 : vector<1x1x8xf32> to vector<1x8xf32>
    %c0_408 = arith.constant 0 : index
    %c280 = arith.constant 280 : index
    %243 = vector.load %arg19[%c0_408, %c280] : memref<1x512xf32, #tpu.memory_space<vmem>>, vector<1x8xf32>
    tpu.vector_store %arg19[%c0_408, %c280], %242 {strides = array<i32>} : memref<1x512xf32, #tpu.memory_space<vmem>>, vector<1x8xf32>,
    %c0_409 = arith.constant 0 : index
    %c36 = arith.constant 36 : index
    %c0_410 = arith.constant 0 : index
    %244 = vector.load %arg18[%c0_409, %c36, %c0_410] : memref<1x64x8xf32, #tpu.memory_space<vmem>>, vector<1x1x8xf32>
    %245 = vector.shape_cast %244 : vector<1x1x8xf32> to vector<1x8xf32>
    %c0_411 = arith.constant 0 : index
    %c288 = arith.constant 288 : index
    %246 = vector.load %arg19[%c0_411, %c288] : memref<1x512xf32, #tpu.memory_space<vmem>>, vector<1x8xf32>
    tpu.vector_store %arg19[%c0_411, %c288], %245 {strides = array<i32>} : memref<1x512xf32, #tpu.memory_space<vmem>>, vector<1x8xf32>,
    %c0_412 = arith.constant 0 : index
    %c37 = arith.constant 37 : index
    %c0_413 = arith.constant 0 : index
    %247 = vector.load %arg18[%c0_412, %c37, %c0_413] : memref<1x64x8xf32, #tpu.memory_space<vmem>>, vector<1x1x8xf32>
    %248 = vector.shape_cast %247 : vector<1x1x8xf32> to vector<1x8xf32>
    %c0_414 = arith.constant 0 : index
    %c296 = arith.constant 296 : index
    %249 = vector.load %arg19[%c0_414, %c296] : memref<1x512xf32, #tpu.memory_space<vmem>>, vector<1x8xf32>
    tpu.vector_store %arg19[%c0_414, %c296], %248 {strides = array<i32>} : memref<1x512xf32, #tpu.memory_space<vmem>>, vector<1x8xf32>,
    %c0_415 = arith.constant 0 : index
    %c38 = arith.constant 38 : index
    %c0_416 = arith.constant 0 : index
    %250 = vector.load %arg18[%c0_415, %c38, %c0_416] : memref<1x64x8xf32, #tpu.memory_space<vmem>>, vector<1x1x8xf32>
    %251 = vector.shape_cast %250 : vector<1x1x8xf32> to vector<1x8xf32>
    %c0_417 = arith.constant 0 : index
    %c304 = arith.constant 304 : index
    %252 = vector.load %arg19[%c0_417, %c304] : memref<1x512xf32, #tpu.memory_space<vmem>>, vector<1x8xf32>
    tpu.vector_store %arg19[%c0_417, %c304], %251 {strides = array<i32>} : memref<1x512xf32, #tpu.memory_space<vmem>>, vector<1x8xf32>,
    %c0_418 = arith.constant 0 : index
    %c39 = arith.constant 39 : index
    %c0_419 = arith.constant 0 : index
    %253 = vector.load %arg18[%c0_418, %c39, %c0_419] : memref<1x64x8xf32, #tpu.memory_space<vmem>>, vector<1x1x8xf32>
    %254 = vector.shape_cast %253 : vector<1x1x8xf32> to vector<1x8xf32>
    %c0_420 = arith.constant 0 : index
    %c312 = arith.constant 312 : index
    %255 = vector.load %arg19[%c0_420, %c312] : memref<1x512xf32, #tpu.memory_space<vmem>>, vector<1x8xf32>
    tpu.vector_store %arg19[%c0_420, %c312], %254 {strides = array<i32>} : memref<1x512xf32, #tpu.memory_space<vmem>>, vector<1x8xf32>,
    %c0_421 = arith.constant 0 : index
    %c40_422 = arith.constant 40 : index
    %c0_423 = arith.constant 0 : index
    %256 = vector.load %arg18[%c0_421, %c40_422, %c0_423] : memref<1x64x8xf32, #tpu.memory_space<vmem>>, vector<1x1x8xf32>
    %257 = vector.shape_cast %256 : vector<1x1x8xf32> to vector<1x8xf32>
    %c0_424 = arith.constant 0 : index
    %c320_425 = arith.constant 320 : index
    %258 = vector.load %arg19[%c0_424, %c320_425] : memref<1x512xf32, #tpu.memory_space<vmem>>, vector<1x8xf32>
    tpu.vector_store %arg19[%c0_424, %c320_425], %257 {strides = array<i32>} : memref<1x512xf32, #tpu.memory_space<vmem>>, vector<1x8xf32>,
    %c0_426 = arith.constant 0 : index
    %c41 = arith.constant 41 : index
    %c0_427 = arith.constant 0 : index
    %259 = vector.load %arg18[%c0_426, %c41, %c0_427] : memref<1x64x8xf32, #tpu.memory_space<vmem>>, vector<1x1x8xf32>
    %260 = vector.shape_cast %259 : vector<1x1x8xf32> to vector<1x8xf32>
    %c0_428 = arith.constant 0 : index
    %c328 = arith.constant 328 : index
    %261 = vector.load %arg19[%c0_428, %c328] : memref<1x512xf32, #tpu.memory_space<vmem>>, vector<1x8xf32>
    tpu.vector_store %arg19[%c0_428, %c328], %260 {strides = array<i32>} : memref<1x512xf32, #tpu.memory_space<vmem>>, vector<1x8xf32>,
    %c0_429 = arith.constant 0 : index
    %c42 = arith.constant 42 : index
    %c0_430 = arith.constant 0 : index
    %262 = vector.load %arg18[%c0_429, %c42, %c0_430] : memref<1x64x8xf32, #tpu.memory_space<vmem>>, vector<1x1x8xf32>
    %263 = vector.shape_cast %262 : vector<1x1x8xf32> to vector<1x8xf32>
    %c0_431 = arith.constant 0 : index
    %c336 = arith.constant 336 : index
    %264 = vector.load %arg19[%c0_431, %c336] : memref<1x512xf32, #tpu.memory_space<vmem>>, vector<1x8xf32>
    tpu.vector_store %arg19[%c0_431, %c336], %263 {strides = array<i32>} : memref<1x512xf32, #tpu.memory_space<vmem>>, vector<1x8xf32>,
    %c0_432 = arith.constant 0 : index
    %c43 = arith.constant 43 : index
    %c0_433 = arith.constant 0 : index
    %265 = vector.load %arg18[%c0_432, %c43, %c0_433] : memref<1x64x8xf32, #tpu.memory_space<vmem>>, vector<1x1x8xf32>
    %266 = vector.shape_cast %265 : vector<1x1x8xf32> to vector<1x8xf32>
    %c0_434 = arith.constant 0 : index
    %c344 = arith.constant 344 : index
    %267 = vector.load %arg19[%c0_434, %c344] : memref<1x512xf32, #tpu.memory_space<vmem>>, vector<1x8xf32>
    tpu.vector_store %arg19[%c0_434, %c344], %266 {strides = array<i32>} : memref<1x512xf32, #tpu.memory_space<vmem>>, vector<1x8xf32>,
    %c0_435 = arith.constant 0 : index
    %c44 = arith.constant 44 : index
    %c0_436 = arith.constant 0 : index
    %268 = vector.load %arg18[%c0_435, %c44, %c0_436] : memref<1x64x8xf32, #tpu.memory_space<vmem>>, vector<1x1x8xf32>
    %269 = vector.shape_cast %268 : vector<1x1x8xf32> to vector<1x8xf32>
    %c0_437 = arith.constant 0 : index
    %c352 = arith.constant 352 : index
    %270 = vector.load %arg19[%c0_437, %c352] : memref<1x512xf32, #tpu.memory_space<vmem>>, vector<1x8xf32>
    tpu.vector_store %arg19[%c0_437, %c352], %269 {strides = array<i32>} : memref<1x512xf32, #tpu.memory_space<vmem>>, vector<1x8xf32>,
    %c0_438 = arith.constant 0 : index
    %c45 = arith.constant 45 : index
    %c0_439 = arith.constant 0 : index
    %271 = vector.load %arg18[%c0_438, %c45, %c0_439] : memref<1x64x8xf32, #tpu.memory_space<vmem>>, vector<1x1x8xf32>
    %272 = vector.shape_cast %271 : vector<1x1x8xf32> to vector<1x8xf32>
    %c0_440 = arith.constant 0 : index
    %c360 = arith.constant 360 : index
    %273 = vector.load %arg19[%c0_440, %c360] : memref<1x512xf32, #tpu.memory_space<vmem>>, vector<1x8xf32>
    tpu.vector_store %arg19[%c0_440, %c360], %272 {strides = array<i32>} : memref<1x512xf32, #tpu.memory_space<vmem>>, vector<1x8xf32>,
    %c0_441 = arith.constant 0 : index
    %c46 = arith.constant 46 : index
    %c0_442 = arith.constant 0 : index
    %274 = vector.load %arg18[%c0_441, %c46, %c0_442] : memref<1x64x8xf32, #tpu.memory_space<vmem>>, vector<1x1x8xf32>
    %275 = vector.shape_cast %274 : vector<1x1x8xf32> to vector<1x8xf32>
    %c0_443 = arith.constant 0 : index
    %c368 = arith.constant 368 : index
    %276 = vector.load %arg19[%c0_443, %c368] : memref<1x512xf32, #tpu.memory_space<vmem>>, vector<1x8xf32>
    tpu.vector_store %arg19[%c0_443, %c368], %275 {strides = array<i32>} : memref<1x512xf32, #tpu.memory_space<vmem>>, vector<1x8xf32>,
    %c0_444 = arith.constant 0 : index
    %c47 = arith.constant 47 : index
    %c0_445 = arith.constant 0 : index
    %277 = vector.load %arg18[%c0_444, %c47, %c0_445] : memref<1x64x8xf32, #tpu.memory_space<vmem>>, vector<1x1x8xf32>
    %278 = vector.shape_cast %277 : vector<1x1x8xf32> to vector<1x8xf32>
    %c0_446 = arith.constant 0 : index
    %c376 = arith.constant 376 : index
    %279 = vector.load %arg19[%c0_446, %c376] : memref<1x512xf32, #tpu.memory_space<vmem>>, vector<1x8xf32>
    tpu.vector_store %arg19[%c0_446, %c376], %278 {strides = array<i32>} : memref<1x512xf32, #tpu.memory_space<vmem>>, vector<1x8xf32>,
    %c0_447 = arith.constant 0 : index
    %c48_448 = arith.constant 48 : index
    %c0_449 = arith.constant 0 : index
    %280 = vector.load %arg18[%c0_447, %c48_448, %c0_449] : memref<1x64x8xf32, #tpu.memory_space<vmem>>, vector<1x1x8xf32>
    %281 = vector.shape_cast %280 : vector<1x1x8xf32> to vector<1x8xf32>
    %c0_450 = arith.constant 0 : index
    %c384_451 = arith.constant 384 : index
    %282 = vector.load %arg19[%c0_450, %c384_451] : memref<1x512xf32, #tpu.memory_space<vmem>>, vector<1x8xf32>
    tpu.vector_store %arg19[%c0_450, %c384_451], %281 {strides = array<i32>} : memref<1x512xf32, #tpu.memory_space<vmem>>, vector<1x8xf32>,
    %c0_452 = arith.constant 0 : index
    %c49 = arith.constant 49 : index
    %c0_453 = arith.constant 0 : index
    %283 = vector.load %arg18[%c0_452, %c49, %c0_453] : memref<1x64x8xf32, #tpu.memory_space<vmem>>, vector<1x1x8xf32>
    %284 = vector.shape_cast %283 : vector<1x1x8xf32> to vector<1x8xf32>
    %c0_454 = arith.constant 0 : index
    %c392 = arith.constant 392 : index
    %285 = vector.load %arg19[%c0_454, %c392] : memref<1x512xf32, #tpu.memory_space<vmem>>, vector<1x8xf32>
    tpu.vector_store %arg19[%c0_454, %c392], %284 {strides = array<i32>} : memref<1x512xf32, #tpu.memory_space<vmem>>, vector<1x8xf32>,
    %c0_455 = arith.constant 0 : index
    %c50 = arith.constant 50 : index
    %c0_456 = arith.constant 0 : index
    %286 = vector.load %arg18[%c0_455, %c50, %c0_456] : memref<1x64x8xf32, #tpu.memory_space<vmem>>, vector<1x1x8xf32>
    %287 = vector.shape_cast %286 : vector<1x1x8xf32> to vector<1x8xf32>
    %c0_457 = arith.constant 0 : index
    %c400 = arith.constant 400 : index
    %288 = vector.load %arg19[%c0_457, %c400] : memref<1x512xf32, #tpu.memory_space<vmem>>, vector<1x8xf32>
    tpu.vector_store %arg19[%c0_457, %c400], %287 {strides = array<i32>} : memref<1x512xf32, #tpu.memory_space<vmem>>, vector<1x8xf32>,
    %c0_458 = arith.constant 0 : index
    %c51 = arith.constant 51 : index
    %c0_459 = arith.constant 0 : index
    %289 = vector.load %arg18[%c0_458, %c51, %c0_459] : memref<1x64x8xf32, #tpu.memory_space<vmem>>, vector<1x1x8xf32>
    %290 = vector.shape_cast %289 : vector<1x1x8xf32> to vector<1x8xf32>
    %c0_460 = arith.constant 0 : index
    %c408 = arith.constant 408 : index
    %291 = vector.load %arg19[%c0_460, %c408] : memref<1x512xf32, #tpu.memory_space<vmem>>, vector<1x8xf32>
    tpu.vector_store %arg19[%c0_460, %c408], %290 {strides = array<i32>} : memref<1x512xf32, #tpu.memory_space<vmem>>, vector<1x8xf32>,
    %c0_461 = arith.constant 0 : index
    %c52 = arith.constant 52 : index
    %c0_462 = arith.constant 0 : index
    %292 = vector.load %arg18[%c0_461, %c52, %c0_462] : memref<1x64x8xf32, #tpu.memory_space<vmem>>, vector<1x1x8xf32>
    %293 = vector.shape_cast %292 : vector<1x1x8xf32> to vector<1x8xf32>
    %c0_463 = arith.constant 0 : index
    %c416 = arith.constant 416 : index
    %294 = vector.load %arg19[%c0_463, %c416] : memref<1x512xf32, #tpu.memory_space<vmem>>, vector<1x8xf32>
    tpu.vector_store %arg19[%c0_463, %c416], %293 {strides = array<i32>} : memref<1x512xf32, #tpu.memory_space<vmem>>, vector<1x8xf32>,
    %c0_464 = arith.constant 0 : index
    %c53 = arith.constant 53 : index
    %c0_465 = arith.constant 0 : index
    %295 = vector.load %arg18[%c0_464, %c53, %c0_465] : memref<1x64x8xf32, #tpu.memory_space<vmem>>, vector<1x1x8xf32>
    %296 = vector.shape_cast %295 : vector<1x1x8xf32> to vector<1x8xf32>
    %c0_466 = arith.constant 0 : index
    %c424 = arith.constant 424 : index
    %297 = vector.load %arg19[%c0_466, %c424] : memref<1x512xf32, #tpu.memory_space<vmem>>, vector<1x8xf32>
    tpu.vector_store %arg19[%c0_466, %c424], %296 {strides = array<i32>} : memref<1x512xf32, #tpu.memory_space<vmem>>, vector<1x8xf32>,
    %c0_467 = arith.constant 0 : index
    %c54 = arith.constant 54 : index
    %c0_468 = arith.constant 0 : index
    %298 = vector.load %arg18[%c0_467, %c54, %c0_468] : memref<1x64x8xf32, #tpu.memory_space<vmem>>, vector<1x1x8xf32>
    %299 = vector.shape_cast %298 : vector<1x1x8xf32> to vector<1x8xf32>
    %c0_469 = arith.constant 0 : index
    %c432 = arith.constant 432 : index
    %300 = vector.load %arg19[%c0_469, %c432] : memref<1x512xf32, #tpu.memory_space<vmem>>, vector<1x8xf32>
    tpu.vector_store %arg19[%c0_469, %c432], %299 {strides = array<i32>} : memref<1x512xf32, #tpu.memory_space<vmem>>, vector<1x8xf32>,
    %c0_470 = arith.constant 0 : index
    %c55 = arith.constant 55 : index
    %c0_471 = arith.constant 0 : index
    %301 = vector.load %arg18[%c0_470, %c55, %c0_471] : memref<1x64x8xf32, #tpu.memory_space<vmem>>, vector<1x1x8xf32>
    %302 = vector.shape_cast %301 : vector<1x1x8xf32> to vector<1x8xf32>
    %c0_472 = arith.constant 0 : index
    %c440 = arith.constant 440 : index
    %303 = vector.load %arg19[%c0_472, %c440] : memref<1x512xf32, #tpu.memory_space<vmem>>, vector<1x8xf32>
    tpu.vector_store %arg19[%c0_472, %c440], %302 {strides = array<i32>} : memref<1x512xf32, #tpu.memory_space<vmem>>, vector<1x8xf32>,
    %c0_473 = arith.constant 0 : index
    %c56_474 = arith.constant 56 : index
    %c0_475 = arith.constant 0 : index
    %304 = vector.load %arg18[%c0_473, %c56_474, %c0_475] : memref<1x64x8xf32, #tpu.memory_space<vmem>>, vector<1x1x8xf32>
    %305 = vector.shape_cast %304 : vector<1x1x8xf32> to vector<1x8xf32>
    %c0_476 = arith.constant 0 : index
    %c448_477 = arith.constant 448 : index
    %306 = vector.load %arg19[%c0_476, %c448_477] : memref<1x512xf32, #tpu.memory_space<vmem>>, vector<1x8xf32>
    tpu.vector_store %arg19[%c0_476, %c448_477], %305 {strides = array<i32>} : memref<1x512xf32, #tpu.memory_space<vmem>>, vector<1x8xf32>,
    %c0_478 = arith.constant 0 : index
    %c57 = arith.constant 57 : index
    %c0_479 = arith.constant 0 : index
    %307 = vector.load %arg18[%c0_478, %c57, %c0_479] : memref<1x64x8xf32, #tpu.memory_space<vmem>>, vector<1x1x8xf32>
    %308 = vector.shape_cast %307 : vector<1x1x8xf32> to vector<1x8xf32>
    %c0_480 = arith.constant 0 : index
    %c456 = arith.constant 456 : index
    %309 = vector.load %arg19[%c0_480, %c456] : memref<1x512xf32, #tpu.memory_space<vmem>>, vector<1x8xf32>
    tpu.vector_store %arg19[%c0_480, %c456], %308 {strides = array<i32>} : memref<1x512xf32, #tpu.memory_space<vmem>>, vector<1x8xf32>,
    %c0_481 = arith.constant 0 : index
    %c58 = arith.constant 58 : index
    %c0_482 = arith.constant 0 : index
    %310 = vector.load %arg18[%c0_481, %c58, %c0_482] : memref<1x64x8xf32, #tpu.memory_space<vmem>>, vector<1x1x8xf32>
    %311 = vector.shape_cast %310 : vector<1x1x8xf32> to vector<1x8xf32>
    %c0_483 = arith.constant 0 : index
    %c464 = arith.constant 464 : index
    %312 = vector.load %arg19[%c0_483, %c464] : memref<1x512xf32, #tpu.memory_space<vmem>>, vector<1x8xf32>
    tpu.vector_store %arg19[%c0_483, %c464], %311 {strides = array<i32>} : memref<1x512xf32, #tpu.memory_space<vmem>>, vector<1x8xf32>,
    %c0_484 = arith.constant 0 : index
    %c59 = arith.constant 59 : index
    %c0_485 = arith.constant 0 : index
    %313 = vector.load %arg18[%c0_484, %c59, %c0_485] : memref<1x64x8xf32, #tpu.memory_space<vmem>>, vector<1x1x8xf32>
    %314 = vector.shape_cast %313 : vector<1x1x8xf32> to vector<1x8xf32>
    %c0_486 = arith.constant 0 : index
    %c472 = arith.constant 472 : index
    %315 = vector.load %arg19[%c0_486, %c472] : memref<1x512xf32, #tpu.memory_space<vmem>>, vector<1x8xf32>
    tpu.vector_store %arg19[%c0_486, %c472], %314 {strides = array<i32>} : memref<1x512xf32, #tpu.memory_space<vmem>>, vector<1x8xf32>,
    %c0_487 = arith.constant 0 : index
    %c60 = arith.constant 60 : index
    %c0_488 = arith.constant 0 : index
    %316 = vector.load %arg18[%c0_487, %c60, %c0_488] : memref<1x64x8xf32, #tpu.memory_space<vmem>>, vector<1x1x8xf32>
    %317 = vector.shape_cast %316 : vector<1x1x8xf32> to vector<1x8xf32>
    %c0_489 = arith.constant 0 : index
    %c480 = arith.constant 480 : index
    %318 = vector.load %arg19[%c0_489, %c480] : memref<1x512xf32, #tpu.memory_space<vmem>>, vector<1x8xf32>
    tpu.vector_store %arg19[%c0_489, %c480], %317 {strides = array<i32>} : memref<1x512xf32, #tpu.memory_space<vmem>>, vector<1x8xf32>,
    %c0_490 = arith.constant 0 : index
    %c61 = arith.constant 61 : index
    %c0_491 = arith.constant 0 : index
    %319 = vector.load %arg18[%c0_490, %c61, %c0_491] : memref<1x64x8xf32, #tpu.memory_space<vmem>>, vector<1x1x8xf32>
    %320 = vector.shape_cast %319 : vector<1x1x8xf32> to vector<1x8xf32>
    %c0_492 = arith.constant 0 : index
    %c488 = arith.constant 488 : index
    %321 = vector.load %arg19[%c0_492, %c488] : memref<1x512xf32, #tpu.memory_space<vmem>>, vector<1x8xf32>
    tpu.vector_store %arg19[%c0_492, %c488], %320 {strides = array<i32>} : memref<1x512xf32, #tpu.memory_space<vmem>>, vector<1x8xf32>,
    %c0_493 = arith.constant 0 : index
    %c62 = arith.constant 62 : index
    %c0_494 = arith.constant 0 : index
    %322 = vector.load %arg18[%c0_493, %c62, %c0_494] : memref<1x64x8xf32, #tpu.memory_space<vmem>>, vector<1x1x8xf32>
    %323 = vector.shape_cast %322 : vector<1x1x8xf32> to vector<1x8xf32>
    %c0_495 = arith.constant 0 : index
    %c496 = arith.constant 496 : index
    %324 = vector.load %arg19[%c0_495, %c496] : memref<1x512xf32, #tpu.memory_space<vmem>>, vector<1x8xf32>
    tpu.vector_store %arg19[%c0_495, %c496], %323 {strides = array<i32>} : memref<1x512xf32, #tpu.memory_space<vmem>>, vector<1x8xf32>,
    %c0_496 = arith.constant 0 : index
    %c63 = arith.constant 63 : index
    %c0_497 = arith.constant 0 : index
    %325 = vector.load %arg18[%c0_496, %c63, %c0_497] : memref<1x64x8xf32, #tpu.memory_space<vmem>>, vector<1x1x8xf32>
    %326 = vector.shape_cast %325 : vector<1x1x8xf32> to vector<1x8xf32>
    %c0_498 = arith.constant 0 : index
    %c504 = arith.constant 504 : index
    %327 = vector.load %arg19[%c0_498, %c504] : memref<1x512xf32, #tpu.memory_space<vmem>>, vector<1x8xf32>
    tpu.vector_store %arg19[%c0_498, %c504], %326 {strides = array<i32>} : memref<1x512xf32, #tpu.memory_space<vmem>>, vector<1x8xf32>,
    %c0_499 = arith.constant 0 : index
    %c0_500 = arith.constant 0 : index
    %328 = vector.load %arg19[%c0_499, %c0_500] : memref<1x512xf32, #tpu.memory_space<vmem>>, vector<1x512xf32>
    %329 = arith.truncf %328 : vector<1x512xf32> to vector<1x512xbf16>
    %c0_501 = arith.constant 0 : index
    %c0_502 = arith.constant 0 : index
    %330 = vector.load %arg10[%c0_501, %c0_502] : memref<512x128xbf16, #tpu.memory_space<vmem>>, vector<512x128xbf16>
    %cst_503 = arith.constant dense<0.000000e+00> : vector<1x128xf32>
    %331 = tpu.matmul %329, %330, %cst_503 {dimension_numbers = #tpu.dot_dimension_numbers<[1], [0], [0], [1], [0, 0, 1, 1], [], []>} : vector<1x512xbf16>, vector<512x128xbf16>, vector<1x128xf32> -> vector<1x128xf32>
    %c0_504 = arith.constant 0 : index
    %c0_505 = arith.constant 0 : index
    %332 = vector.load %arg11[%c0_504, %c0_505] : memref<1x128xf32, #tpu.memory_space<vmem>>, vector<1x128xf32>
    %333 = arith.addf %331, %332 : vector<1x128xf32>
    %334 = vector.extract_strided_slice %333 {offsets = [0, 0], sizes = [1, 64], strides = [1, 1]} : vector<1x128xf32> to vector<1x64xf32>
    %cst_506 = arith.constant dense<0xFF800000> : vector<1xf32>
    %335 = vector.multi_reduction <maximumf>, %334, %cst_506 [1] : vector<1x64xf32> to vector<1xf32>
    %336 = vector.shape_cast %335 : vector<1xf32> to vector<1x1xf32>
    %337 = vector.broadcast %336 : vector<1x1xf32> to vector<1x64xf32>
    %338 = arith.subf %334, %337 : vector<1x64xf32>
    %339 = math.exp %338 : vector<1x64xf32>
    %cst_507 = arith.constant dense<0.000000e+00> : vector<1xf32>
    %340 = vector.multi_reduction <add>, %339, %cst_507 [1] : vector<1x64xf32> to vector<1xf32>
    %341 = vector.shape_cast %340 : vector<1xf32> to vector<1x1xf32>
    %342 = math.log %341 : vector<1x1xf32>
    %343 = vector.broadcast %342 : vector<1x1xf32> to vector<1x64xf32>
    %344 = arith.subf %338, %343 : vector<1x64xf32>
    %345 = vector.extract_strided_slice %333 {offsets = [0, 64], sizes = [1, 64], strides = [1, 1]} : vector<1x128xf32> to vector<1x64xf32>
    %cst_508 = arith.constant 0.000000e+00 : f32
    %346 = vector.broadcast %cst_508 : f32 to vector<1x64xf32>
    %347 = arith.maximumf %345, %346 : vector<1x64xf32>
    %c0_509 = arith.constant 0 : index
    %c0_510 = arith.constant 0 : index
    %348 = vector.load %arg12[%c0_509, %c0_510] : memref<1x64xf32, #tpu.memory_space<vmem>>, vector<1x64xf32>
    %349 = arith.mulf %347, %348 : vector<1x64xf32>
    %cst_511 = arith.constant dense<0.000000e+00> : vector<1xf32>
    %350 = vector.multi_reduction <add>, %349, %cst_511 [1] : vector<1x64xf32> to vector<1xf32>
    %351 = vector.shape_cast %350 : vector<1xf32> to vector<1x1xf32>
    %c0_512 = arith.constant 0 : index
    %c0_513 = arith.constant 0 : index
    %352 = vector.load %arg13[%c0_512, %c0_513] : memref<1x1xf32, #tpu.memory_space<vmem>>, vector<1x1xf32>
    %353 = arith.addf %351, %352 : vector<1x1xf32>
    %354 = math.tanh %353 : vector<1x1xf32>
    %c0_514 = arith.constant 0 : index
    %c0_515 = arith.constant 0 : index
    %c0_516 = arith.constant 0 : index
    %355 = vector.load %arg14[%c0_514, %c0_515, %c0_516] : memref<1x1x128xf32, #tpu.memory_space<vmem>>, vector<1x1x64xf32>
    %356 = vector.shape_cast %355 : vector<1x1x64xf32> to vector<1x64xf32>
    %357 = vector.shape_cast %344 : vector<1x64xf32> to vector<1x1x64xf32>
    tpu.vector_store %arg14[%c0_514, %c0_515, %c0_516], %357 {strides = array<i32>} : memref<1x1x128xf32, #tpu.memory_space<vmem>>, vector<1x1x64xf32>,
    %c0_517 = arith.constant 0 : index
    %c0_518 = arith.constant 0 : index
    %c64_519 = arith.constant 64 : index
    %358 = vector.load %arg14[%c0_517, %c0_518, %c64_519] : memref<1x1x128xf32, #tpu.memory_space<vmem>>, vector<1x1x1xf32>
    %359 = vector.shape_cast %358 : vector<1x1x1xf32> to vector<1x1xf32>
    %360 = vector.shape_cast %354 : vector<1x1xf32> to vector<1x1x1xf32>
    tpu.vector_store %arg14[%c0_517, %c0_518, %c64_519], %360 {strides = array<i32>} : memref<1x1x128xf32, #tpu.memory_space<vmem>>, vector<1x1x1xf32>,
    %cst_520 = arith.constant 0.000000e+00 : f32
    %361 = vector.broadcast %cst_520 : f32 to vector<1x63xf32>
    %c0_521 = arith.constant 0 : index
    %c0_522 = arith.constant 0 : index
    %c65 = arith.constant 65 : index
    %362 = vector.load %arg14[%c0_521, %c0_522, %c65] : memref<1x1x128xf32, #tpu.memory_space<vmem>>, vector<1x1x63xf32>
    %363 = vector.shape_cast %362 : vector<1x1x63xf32> to vector<1x63xf32>
    %364 = vector.shape_cast %361 : vector<1x63xf32> to vector<1x1x63xf32>
    tpu.vector_store %arg14[%c0_521, %c0_522, %c65], %364 {strides = array<i32>} : memref<1x1x128xf32, #tpu.memory_space<vmem>>, vector<1x1x63xf32>,
    return
  }
  func.func @transform_0(%arg0: i32) -> (i32, i32, i32, i32) {
    %c0_i32 = arith.constant 0 : i32
    %c0_i32_0 = arith.constant 0 : i32
    %c0_i32_1 = arith.constant 0 : i32
    %c0_i32_2 = arith.constant 0 : i32
    return %arg0, %c0_i32, %c0_i32_0, %c0_i32_1 : i32, i32, i32, i32
  }
  func.func @transform_1(%arg0: i32) -> (i32, i32) {
    %c0_i32 = arith.constant 0 : i32
    %c0_i32_0 = arith.constant 0 : i32
    %c0_i32_1 = arith.constant 0 : i32
    return %c0_i32, %c0_i32_0 : i32, i32
  }
  func.func @transform_2(%arg0: i32) -> (i32, i32) {
    %c0_i32 = arith.constant 0 : i32
    %c0_i32_0 = arith.constant 0 : i32
    %c0_i32_1 = arith.constant 0 : i32
    return %c0_i32, %c0_i32_0 : i32, i32
  }
  func.func @transform_3(%arg0: i32) -> (i32, i32) {
    %c0_i32 = arith.constant 0 : i32
    %c0_i32_0 = arith.constant 0 : i32
    %c0_i32_1 = arith.constant 0 : i32
    return %c0_i32, %c0_i32_0 : i32, i32
  }
  func.func @transform_4(%arg0: i32) -> (i32, i32) {
    %c0_i32 = arith.constant 0 : i32
    %c0_i32_0 = arith.constant 0 : i32
    %c0_i32_1 = arith.constant 0 : i32
    return %c0_i32, %c0_i32_0 : i32, i32
  }
  func.func @transform_5(%arg0: i32) -> (i32, i32) {
    %c0_i32 = arith.constant 0 : i32
    %c0_i32_0 = arith.constant 0 : i32
    %c0_i32_1 = arith.constant 0 : i32
    return %c0_i32, %c0_i32_0 : i32, i32
  }
  func.func @transform_6(%arg0: i32) -> (i32, i32) {
    %c0_i32 = arith.constant 0 : i32
    %c0_i32_0 = arith.constant 0 : i32
    %c0_i32_1 = arith.constant 0 : i32
    return %c0_i32, %c0_i32_0 : i32, i32
  }
  func.func @transform_7(%arg0: i32) -> (i32, i32) {
    %c0_i32 = arith.constant 0 : i32
    %c0_i32_0 = arith.constant 0 : i32
    %c0_i32_1 = arith.constant 0 : i32
    return %c0_i32, %c0_i32_0 : i32, i32
  }
  func.func @transform_8(%arg0: i32) -> (i32, i32) {
    %c0_i32 = arith.constant 0 : i32
    %c0_i32_0 = arith.constant 0 : i32
    %c0_i32_1 = arith.constant 0 : i32
    return %c0_i32, %c0_i32_0 : i32, i32
  }
  func.func @transform_9(%arg0: i32) -> (i32, i32) {
    %c0_i32 = arith.constant 0 : i32
    %c0_i32_0 = arith.constant 0 : i32
    %c0_i32_1 = arith.constant 0 : i32
    return %c0_i32, %c0_i32_0 : i32, i32
  }
  func.func @transform_10(%arg0: i32) -> (i32, i32) {
    %c0_i32 = arith.constant 0 : i32
    %c0_i32_0 = arith.constant 0 : i32
    %c0_i32_1 = arith.constant 0 : i32
    return %c0_i32, %c0_i32_0 : i32, i32
  }
  func.func @transform_11(%arg0: i32) -> (i32, i32) {
    %c0_i32 = arith.constant 0 : i32
    %c0_i32_0 = arith.constant 0 : i32
    %c0_i32_1 = arith.constant 0 : i32
    return %c0_i32, %c0_i32_0 : i32, i32
  }
  func.func @transform_12(%arg0: i32) -> (i32, i32) {
    %c0_i32 = arith.constant 0 : i32
    %c0_i32_0 = arith.constant 0 : i32
    %c0_i32_1 = arith.constant 0 : i32
    return %c0_i32, %c0_i32_0 : i32, i32
  }
  func.func @transform_13(%arg0: i32) -> (i32, i32, i32) {
    %c0_i32 = arith.constant 0 : i32
    %c0_i32_0 = arith.constant 0 : i32
    %c0_i32_1 = arith.constant 0 : i32
    return %arg0, %c0_i32, %c0_i32_0 : i32, i32, i32
  }
}

</mosaic_0001>

<bundles_post_ra>
// kernel: net_forward.1
= control target key start
LH: loop header
LB: loop body
LE: loop exit
PB: predicated region body
PF: predicated region fallthrough
CT: control target
= control target key end

     0   :  { %s4906_s27 = smov 0   ;;  %s6393_s0 = inlined_call_operand.vmem [shape: f32[2,8,8,4], index: 0, kind: input, shape index: {}]   ;;  %s6394_s1 = inlined_call_operand.vmem [shape: bf16[36,32], index: 1, kind: input, shape index: {}]   ;;  %s6395_s2 = inlined_call_operand.vmem [shape: f32[1,32], index: 2, kind: input, shape index: {}]   ;;  %s6396_s3 = inlined_call_operand.vmem [shape: bf16[288,64], index: 3, kind: input, shape index: {}]   ;;  %s6397_s4 = inlined_call_operand.vmem [shape: f32[1,64], index: 4, kind: input, shape index: {}]   ;;  %s6398_s5 = inlined_call_operand.vmem [shape: bf16[576,128], index: 5, kind: input, shape index: {}]   ;;  %s6399_s6 = inlined_call_operand.vmem [shape: f32[1,128], index: 6, kind: input, shape index: {}]   ;;  %s6400_s7 = inlined_call_operand.vmem [shape: bf16[128,8], index: 7, kind: input, shape index: {}]   ;;  %s6401_s8 = inlined_call_operand.vmem [shape: f32[1,8], index: 8, kind: input, shape index: {}]   ;;  %s6402_s9 = inlined_call_operand.vmem [shape: bf16[512,128], index: 9, kind: input, shape index: {}]   ;;  %s6403_s10 = inlined_call_operand.vmem [shape: f32[1,128], index: 10, kind: input, shape index: {}]   ;;  %s6404_s11 = inlined_call_operand.vmem [shape: f32[1,64], index: 11, kind: input, shape index: {}]   ;;  %s6405_s12 = inlined_call_operand.<no memory space> [shape: f32[1,1], index: 12, kind: input, shape index: {}]   ;;  %s6406_s13 = inlined_call_operand.vmem [shape: f32[2,1,128], index: 13, kind: output, shape index: {}]  }
   0x1   :  { %v18_v0 = vstv %s6405_s12 }
   0x2   :  { %19 = vst [vmem:[#allocation7] sm:$0x1] %v18_v0 }
   0x3 LB: > { %s4224_s28 = sadd.s32 4294967295, %s4810_s27   ;;  %p4228_p0 = scmp.ge.s32.totalorder %s4810_s27, 1  ;;  %s4810_s27 = sphi %s4906_s27, %s25_s27  }
   0x4   : > { %p389_p1 = scmp.lt.s32.totalorder %s4810_s27, 3 }
   0x6   : > { %p390_p2 = pnand %p4228_p0, %p389_p1 }
   0x7   : > { %p431_p3 = scmp.lt.s32.totalorder (!%p390_p2), %s4224_s28, 1  ;;  %vm450_vm0 = vcmask (!%p390_p2), 24576   ;;  %v4812_v1 = vmov (!%p390_p2), 0.0   ;;  %vm448_vm1 = vcmask (!%p390_p2), 31744   ;;  %vm468_vm2 = vcmask (!%p390_p2), 64544   ;;  %s4813_s15 = smov (!%p390_p2), 4  }
   0x8   : > { %393 = sbr.rel (%p390_p2) target bundleno = 2315 (0x90b), region = 72  ;;  %454 = vst.msk [vmem:[#allocation2 + $0x18] sm:$0x1] (!%p390_p2), %vm450_vm0, %v4812_v1  ;;  %452 = vst.msk [vmem:[#allocation2 + $0x8] sm:$0x1] (!%p390_p2), %vm450_vm0, %v4812_v1  ;;  %vm507_vm3 = vcmask (!%p390_p2), 90176  }
   0x9   : > { %453 = vst.msk [vmem:[#allocation2 + $0x10] sm:$0x1] (!%p390_p2), %vm450_vm0, %v4812_v1  ;;  %455 = vst.msk [vmem:[#allocation2 + $0x20] sm:$0x1] (!%p390_p2), %vm450_vm0, %v4812_v1  ;;  %vm545_vm4 = vcmask (!%p390_p2), 122976   ;;  %vm505_vm5 = vcmask (!%p390_p2), 97344  }
   0xa   : > { %456 = vst.msk [vmem:[#allocation2 + $0x28] sm:$0x1] (!%p390_p2), %vm450_vm0, %v4812_v1  ;;  %457 = vst.msk [vmem:[#allocation2 + $0x30] sm:$0x1] (!%p390_p2), %vm450_vm0, %v4812_v1  ;;  %vm460_vm6 = vcmask (!%p390_p2), 30720   ;;  %s4814_s16 = smov (!%p390_p2), 8  }
   0xb   : > { %458 = vst.msk [vmem:[#allocation2 + $0x38] sm:$0x1] (!%p390_p2), %vm450_vm0, %v4812_v1  ;;  %s4815_s17 = smov (!%p390_p2), 12   ;;  %s4816_s18 = smov (!%p390_p2), 16   ;;  %v4701_v9 = vld [vmem:[%s6394_s1] sm:$0xff] (!%p390_p2)   ;;  %v4702_v10 = vld [vmem:[%s6394_s1 + $0x8] sm:$0xff] (!%p390_p2)  }
   0xc   : > { %449 = vst.msk [vmem:[#allocation2] sm:$0xff] (!%p390_p2), %vm448_vm1, %v4812_v1  ;;  %s4817_s19 = smov (!%p390_p2), 20   ;;  %s4818_s20 = smov (!%p390_p2), 24   ;;  %4605 = vmatprep.subr.bf16.mxu0 (!%p390_p2), %v4701_v9  ;;  %v4703_v11 = vld [vmem:[%s6394_s1 + $0x10] ss:$0 sps:$4 sm:$0x33] (!%p390_p2)  }
   0xd   : > { %451 = vst.msk [vmem:[#allocation2] sm:$0x1] (!%p390_p2), %vm450_vm0, %v4812_v1  ;;  %4606 = vmatpush3.bf16.msra.mxu0 (!%p390_p2), %v4701_v9  ;;  %s4819_s25 = smov (!%p390_p2), 28   ;;  %vm826_vm7 = vcmask (!%p390_p2), 1041408   ;;  %s4820_s29 = smov (!%p390_p2), 32   ;;  %vm537_vm8 = vcmask (!%p390_p2), 97345  }
   0xe   : > { %469 = vst.msk [vmem:[#allocation2] sm:$0xff] (!%p390_p2), %vm468_vm2, %v4812_v1  ;;  %4607 = vmatprep.subr.bf16.mxu0 (!%p390_p2), %v4702_v10  ;;  %v828_v12 = vsel (!%p390_p2), %vm826_vm7, %v4703_v11, 0  ;;  %vm579_vm9 = vcmask (!%p390_p2), 129120   ;;  %vm612_vm10 = vcmask (!%p390_p2), 162944   ;;  %vm621_vm11 = vcmask (!%p390_p2), 188576   ;;  %s4821_s26 = smov (!%p390_p2), 96  }
   0xf   : > { %s6457_s28 = smov (!%p431_p3, %s4224_s28), 1  ;;  %506 = vst.msk [vmem:[#allocation2] sm:$0xff] %vm505_vm5, %v4812_v1  ;;  %vm654_vm12 = vcmask 195745   ;;  %vm666_vm13 = vcmask 221376   ;;  %vm696_vm14 = vcmask 227520   ;;  %vm704_vm15 = vcmask 261344  }
  0x10   : > { %s4407_s12 = sshll.u32 %s6457_s28, 6  ;;  %508 = vst.msk [vmem:[#allocation2 + $0x7] sm:$0x1] %vm507_vm3, %v4812_v1  ;;  %vm736_vm0 = vcmask 286976   ;;  %vm766_vm1 = vcmask 294145   ;;  %vm813_vm5 = vcmask 293888  }
  0x11   : > { %s4931_s14 = scalar_lea.vmem %s6393_s0, %s4407_s12  ;;  %546 = vst.msk [vmem:[#allocation2] sm:$0x1] %vm545_vm4, %v4812_v1  ;;  %4608 = vmatpush3.bf16.msra.mxu0 %v4702_v10  ;;  %s4822_s21 = smov 64  }
  0x12   : > { %v442_v2 = vld [vmem:[%s4931_s14 + $0x10] sm:$0xff]  ;;  %v440_v3 = vld [vmem:[%s4931_s14] sm:$0xff]  ;;  %v441_v4 = vld [vmem:[%s4931_s14 + $0x8] sm:$0xff]  ;;  %4671 = vmatprep.subr.msk.bf16.mxu0 %vm826_vm7, %v4703_v11  ;;  %vm944_vm7 = vcmask 523520   ;;  %s4828_s22 = smov 80   ;;  %s4829_s23 = smov 88  }
  0x13   : > { %481 = vrot.lane.b32.xlu1 %v442_v2, %s4813_s15  ;;  %477 = vrot.lane.b32.xlu0 %v440_v3, %s4813_s15  ;;  %v443_v5 = vld [vmem:[%s4931_s14 + $0x18] sm:$0xff]  ;;  %v4945_v6 = vld [vmem:[%s4931_s14 + $0x20] sm:$0xff]  ;;  %463 = vst.msk [vmem:[#allocation2 + $0x19] sm:$0x7f] %vm460_vm6, %v442_v2  ;;  %461 = vst.msk [vmem:[#allocation2 + $0x9] sm:$0x7f] %vm460_vm6, %v440_v3 }
  0x14   : > { %462 = vst.msk [vmem:[#allocation2 + $0x11] sm:$0x7f] %vm460_vm6, %v441_v4  ;;  %v4951_v7 = vld [vmem:[%s4931_s14 + $0x30] sm:$0xff]  ;;  %v4954_v8 = vld [vmem:[%s4931_s14 + $0x28] sm:$0xff]  ;;  %464 = vst.msk [vmem:[#allocation2 + $0x21] sm:$0x7f] %vm460_vm6, %v443_v5 }
  0x15   : > { %465 = vst.msk [vmem:[#allocation2 + $0x29] sm:$0x7f] %vm460_vm6, %v4945_v6  ;;  %466 = vst.msk [vmem:[#allocation2 + $0x31] sm:$0x7f] %vm460_vm6, %v4954_v8  ;;  %4610 = vmatpush3.bf16.msra.mxu0 %v828_v12  ;;  %v447_v13 = vld [vmem:[%s4931_s14 + $0x38] sm:$0xff]  ;;  %s4824_s14 = smov 40  }
  0x16   : > { %467 = vst.msk [vmem:[#allocation2 + $0x39] sm:$0x7f] %vm460_vm6, %v4951_v7  ;;  %vm905_vm6 = vcmask 253952   ;;  %s4830_s24 = smov 104   ;;  %s6407_s12 = smov 120  }
  0x17   : > { %516 = vrot.lane.b32.xlu1 %v440_v3, %s4814_s16  ;;  %479 = vrot.lane.b32.xlu0 %v441_v4, %s4813_s15  ;;  %1186 = vst.msk [vmem:[#allocation3 + $0x17] sm:$0x1] %vm905_vm6, %v4812_v1  ;;  %1187 = vst.msk [vmem:[#allocation3 + $0x2f] sm:$0x1] %vm905_vm6, %v4812_v1 }
  0x18   : > { %907 = vst.msk [vmem:[#allocation3 + $0x18] sm:$0x1] %vm905_vm6, %v4812_v1  ;;  %908 = vst.msk [vmem:[#allocation3 + $0x30] sm:$0x1] %vm905_vm6, %v4812_v1 }
  0x19   : > { %909 = vst.msk [vmem:[#allocation3 + $0x48] sm:$0x1] %vm905_vm6, %v4812_v1  ;;  %910 = vst.msk [vmem:[#allocation3 + $0x60] sm:$0x1] %vm905_vm6, %v4812_v1 }
  0x1a   : > { %911 = vst.msk [vmem:[#allocation3 + $0x78] sm:$0x1] %vm905_vm6, %v4812_v1  ;;  %912 = vst.msk [vmem:[#allocation3 + $0x90] sm:$0x1] %vm905_vm6, %v4812_v1 }
  0x1b   : > { %520 = vrot.lane.b32.xlu1 %v442_v2, %s4814_s16  ;;  %518 = vrot.lane.b32.xlu0 %v441_v4, %s4814_s16  ;;  %913 = vst.msk [vmem:[#allocation3 + $0xa8] sm:$0x1] %vm905_vm6, %v4812_v1  ;;  %1188 = vst.msk [vmem:[#allocation3 + $0x47] sm:$0x1] %vm905_vm6, %v4812_v1 }
  0x1c   : > { %1189 = vst.msk [vmem:[#allocation3 + $0x5f] sm:$0x1] %vm905_vm6, %v4812_v1  ;;  %1190 = vst.msk [vmem:[#allocation3 + $0x77] sm:$0x1] %vm905_vm6, %v4812_v1 }
  0x1d   : > { %1191 = vst.msk [vmem:[#allocation3 + $0x8f] sm:$0x1] %vm905_vm6, %v4812_v1  ;;  %1192 = vst.msk [vmem:[#allocation3 + $0xa7] sm:$0x1] %vm905_vm6, %v4812_v1 }
  0x1f   : > { %557 = vrot.lane.b32.xlu1 %v441_v4, %s4815_s17  ;;  %555 = vrot.lane.b32.xlu0 %v440_v3, %s4815_s17 }
  0x23   : > { %561 = vrot.lane.b32.xlu1 %v443_v5, %s4815_s17  ;;  %559 = vrot.lane.b32.xlu0 %v442_v2, %s4815_s17 }
  0x27   : > { %590 = vrot.lane.b32.xlu1 %v441_v4, %s4816_s18  ;;  %588 = vrot.lane.b32.xlu0 %v440_v3, %s4816_s18 }
  0x2b   : > { %594 = vrot.lane.b32.xlu1 %v443_v5, %s4816_s18  ;;  %592 = vrot.lane.b32.xlu0 %v442_v2, %s4816_s18 }
  0x2f   : > { %632 = vrot.lane.b32.xlu1 %v441_v4, %s4817_s19  ;;  %630 = vrot.lane.b32.xlu0 %v440_v3, %s4817_s19 }
  0x33   : > { %636 = vrot.lane.b32.xlu1 %v443_v5, %s4817_s19  ;;  %634 = vrot.lane.b32.xlu0 %v442_v2, %s4817_s19 }
  0x37   : > { %677 = vrot.lane.b32.xlu1 %v442_v2, %s4818_s20  ;;  %675 = vrot.lane.b32.xlu0 %v441_v4, %s4818_s20 }
  0x3b   : > { %681 = vrot.lane.b32.xlu1 %v4945_v6, %s4818_s20  ;;  %679 = vrot.lane.b32.xlu0 %v443_v5, %s4818_s20 }
  0x3f   : > { %708 = vrot.lane.b32.xlu1 %v442_v2, %s4819_s25  ;;  %706 = vrot.lane.b32.xlu0 %v441_v4, %s4819_s25 }
  0x43   : > { %712 = vrot.lane.b32.xlu1 %v4945_v6, %s4819_s25  ;;  %710 = vrot.lane.b32.xlu0 %v443_v5, %s4819_s25 }
  0x47   : > { %747 = vrot.lane.b32.xlu1 %v442_v2, %s4820_s29  ;;  %745 = vrot.lane.b32.xlu0 %v441_v4, %s4820_s29 }
  0x4b   : > { %751 = vrot.lane.b32.xlu1 %v4945_v6, %s4820_s29  ;;  %749 = vrot.lane.b32.xlu0 %v443_v5, %s4820_s29 }
  0x4f   : > { %483 = vrot.lane.b32.xlu1 %v443_v5, %s4813_s15  ;;  %489 = vrot.lane.b32.xlu0 %v4951_v7, %s4813_s15 }
  0x53   : > { %528 = vrot.lane.b32.xlu1 %v4951_v7, %s4814_s16  ;;  %485 = vrot.lane.b32.xlu0 %v4945_v6, %s4813_s15 }
  0x57   : > { %522 = vrot.lane.b32.xlu1 %v443_v5, %s4814_s16  ;;  %487 = vrot.lane.b32.xlu0 %v4954_v8, %s4813_s15  ;;  %s4825_s15 = smov 48  }
  0x5b   : > { %569 = vrot.lane.b32.xlu1 %v447_v13, %s4815_s17  ;;  %524 = vrot.lane.b32.xlu0 %v4945_v6, %s4814_s16 }
  0x5f   : > { %563 = vrot.lane.b32.xlu1 %v4945_v6, %s4815_s17  ;;  %526 = vrot.lane.b32.xlu0 %v4954_v8, %s4814_s16 }
  0x63   : > { %602 = vrot.lane.b32.xlu1 %v447_v13, %s4816_s18  ;;  %565 = vrot.lane.b32.xlu0 %v4954_v8, %s4815_s17 }
  0x67   : > { %596 = vrot.lane.b32.xlu1 %v4945_v6, %s4816_s18  ;;  %567 = vrot.lane.b32.xlu0 %v4951_v7, %s4815_s17  ;;  %s4826_s17 = smov 56  }
  0x6b   : > { %644 = vrot.lane.b32.xlu1 %v447_v13, %s4817_s19  ;;  %598 = vrot.lane.b32.xlu0 %v4954_v8, %s4816_s18 }
  0x6f   : > { %638 = vrot.lane.b32.xlu1 %v4945_v6, %s4817_s19  ;;  %600 = vrot.lane.b32.xlu0 %v4951_v7, %s4816_s18 }
  0x73   : > { %642 = vrot.lane.b32.xlu1 %v4951_v7, %s4817_s19  ;;  %640 = vrot.lane.b32.xlu0 %v4954_v8, %s4817_s19  ;;  %s4827_s19 = smov 72  }
  0x77   : > { %685 = vrot.lane.b32.xlu1 %v4951_v7, %s4818_s20  ;;  %683 = vrot.lane.b32.xlu0 %v4954_v8, %s4818_s20 }
  0x7b   : > { %714 = vrot.lane.b32.xlu1 %v4954_v8, %s4819_s25  ;;  %687 = vrot.lane.b32.xlu0 %v447_v13, %s4818_s20 }
  0x7f   : > { %718 = vrot.lane.b32.xlu1 %v447_v13, %s4819_s25  ;;  %716 = vrot.lane.b32.xlu0 %v4951_v7, %s4819_s25  ;;  %s4831_s25 = smov 112  }
  0x83   : > { %755 = vrot.lane.b32.xlu1 %v4951_v7, %s4820_s29  ;;  %753 = vrot.lane.b32.xlu0 %v4954_v8, %s4820_s29 }
  0x85   : > { %v482_v14 = vpop.permute.xlu1 %481  ;;  %v478_v15 = vpop.permute.xlu0 %477 }
  0x86   : > { %500 = vst.msk [vmem:[#allocation2 + $0x18] sm:$0xff] %vm468_vm2, %v482_v14  ;;  %498 = vst.msk [vmem:[#allocation2 + $0x8] sm:$0xff] %vm468_vm2, %v478_v15 }
  0x87   : > { %511 = vst.msk [vmem:[#allocation2 + $0x1f] sm:$0x1] %vm507_vm3, %v4812_v1  ;;  %509 = vst.msk [vmem:[#allocation2 + $0xf] sm:$0x1] %vm507_vm3, %v4812_v1  ;;  %757 = vrot.lane.b32.xlu0 %v447_v13, %s4820_s29 }
  0x89   : > { %v517_v16 = vpop.permute.xlu1 %516  ;;  %v480_v17 = vpop.permute.xlu0 %479 }
  0x8a   : > { %538 = vst.msk [vmem:[#allocation2 + $0x7] sm:$0xfe] %vm537_vm8, %v517_v16 }
  0x8b   : > { %499 = vst.msk [vmem:[#allocation2 + $0x10] sm:$0xff] %vm468_vm2, %v480_v17 }
  0x8c   : > { %547 = vst.msk [vmem:[#allocation2 + $0x8] sm:$0x1] %vm545_vm4, %v4812_v1 }
  0x8d   : > { %510 = vst.msk [vmem:[#allocation2 + $0x17] sm:$0x1] %vm507_vm3, %v4812_v1  ;;  %v521_v18 = vpop.permute.xlu1 %520  ;;  %v519_v19 = vpop.permute.xlu0 %518 }
  0x8e   : > { %540 = vst.msk [vmem:[#allocation2 + $0x17] sm:$0xfe] %vm537_vm8, %v521_v18  ;;  %539 = vst.msk [vmem:[#allocation2 + $0xf] sm:$0xfe] %vm537_vm8, %v519_v19 }
  0x8f   : > { %549 = vst.msk [vmem:[#allocation2 + $0x18] sm:$0x1] %vm545_vm4, %v4812_v1  ;;  %548 = vst.msk [vmem:[#allocation2 + $0x10] sm:$0x1] %vm545_vm4, %v4812_v1 }
  0x91   : > { %v558_v20 = vpop.permute.xlu1 %557  ;;  %v556_v21 = vpop.permute.xlu0 %555 }
  0x92   : > { %581 = vst.msk [vmem:[#allocation2 + $0x9] sm:$0x7f] %vm579_vm9, %v558_v20  ;;  %580 = vst.msk [vmem:[#allocation2 + $0x1] sm:$0x7f] %vm579_vm9, %v556_v21 }
  0x95   : > { %v562_v22 = vpop.permute.xlu1 %561  ;;  %v560_v23 = vpop.permute.xlu0 %559 }
  0x96   : > { %583 = vst.msk [vmem:[#allocation2 + $0x19] sm:$0x7f] %vm579_vm9, %v562_v22  ;;  %582 = vst.msk [vmem:[#allocation2 + $0x11] sm:$0x7f] %vm579_vm9, %v560_v23  ;;  %v4704_v22 = vld [vmem:[%s6396_s3 + $0x80] sm:$0xff]   ;;  %v4705_v23 = vld [vmem:[%s6396_s3 + $0x88] sm:$0xff]  }
  0x97   : > { %4619 = vmatprep.subr.bf16.mxu0 %v4704_v22 }
  0x99   : > { %v591_v24 = vpop.permute.xlu1 %590  ;;  %v589_v25 = vpop.permute.xlu0 %588 }
  0x9a   : > { %614 = vst.msk [vmem:[#allocation2 + $0x8] sm:$0xff] %vm612_vm10, %v591_v24  ;;  %613 = vst.msk [vmem:[#allocation2] sm:$0xff] %vm612_vm10, %v589_v25  ;;  %v5244_v24 = vld [vmem:[%s6395_s2] ss:$0 sm:$0xff] }
  0x9b   : > { %623 = vst.msk [vmem:[#allocation2 + $0xf] sm:$0x1] %vm621_vm11, %v4812_v1  ;;  %622 = vst.msk [vmem:[#allocation2 + $0x7] sm:$0x1] %vm621_vm11, %v4812_v1 }
  0x9d   : > { %v595_v26 = vpop.permute.xlu1 %594  ;;  %v593_v27 = vpop.permute.xlu0 %592 }
  0x9e   : > { %616 = vst.msk [vmem:[#allocation2 + $0x18] sm:$0xff] %vm612_vm10, %v595_v26  ;;  %615 = vst.msk [vmem:[#allocation2 + $0x10] sm:$0xff] %vm612_vm10, %v593_v27 }
  0x9f   : > { %625 = vst.msk [vmem:[#allocation2 + $0x1f] sm:$0x1] %vm621_vm11, %v4812_v1  ;;  %624 = vst.msk [vmem:[#allocation2 + $0x17] sm:$0x1] %vm621_vm11, %v4812_v1 }
  0xa1   : > { %v633_v28 = vpop.permute.xlu1 %632  ;;  %v631_v29 = vpop.permute.xlu0 %630 }
  0xa2   : > { %656 = vst.msk [vmem:[#allocation2 + $0x7] sm:$0xfe] %vm654_vm12, %v633_v28  ;;  %655 = vst.msk [vmem:[#allocation2 - $0x1] sm:$0xfe] %vm654_vm12, %v631_v29  ;;  %v4706_v28 = vld [vmem:[%s6396_s3 + $0x40] sm:$0xff]  }
  0xa3   : > { %668 = vst.msk [vmem:[#allocation2 + $0x8] sm:$0x1] %vm666_vm13, %v4812_v1  ;;  %667 = vst.msk [vmem:[#allocation2] sm:$0x1] %vm666_vm13, %v4812_v1  ;;  %4415 = vmatprep.subr.bf16.mxu1 %v4706_v28 }
  0xa5   : > { %v637_v30 = vpop.permute.xlu1 %636  ;;  %v635_v31 = vpop.permute.xlu0 %634 }
  0xa6   : > { %658 = vst.msk [vmem:[#allocation2 + $0x17] sm:$0xfe] %vm654_vm12, %v637_v30  ;;  %657 = vst.msk [vmem:[#allocation2 + $0xf] sm:$0xfe] %vm654_vm12, %v635_v31  ;;  %v4707_v31 = vld [vmem:[%s6396_s3] sm:$0xff]  }
  0xa7   : > { %670 = vst.msk [vmem:[#allocation2 + $0x18] sm:$0x1] %vm666_vm13, %v4812_v1  ;;  %669 = vst.msk [vmem:[#allocation2 + $0x10] sm:$0x1] %vm666_vm13, %v4812_v1  ;;  %4416 = vmatpush3.bf16.msra.mxu1 %v4707_v31 }
  0xa9   : > { %v678_v32 = vpop.permute.xlu1 %677  ;;  %v676_v33 = vpop.permute.xlu0 %675 }
  0xaa   : > { %698 = vst.msk [vmem:[#allocation2 + $0x9] sm:$0x7f] %vm696_vm14, %v678_v32  ;;  %697 = vst.msk [vmem:[#allocation2 + $0x1] sm:$0x7f] %vm696_vm14, %v676_v33 }
  0xad   : > { %v682_v34 = vpop.permute.xlu1 %681  ;;  %v680_v35 = vpop.permute.xlu0 %679 }
  0xae   : > { %700 = vst.msk [vmem:[#allocation2 + $0x19] sm:$0x7f] %vm696_vm14, %v682_v34  ;;  %699 = vst.msk [vmem:[#allocation2 + $0x11] sm:$0x7f] %vm696_vm14, %v680_v35 }
  0xb1   : > { %v709_v36 = vpop.permute.xlu1 %708  ;;  %v707_v37 = vpop.permute.xlu0 %706 }
  0xb2   : > { %728 = vst.msk [vmem:[#allocation2 + $0x8] sm:$0xff] %vm704_vm15, %v709_v36  ;;  %727 = vst.msk [vmem:[#allocation2] sm:$0xff] %vm704_vm15, %v707_v37 }
  0xb3   : > { %738 = vst.msk [vmem:[#allocation2 + $0xf] sm:$0x1] %vm736_vm0, %v4812_v1  ;;  %737 = vst.msk [vmem:[#allocation2 + $0x7] sm:$0x1] %vm736_vm0, %v4812_v1 }
  0xb5   : > { %v713_v38 = vpop.permute.xlu1 %712  ;;  %v711_v39 = vpop.permute.xlu0 %710 }
  0xb6   : > { %730 = vst.msk [vmem:[#allocation2 + $0x18] sm:$0xff] %vm704_vm15, %v713_v38  ;;  %729 = vst.msk [vmem:[#allocation2 + $0x10] sm:$0xff] %vm704_vm15, %v711_v39 }
  0xb7   : > { %740 = vst.msk [vmem:[#allocation2 + $0x1f] sm:$0x1] %vm736_vm0, %v4812_v1  ;;  %739 = vst.msk [vmem:[#allocation2 + $0x17] sm:$0x1] %vm736_vm0, %v4812_v1 }
  0xb9   : > { %v748_v40 = vpop.permute.xlu1 %747  ;;  %v746_v41 = vpop.permute.xlu0 %745 }
  0xba   : > { %768 = vst.msk [vmem:[#allocation2 + $0x7] sm:$0xfe] %vm766_vm1, %v748_v40  ;;  %767 = vst.msk [vmem:[#allocation2 - $0x1] sm:$0xfe] %vm766_vm1, %v746_v41  ;;  %v4708_v40 = vld [vmem:[%s6396_s3 + $0x48] sm:$0xff]  }
  0xbb   : > { %4417 = vmatprep.subr.bf16.mxu1 %v4708_v40 }
  0xbd   : > { %v752_v42 = vpop.permute.xlu1 %751  ;;  %v750_v43 = vpop.permute.xlu0 %749 }
  0xbe   : > { %770 = vst.msk [vmem:[#allocation2 + $0x17] sm:$0xfe] %vm766_vm1, %v752_v42  ;;  %769 = vst.msk [vmem:[#allocation2 + $0xf] sm:$0xfe] %vm766_vm1, %v750_v43  ;;  %v4709_v43 = vld [vmem:[%s6396_s3 + $0x8] sm:$0xff]  }
  0xbf   : > { %4418 = vmatpush3.bf16.msra.mxu1 %v4709_v43 }
  0xc1   : > { %v484_v44 = vpop.permute.xlu1 %483  ;;  %v490_v45 = vpop.permute.xlu0 %489  ;;  %v774_v46 = vld [vmem:[#allocation2] sm:$0xff]  ;;  %v775_v47 = vld [vmem:[#allocation2 + $0x8] sm:$0xff] }
  0xc2   : > { %501 = vst.msk [vmem:[#allocation2 + $0x20] sm:$0xff] %vm468_vm2, %v484_v44  ;;  %504 = vst.msk [vmem:[#allocation2 + $0x38] sm:$0xff] %vm468_vm2, %v490_v45  ;;  %v782_v48 = vpack.c.bf16 %v775_v47, %v774_v46 }
  0xc3   : > { %512 = vst.msk [vmem:[#allocation2 + $0x27] sm:$0x1] %vm507_vm3, %v4812_v1  ;;  %515 = vst.msk [vmem:[#allocation2 + $0x3f] sm:$0x1] %vm507_vm3, %v4812_v1 }
  0xc4   : > { %4611 = vmatprep.mubr.msk.bf16.mxu0 %vm813_vm5, %v782_v48  ;;  %v4710_v48 = vld [vmem:[%s6396_s3 + $0x50] sm:$0xff]  }
  0xc5   : > { %v529_v49 = vpop.permute.xlu1 %528  ;;  %v486_v50 = vpop.permute.xlu0 %485  ;;  %v776_v51 = vld [vmem:[#allocation2 + $0x10] sm:$0xff]  ;;  %v777_v52 = vld [vmem:[#allocation2 + $0x18] sm:$0xff]  ;;  %4419 = vmatprep.subr.bf16.mxu1 %v4710_v48 }
  0xc6   : > { %544 = vst.msk [vmem:[#allocation2 + $0x37] sm:$0xfe] %vm537_vm8, %v529_v49  ;;  %v783_v53 = vpack.c.bf16 %v777_v52, %v776_v51  ;;  %v4711_v49 = vld [vmem:[%s6396_s3 + $0x10] sm:$0xff]   ;;  %v4713_v51 = vld [vmem:[%s6396_s3 + $0x18] sm:$0xff]  }
  0xc7   : > { %502 = vst.msk [vmem:[#allocation2 + $0x28] sm:$0xff] %vm468_vm2, %v486_v50  ;;  %4420 = vmatpush3.bf16.msra.mxu1 %v4711_v49  ;;  %v4712_v50 = vld [vmem:[%s6396_s3 + $0x58] sm:$0xff]  }
  0xc8   : > { %553 = vst.msk [vmem:[#allocation2 + $0x38] sm:$0x1] %vm545_vm4, %v4812_v1  ;;  %4612 = vmatmul.mubr.msk.bf16.vlgmr.msra.gmra.mrb[0].mxu0 %vm813_vm5, %v783_v53  ;;  %4421 = vmatprep.subr.bf16.mxu1 %v4712_v50 }
  0xc9   : > { %513 = vst.msk [vmem:[#allocation2 + $0x2f] sm:$0x1] %vm507_vm3, %v4812_v1  ;;  %v523_v54 = vpop.permute.xlu1 %522  ;;  %v488_v55 = vpop.permute.xlu0 %487  ;;  %4620 = vmatpush3.bf16.msra.mxu0 %v4704_v22 }
  0xca   : > { %541 = vst.msk [vmem:[#allocation2 + $0x1f] sm:$0xfe] %vm537_vm8, %v523_v54  ;;  %4621 = vmatprep.subr.bf16.mxu0 %v4705_v23 }
  0xcb   : > { %503 = vst.msk [vmem:[#allocation2 + $0x30] sm:$0xff] %vm468_vm2, %v488_v55  ;;  %vm664_vm2 = vcmask 228544   ;;  %4422 = vmatpush3.bf16.msra.mxu1 %v4713_v51  ;;  %v4714_v55 = vld [vmem:[%s6396_s3 + $0x60] sm:$0xff]  }
  0xcc   : > { %550 = vst.msk [vmem:[#allocation2 + $0x20] sm:$0x1] %vm545_vm4, %v4812_v1  ;;  %4423 = vmatprep.subr.bf16.mxu1 %v4714_v55 }
  0xcd   : > { %514 = vst.msk [vmem:[#allocation2 + $0x37] sm:$0x1] %vm507_vm3, %v4812_v1  ;;  %v570_v56 = vpop.permute.xlu1 %569  ;;  %v525_v57 = vpop.permute.xlu0 %524  ;;  %vm734_vm3 = vcmask 294144   ;;  %4622 = vmatpush3.bf16.msra.mxu0 %v4705_v23 }
  0xce   : > { %587 = vst.msk [vmem:[#allocation2 + $0x39] sm:$0x7f] %vm579_vm9, %v570_v56 }
  0xcf   : > { %542 = vst.msk [vmem:[#allocation2 + $0x27] sm:$0xfe] %vm537_vm8, %v525_v57  ;;  %v4715_v57 = vld [vmem:[%s6396_s3 + $0x20] sm:$0xff]  }
  0xd0   : > { %551 = vst.msk [vmem:[#allocation2 + $0x28] sm:$0x1] %vm545_vm4, %v4812_v1  ;;  %4424 = vmatpush3.bf16.msra.mxu1 %v4715_v57 }
  0xd1   : > { %v564_v58 = vpop.permute.xlu1 %563  ;;  %v527_v59 = vpop.permute.xlu0 %526 }
  0xd2   : > { %584 = vst.msk [vmem:[#allocation2 + $0x21] sm:$0x7f] %vm579_vm9, %v564_v58  ;;  %v4716_v58 = vld [vmem:[%s6396_s3 + $0x68] sm:$0xff]  }
  0xd3   : > { %543 = vst.msk [vmem:[#allocation2 + $0x2f] sm:$0xfe] %vm537_vm8, %v527_v59  ;;  %vm1201_vm8 = vcmask 260096   ;;  %v4717_v59 = vld [vmem:[%s6396_s3 + $0x28] sm:$0xff]   ;;  %4425 = vmatprep.subr.bf16.mxu1 %v4716_v58 }
  0xd4   : > { %552 = vst.msk [vmem:[#allocation2 + $0x30] sm:$0x1] %vm545_vm4, %v4812_v1  ;;  %vm903_vm4 = vcmask 261120   ;;  %4426 = vmatpush3.bf16.msra.mxu1 %v4717_v59 }
  0xd5   : > { %v603_v60 = vpop.permute.xlu1 %602  ;;  %v566_v61 = vpop.permute.xlu0 %565  ;;  %904 = vst.msk [vmem:[#allocation3] sm:$0xff] %vm903_vm4, %v4812_v1  ;;  %1185 = vst.msk [vmem:[#allocation3 + $0xb8] sm:$0xff] %vm903_vm4, %v4812_v1 }
  0xd6   : > { %620 = vst.msk [vmem:[#allocation2 + $0x38] sm:$0xff] %vm612_vm10, %v603_v60  ;;  %v4718_v60 = vld [vmem:[%s6396_s3 + $0x70] sm:$0xff]  }
  0xd7   : > { %585 = vst.msk [vmem:[#allocation2 + $0x29] sm:$0x7f] %vm579_vm9, %v566_v61  ;;  %v4719_v61 = vld [vmem:[%s6396_s3 + $0x30] sm:$0xff]   ;;  %4427 = vmatprep.subr.bf16.mxu1 %v4718_v60 }
  0xd8   : > { %629 = vst.msk [vmem:[#allocation2 + $0x3f] sm:$0x1] %vm621_vm11, %v4812_v1  ;;  %4428 = vmatpush3.bf16.msra.mxu1 %v4719_v61 }
  0xd9   : > { %v597_v62 = vpop.permute.xlu1 %596  ;;  %v568_v63 = vpop.permute.xlu0 %567  ;;  %906 = vst.msk [vmem:[#allocation3] sm:$0x1] %vm905_vm6, %v4812_v1  ;;  %1193 = vst.msk [vmem:[#allocation3 + $0xbf] sm:$0x1] %vm905_vm6, %v4812_v1  ;;  %vm1648_vm6 = vcmask 1040896  }
  0xda   : > { %617 = vst.msk [vmem:[#allocation2 + $0x20] sm:$0xff] %vm612_vm10, %v597_v62  ;;  %v4720_v62 = vld [vmem:[%s6396_s3 + $0x78] sm:$0xff]  }
  0xdb   : > { %586 = vst.msk [vmem:[#allocation2 + $0x31] sm:$0x7f] %vm579_vm9, %v568_v63  ;;  %vm936_vm9 = vcmask 261121   ;;  %v4721_v63 = vld [vmem:[%s6396_s3 + $0x38] sm:$0xff]   ;;  %4429 = vmatprep.subr.bf16.mxu1 %v4720_v62 }
  0xdc   : > { %626 = vst.msk [vmem:[#allocation2 + $0x27] sm:$0x1] %vm621_vm11, %v4812_v1  ;;  %4430 = vmatpush3.bf16.msra.mxu1 %v4721_v63 }
  0xdd   : > { %v645_v0 = vpop.permute.xlu1 %644  ;;  %v599_v2 = vpop.permute.xlu0 %598  ;;  %945 = vst.msk [vmem:[#allocation3] sm:$0xff] %vm944_vm7, %v4812_v1 }
  0xde   : > { %662 = vst.msk [vmem:[#allocation2 + $0x37] sm:$0xfe] %vm654_vm12, %v645_v0 }
  0xdf   : > { %618 = vst.msk [vmem:[#allocation2 + $0x28] sm:$0xff] %vm612_vm10, %v599_v2 }
  0xe0   : > { %665 = vst.msk [vmem:[#allocation2 + $0x38] sm:$0xff] %vm664_vm2, %v4812_v1  ;;  %vm1546_vm2 = vcmask 523264  }
  0xe1   : > { %627 = vst.msk [vmem:[#allocation2 + $0x2f] sm:$0x1] %vm621_vm11, %v4812_v1  ;;  %v639_v3 = vpop.permute.xlu1 %638  ;;  %v601_v4 = vpop.permute.xlu0 %600 }
  0xe2   : > { %674 = vst.msk [vmem:[#allocation2 + $0x38] sm:$0x1] %vm666_vm13, %v4812_v1 }
  0xe3   : > { %705 = vst.msk [vmem:[#allocation2 + $0x38] sm:$0xff] %vm704_vm15, %v4812_v1 }
  0xe4   : > { %735 = vst.msk [vmem:[#allocation2 + $0x38] sm:$0xff] %vm734_vm3, %v4812_v1  ;;  %vm6409_vm3 = vcmask 516096  }
  0xe5   : > { %659 = vst.msk [vmem:[#allocation2 + $0x1f] sm:$0xfe] %vm654_vm12, %v639_v3  ;;  %v643_v5 = vpop.permute.xlu1 %642  ;;  %v641_v6 = vpop.permute.xlu0 %640 }
  0xe6   : > { %619 = vst.msk [vmem:[#allocation2 + $0x30] sm:$0xff] %vm612_vm10, %v601_v4  ;;  %vm1073_vm10 = vcmask 516352  }
  0xe7   : > { %744 = vst.msk [vmem:[#allocation2 + $0x3f] sm:$0x1] %vm736_vm0, %v4812_v1 }
  0xe8   : > { %671 = vst.msk [vmem:[#allocation2 + $0x20] sm:$0x1] %vm666_vm13, %v4812_v1 }
  0xe9   : > { %628 = vst.msk [vmem:[#allocation2 + $0x37] sm:$0x1] %vm621_vm11, %v4812_v1  ;;  %v686_v7 = vpop.permute.xlu1 %685  ;;  %v684_v8 = vpop.permute.xlu0 %683  ;;  %vm974_vm11 = vcmask 785920  }
  0xea   : > { %661 = vst.msk [vmem:[#allocation2 + $0x2f] sm:$0xfe] %vm654_vm12, %v643_v5  ;;  %660 = vst.msk [vmem:[#allocation2 + $0x27] sm:$0xfe] %vm654_vm12, %v641_v6  ;;  %vm976_vm12 = vcmask 778752  }
  0xeb   : > { %673 = vst.msk [vmem:[#allocation2 + $0x30] sm:$0x1] %vm666_vm13, %v4812_v1  ;;  %672 = vst.msk [vmem:[#allocation2 + $0x28] sm:$0x1] %vm666_vm13, %v4812_v1  ;;  %vm1021_vm13 = vcmask 1041152  }
  0xec   : > { %702 = vst.msk [vmem:[#allocation2 + $0x29] sm:$0x7f] %vm696_vm14, %v686_v7  ;;  %701 = vst.msk [vmem:[#allocation2 + $0x21] sm:$0x7f] %vm696_vm14, %v684_v8 }
  0xed   : > { %v715_v9 = vpop.permute.xlu1 %714  ;;  %v688_v10 = vpop.permute.xlu0 %687  ;;  %975 = vst.msk [vmem:[#allocation3] sm:$0xff] %vm974_vm11, %v4812_v1 }
  0xee   : > { %731 = vst.msk [vmem:[#allocation2 + $0x20] sm:$0xff] %vm704_vm15, %v715_v9  ;;  %v781_v19 = vld [vmem:[#allocation2 + $0x38] sm:$0xff] }
  0xef   : > { %703 = vst.msk [vmem:[#allocation2 + $0x31] sm:$0x7f] %vm696_vm14, %v688_v10  ;;  %vm1013_vm14 = vcmask 784896  }
  0xf0   : > { %741 = vst.msk [vmem:[#allocation2 + $0x27] sm:$0x1] %vm736_vm0, %v4812_v1 }
  0xf1   : > { %v719_v11 = vpop.permute.xlu1 %718  ;;  %v717_v12 = vpop.permute.xlu0 %716  ;;  %977 = vst.msk [vmem:[#allocation3 + $0x7] sm:$0x1] %vm976_vm12, %v4812_v1 }
  0xf2   : > { %733 = vst.msk [vmem:[#allocation2 + $0x30] sm:$0xff] %vm704_vm15, %v719_v11  ;;  %732 = vst.msk [vmem:[#allocation2 + $0x28] sm:$0xff] %vm704_vm15, %v717_v12  ;;  %vm1107_vm15 = vcmask 522496  }
  0xf3   : > { %743 = vst.msk [vmem:[#allocation2 + $0x37] sm:$0x1] %vm736_vm0, %v4812_v1  ;;  %742 = vst.msk [vmem:[#allocation2 + $0x2f] sm:$0x1] %vm736_vm0, %v4812_v1  ;;  %vm1056_vm0 = vcmask 1048321  }
  0xf4   : > { %1022 = vst.msk [vmem:[#allocation3] sm:$0x1] %vm1021_vm13, %v4812_v1 }
  0xf5   : > { %v756_v13 = vpop.permute.xlu1 %755  ;;  %v754_v14 = vpop.permute.xlu0 %753  ;;  %1617 = vst.msk [vmem:[#allocation4 + $0x8] sm:$0xff] %vm1546_vm2, %v4812_v1  ;;  %1547 = vst.msk [vmem:[#allocation4] sm:$0xff] %vm1546_vm2, %v4812_v1 }
  0xf6   : > { %772 = vst.msk [vmem:[#allocation2 + $0x27] sm:$0xfe] %vm766_vm1, %v756_v13  ;;  %771 = vst.msk [vmem:[#allocation2 + $0x1f] sm:$0xfe] %vm766_vm1, %v754_v14 }
  0xf7   : > { %1743 = vst.msk [vmem:[#allocation4 + $0x130] sm:$0xff] %vm1546_vm2, %v4812_v1  ;;  %1771 = vst.msk [vmem:[#allocation4 + $0x138] sm:$0xff] %vm1546_vm2, %v4812_v1 }
  0xf8   : > { %1550 = vst.msk [vmem:[#allocation4 + $0x28] sm:$0x1] %vm6409_vm3, %v4812_v1  ;;  %1551 = vst.msk [vmem:[#allocation4 + $0x50] sm:$0x1] %vm6409_vm3, %v4812_v1 }
  0xf9   : > { %v758_v15 = vpop.permute.xlu0 %757  ;;  %1552 = vst.msk [vmem:[#allocation4 + $0x78] sm:$0x1] %vm6409_vm3, %v4812_v1  ;;  %1553 = vst.msk [vmem:[#allocation4 + $0xa0] sm:$0x1] %vm6409_vm3, %v4812_v1 }
  0xfa   : > { %773 = vst.msk [vmem:[#allocation2 + $0x2f] sm:$0xfe] %vm766_vm1, %v758_v15  ;;  %vm1147_vm1 = vcmask 785921  }
  0xfb   : > { %1554 = vst.msk [vmem:[#allocation4 + $0xc8] sm:$0x1] %vm6409_vm3, %v4812_v1  ;;  %1555 = vst.msk [vmem:[#allocation4 + $0xf0] sm:$0x1] %vm6409_vm3, %v4812_v1 }
  0xfc   : > { %1556 = vst.msk [vmem:[#allocation4 + $0x118] sm:$0x1] %vm6409_vm3, %v4812_v1  ;;  %1619 = vst.msk [vmem:[#allocation4 + $0x37] sm:$0x1] %vm6409_vm3, %v4812_v1 }
  0xfd   : > { %v778_v16 = vld [vmem:[#allocation2 + $0x20] sm:$0xff]  ;;  %v779_v17 = vld [vmem:[#allocation2 + $0x28] sm:$0xff]  ;;  %1620 = vst.msk [vmem:[#allocation4 + $0x5f] sm:$0x1] %vm6409_vm3, %v4812_v1  ;;  %1621 = vst.msk [vmem:[#allocation4 + $0x87] sm:$0x1] %vm6409_vm3, %v4812_v1 }
  0xfe   : > { %v784_v18 = vpack.c.bf16 %v779_v17, %v778_v16  ;;  %1622 = vst.msk [vmem:[#allocation4 + $0xaf] sm:$0x1] %vm6409_vm3, %v4812_v1  ;;  %1623 = vst.msk [vmem:[#allocation4 + $0xd7] sm:$0x1] %vm6409_vm3, %v4812_v1 }
  0xff   : > { %1624 = vst.msk [vmem:[#allocation4 + $0xff] sm:$0x1] %vm6409_vm3, %v4812_v1  ;;  %1625 = vst.msk [vmem:[#allocation4 + $0x127] sm:$0x1] %vm6409_vm3, %v4812_v1 }
 0x100   : > { %4615 = vmatprep.mubr.msk.bf16.mxu0 %vm813_vm5, %v784_v18  ;;  %1744 = vst.msk [vmem:[#allocation4 + $0x18] sm:$0x1] %vm6409_vm3, %v4812_v1  ;;  %1745 = vst.msk [vmem:[#allocation4 + $0x40] sm:$0x1] %vm6409_vm3, %v4812_v1 }
 0x101   : > { %v780_v20 = vld [vmem:[#allocation2 + $0x30] sm:$0xff]  ;;  %1746 = vst.msk [vmem:[#allocation4 + $0x68] sm:$0x1] %vm6409_vm3, %v4812_v1  ;;  %1747 = vst.msk [vmem:[#allocation4 + $0x90] sm:$0x1] %vm6409_vm3, %v4812_v1 }
 0x102   : > { %v785_v21 = vpack.c.bf16 %v781_v19, %v780_v20  ;;  %1748 = vst.msk [vmem:[#allocation4 + $0xb8] sm:$0x1] %vm6409_vm3, %v4812_v1  ;;  %1749 = vst.msk [vmem:[#allocation4 + $0xe0] sm:$0x1] %vm6409_vm3, %v4812_v1 }
 0x103   : > { %1750 = vst.msk [vmem:[#allocation4 + $0x108] sm:$0x1] %vm6409_vm3, %v4812_v1  ;;  %1772 = vst.msk [vmem:[#allocation4 + $0x27] sm:$0x1] %vm6409_vm3, %v4812_v1 }
 0x104   : > { %4616 = vmatmul.mubr.msk.bf16.gmra.mrb[4].mxu0 %vm813_vm5, %v785_v21  ;;  %vm1155_vm5 = vcmask 1048320   ;;  %1773 = vst.msk [vmem:[#allocation4 + $0x4f] sm:$0x1] %vm6409_vm3, %v4812_v1  ;;  %1774 = vst.msk [vmem:[#allocation4 + $0x77] sm:$0x1] %vm6409_vm3, %v4812_v1 }
 0x105   : > { %1775 = vst.msk [vmem:[#allocation4 + $0x9f] sm:$0x1] %vm6409_vm3, %v4812_v1  ;;  %1776 = vst.msk [vmem:[#allocation4 + $0xc7] sm:$0x1] %vm6409_vm3, %v4812_v1 }
 0x106   : > { %1777 = vst.msk [vmem:[#allocation4 + $0xef] sm:$0x1] %vm6409_vm3, %v4812_v1  ;;  %1778 = vst.msk [vmem:[#allocation4 + $0x117] sm:$0x1] %vm6409_vm3, %v4812_v1 }
 0x107   : > { %1618 = vst.msk [vmem:[#allocation4 + $0xf] sm:$0x1] %vm6409_vm3, %v4812_v1  ;;  %1549 = vst.msk [vmem:[#allocation4] sm:$0x1] %vm6409_vm3, %v4812_v1 }
 0x108   : > { %1751 = vst.msk [vmem:[#allocation4 + $0x130] sm:$0x1] %vm6409_vm3, %v4812_v1  ;;  %1779 = vst.msk [vmem:[#allocation4 + $0x13f] sm:$0x1] %vm6409_vm3, %v4812_v1 }
 0x109   : > { %1649 = vst.msk [vmem:[#allocation4 + $0x8] sm:$0x1] %vm1648_vm6, %v4812_v1 }
 0x19b   : > { %v4613_v25 = vpop.f32.mrb[0].mxu0 }
 0x19c   : > { %v873_v26 = vadd.f32 %v4613_v25, %v5244_v24  ;;  %v864_v27 = vpop.f32.mrb[1].mxu0 }
 0x19d   : > { %v865_v29 = vadd.f32 %v5244_v24, %v864_v27  ;;  %v4614_v30 = vpop.f32.mrb[2].mxu0  ;;  %v1232_v27 = vld [vmem:[#allocation3 + $0xb8] sm:$0xff] }
 0x19e   : > { %v897_v32 = vmax.f32 %v873_v26, 0.0  ;;  %v876_v33 = vadd.f32 %v4614_v30, %v5244_v24  ;;  %v867_v34 = vpop.f32.mrb[3].mxu0 }
 0x19f   : > { %v5255_v35 = vmax.f32 %v865_v29, 0.0  ;;  %v868_v36 = vadd.f32 %v5244_v24, %v867_v34 }
 0x1a0   : > { %v5258_v37 = vmax.f32 %v876_v33, 0.0  ;;  %1159 = vrot.lane.b32.xlu0 %v897_v32, %s4821_s26  ;;  %v923_v38 = vrot.slane %v897_v32, 7  ;;  %v987_v39 = vrot.slane %v897_v32, 1  ;;  %1067 = vst.msk [vmem:[#allocation3 + $0x38] sm:$0xff] %vm903_vm4, %v897_v32 }
 0x1a1   : > { %v5265_v41 = vmax.f32 %v868_v36, 0.0  ;;  %946 = vrot.lane.b32.xlu1 %v5255_v35, %s4820_s29  ;;  %1065 = vst.msk [vmem:[#allocation3 + $0x8] sm:$0xff] %vm903_vm4, %v5255_v35  ;;  %v921_v42 = vrot.slane %v5255_v35, 7  ;;  %v985_v52 = vrot.slane %v5255_v35, 1 }
 0x1a2   : > { %1076 = vst.msk [vmem:[#allocation3 + $0x3f] sm:$0x1] %vm1073_vm10, %v4812_v1  ;;  %v5281_v44 = vrot.slane %v5258_v37, 1  ;;  %v5284_v45 = vrot.slane %v5258_v37, 7  ;;  %1074 = vst.msk [vmem:[#allocation3 + $0xf] sm:$0x1] %vm1073_vm10, %v4812_v1 }
 0x1a3   : > { %1203 = vst.msk [vmem:[#allocation3 + $0x28] sm:$0x7f] %vm1201_vm8, %v987_v39  ;;  %v5290_v46 = vrot.slane %v5265_v41, 1  ;;  %v922_v47 = vrot.slane %v5265_v41, 7 }
 0x1a4   : > { %1068 = vst.msk [vmem:[#allocation3 + $0x50] sm:$0xff] %vm903_vm4, %v5258_v37  ;;  %1066 = vst.msk [vmem:[#allocation3 + $0x20] sm:$0xff] %vm903_vm4, %v5265_v41  ;;  %950 = vrot.lane.b32.xlu0 %v897_v32, %s4820_s29 }
 0x1a5   : > { %939 = vst.msk [vmem:[#allocation3 + $0x48] sm:$0xfe] %vm936_vm9, %v923_v38  ;;  %937 = vst.msk [vmem:[#allocation3 + $0x18] sm:$0xfe] %vm936_vm9, %v921_v42  ;;  %1128 = vrot.lane.b32.xlu1 %v923_v38, %s4822_s21 }
 0x1a6   : > { %1077 = vst.msk [vmem:[#allocation3 + $0x57] sm:$0x1] %vm1073_vm10, %v4812_v1  ;;  %1075 = vst.msk [vmem:[#allocation3 + $0x27] sm:$0x1] %vm1073_vm10, %v4812_v1 }
 0x1a7   : > { %1204 = vst.msk [vmem:[#allocation3 + $0x40] sm:$0x7f] %vm1201_vm8, %v5281_v44  ;;  %1202 = vst.msk [vmem:[#allocation3 + $0x10] sm:$0x7f] %vm1201_vm8, %v5290_v46 }
 0x1a8   : > { %940 = vst.msk [vmem:[#allocation3 + $0x60] sm:$0xfe] %vm936_vm9, %v5284_v45  ;;  %938 = vst.msk [vmem:[#allocation3 + $0x30] sm:$0xfe] %vm936_vm9, %v922_v47  ;;  %996 = vrot.lane.b32.xlu0 %v987_v39, %s4822_s21 }
 0x1a9   : > { %1087 = vrot.lane.b32.xlu1 %v987_v39, %s4820_s29 }
 0x1aa   : > { %v1214_v54 = vld [vmem:[#allocation3 + $0x28] sm:$0xff] }
 0x1ac   : > { %992 = vrot.lane.b32.xlu0 %v985_v52, %s4822_s21 }
 0x1ad   : > { %1161 = vrot.lane.b32.xlu1 %v5258_v37, %s4821_s26 }
 0x1ae   : > { %v1211_v53 = vld [vmem:[#allocation3 + $0x10] sm:$0xff]  ;;  %v1217_v20 = vld [vmem:[#allocation3 + $0x40] sm:$0xff] }
 0x1af   : > { %v1235_v56 = vpack.c.bf16 %v1214_v54, %v1211_v53 }
 0x1b0   : > { %1089 = vrot.lane.b32.xlu0 %v5281_v44, %s4820_s29 }
 0x1b1   : > { %4623 = vmatprep.mubr.msk.bf16.mxu0 %vm903_vm4, %v1235_v56  ;;  %1036 = vrot.lane.b32.xlu1 %v923_v38, %s4821_s26 }
 0x1b4   : > { %1038 = vrot.lane.b32.xlu0 %v5284_v45, %s4821_s26 }
 0x1b5   : > { %952 = vrot.lane.b32.xlu1 %v5258_v37, %s4820_s29 }
 0x1b8   : > { %1085 = vrot.lane.b32.xlu0 %v5290_v46, %s4820_s29 }
 0x1b9   : > { %1083 = vrot.lane.b32.xlu1 %v985_v52, %s4820_s29 }
 0x1bc   : > { %1126 = vrot.lane.b32.xlu0 %v922_v47, %s4822_s21 }
 0x1bd   : > { %1157 = vrot.lane.b32.xlu1 %v5265_v41, %s4821_s26 }
 0x1c0   : > { %1034 = vrot.lane.b32.xlu0 %v922_v47, %s4821_s26 }
 0x1c1   : > { %1032 = vrot.lane.b32.xlu1 %v921_v42, %s4821_s26 }
 0x1c5   : > { %948 = vrot.lane.b32.xlu1 %v5265_v41, %s4820_s29 }
 0x1c9   : > { %1130 = vrot.lane.b32.xlu1 %v5284_v45, %s4822_s21 }
 0x1cd   : > { %998 = vrot.lane.b32.xlu1 %v5281_v44, %s4822_s21 }
 0x1d1   : > { %994 = vrot.lane.b32.xlu1 %v5290_v46, %s4822_s21 }
 0x1d7   : > { %v4617_v0 = vpop.f32.mrb[4].mxu0 }
 0x1d8   : > { %v889_v2 = vadd.f32 %v4617_v0, %v5244_v24  ;;  %v880_v3 = vpop.f32.mrb[5].mxu0 }
 0x1d9   : > { %v881_v4 = vadd.f32 %v5244_v24, %v880_v3  ;;  %v4618_v5 = vpop.f32.mrb[6].mxu0 }
 0x1da   : > { %v901_v6 = vmax.f32 %v889_v2, 0.0  ;;  %v892_v7 = vadd.f32 %v4618_v5, %v5244_v24  ;;  %v883_v8 = vpop.f32.mrb[7].mxu0 }
 0x1db   : > { %v899_v9 = vmax.f32 %v881_v4, 0.0  ;;  %v884_v10 = vadd.f32 %v5244_v24, %v883_v8 }
 0x1dc   : > { %v991_v11 = vrot.slane %v901_v6, 1  ;;  %1071 = vst.msk [vmem:[#allocation3 + $0x98] sm:$0xff] %vm903_vm4, %v901_v6  ;;  %v902_v12 = vmax.f32 %v892_v7, 0.0  ;;  %1167 = vrot.lane.b32.xlu0 %v901_v6, %s4821_s26  ;;  %v927_v13 = vrot.slane %v901_v6, 7 }
 0x1dd   : > { %1069 = vst.msk [vmem:[#allocation3 + $0x68] sm:$0xff] %vm903_vm4, %v899_v9  ;;  %v900_v14 = vmax.f32 %v884_v10, 0.0  ;;  %v989_v15 = vrot.slane %v899_v9, 1  ;;  %v925_v16 = vrot.slane %v899_v9, 7 }
 0x1de   : > { %1080 = vst.msk [vmem:[#allocation3 + $0x9f] sm:$0x1] %vm1073_vm10, %v4812_v1  ;;  %v1082_v17 = vrot.slane %v902_v12, 1  ;;  %1078 = vst.msk [vmem:[#allocation3 + $0x6f] sm:$0x1] %vm1073_vm10, %v4812_v1  ;;  %v1031_v29 = vrot.slane %v902_v12, 7 }
 0x1df   : > { %1207 = vst.msk [vmem:[#allocation3 + $0x88] sm:$0x7f] %vm1201_vm8, %v991_v11  ;;  %v990_v18 = vrot.slane %v900_v14, 1  ;;  %1205 = vst.msk [vmem:[#allocation3 + $0x58] sm:$0x7f] %vm1201_vm8, %v989_v15  ;;  %1091 = vrot.lane.b32.xlu1 %v989_v15, %s4820_s29  ;;  %v926_v19 = vrot.slane %v900_v14, 7 }
 0x1e0   : > { %1072 = vst.msk [vmem:[#allocation3 + $0xb0] sm:$0xff] %vm903_vm4, %v902_v12  ;;  %1070 = vst.msk [vmem:[#allocation3 + $0x80] sm:$0xff] %vm903_vm4, %v900_v14  ;;  %958 = vrot.lane.b32.xlu0 %v901_v6, %s4820_s29 }
 0x1e1   : > { %943 = vst.msk [vmem:[#allocation3 + $0xa8] sm:$0xfe] %vm936_vm9, %v927_v13  ;;  %941 = vst.msk [vmem:[#allocation3 + $0x78] sm:$0xfe] %vm936_vm9, %v925_v16 }
 0x1e2   : > { %1081 = vst.msk [vmem:[#allocation3 + $0xb7] sm:$0x1] %vm1073_vm10, %v4812_v1  ;;  %1079 = vst.msk [vmem:[#allocation3 + $0x87] sm:$0x1] %vm1073_vm10, %v4812_v1  ;;  %vm1733_vm10 = vcmask 1047040  }
 0x1e3   : > { %1208 = vst.msk [vmem:[#allocation3 + $0xa0] sm:$0x7f] %vm1201_vm8, %v1082_v17  ;;  %1206 = vst.msk [vmem:[#allocation3 + $0x70] sm:$0x7f] %vm1201_vm8, %v990_v18  ;;  %1165 = vrot.lane.b32.xlu1 %v900_v14, %s4821_s26  ;;  %vm1579_vm8 = vcmask 523265  }
 0x1e4   : > { %942 = vst.msk [vmem:[#allocation3 + $0x90] sm:$0xfe] %vm936_vm9, %v926_v19  ;;  %1163 = vrot.lane.b32.xlu0 %v899_v9, %s4821_s26  ;;  %vm1683_vm9 = vcmask 1048065  }
 0x1e6   : > { %v1220_v21 = vld [vmem:[#allocation3 + $0x58] sm:$0xff]  ;;  %v1226_v24 = vld [vmem:[#allocation3 + $0x88] sm:$0xff] }
 0x1e7   : > { %1040 = vrot.lane.b32.xlu1 %v925_v16, %s4821_s26  ;;  %v1238_v22 = vpack.c.bf16 %v1220_v21, %v1217_v20 }
 0x1e8   : > { %954 = vrot.lane.b32.xlu0 %v899_v9, %s4820_s29 }
 0x1e9   : > { %4624 = vmatmul.mubr.msk.bf16.vlgmr.msra.gmra.mrb[8].mxu0 %vm903_vm4, %v1238_v22 }
 0x1ea   : > { %v1223_v23 = vld [vmem:[#allocation3 + $0x70] sm:$0xff]  ;;  %v1229_v26 = vld [vmem:[#allocation3 + $0xa0] sm:$0xff] }
 0x1eb   : > { %v1241_v25 = vpack.c.bf16 %v1226_v24, %v1223_v23  ;;  %956 = vrot.lane.b32.xlu1 %v900_v14, %s4820_s29  ;;  %v1244_v28 = vpack.c.bf16 %v1232_v27, %v1229_v26 }
 0x1ec   : > { %1136 = vrot.lane.b32.xlu0 %v927_v13, %s4822_s21 }
 0x1ed   : > { %4627 = vmatprep.mubr.msk.bf16.mxu0 %vm903_vm4, %v1241_v25 }
 0x1ef   : > { %1097 = vrot.lane.b32.xlu1 %v1082_v17, %s4820_s29 }
 0x1f0   : > { %1095 = vrot.lane.b32.xlu0 %v991_v11, %s4820_s29 }
 0x1f1   : > { %4628 = vmatmul.mubr.msk.bf16.gmra.mrb[12].mxu0 %vm903_vm4, %v1244_v28  ;;  %vm1587_vm4 = vcmask 1048064  }
 0x1f2   : > { %1588 = vst.msk [vmem:[#allocation4] sm:$0xff] %vm1587_vm4, %v4812_v1  ;;  %1760 = vst.msk [vmem:[#allocation4 + $0x130] sm:$0xff] %vm1587_vm4, %v4812_v1 }
 0x1f3   : > { %1134 = vrot.lane.b32.xlu1 %v926_v19, %s4822_s21 }
 0x1f4   : > { %1132 = vrot.lane.b32.xlu0 %v925_v16, %s4822_s21 }
 0x1f7   : > { %1138 = vrot.lane.b32.xlu1 %v1031_v29, %s4822_s21 }
 0x1f8   : > { %1000 = vrot.lane.b32.xlu0 %v989_v15, %s4822_s21 }
 0x1fb   : > { %1004 = vrot.lane.b32.xlu1 %v991_v11, %s4822_s21 }
 0x1fc   : > { %1093 = vrot.lane.b32.xlu0 %v990_v18, %s4820_s29 }
 0x1ff   : > { %1044 = vrot.lane.b32.xlu1 %v927_v13, %s4821_s26 }
 0x200   : > { %1169 = vrot.lane.b32.xlu0 %v902_v12, %s4821_s26 }
 0x204   : > { %1042 = vrot.lane.b32.xlu0 %v926_v19, %s4821_s26 }
 0x208   : > { %1002 = vrot.lane.b32.xlu0 %v990_v18, %s4822_s21 }
 0x20c   : > { %1046 = vrot.lane.b32.xlu0 %v1031_v29, %s4821_s26 }
 0x212   : > { %v1160_v30 = vpop.permute.xlu0 %1159 }
 0x213   : > { %v947_v31 = vpop.permute.xlu1 %946 }
 0x214   : > { %967 = vst.msk [vmem:[#allocation3 + $0x18] sm:$0xff] %vm944_vm7, %v947_v31 }
 0x215   : > { %978 = vst.msk [vmem:[#allocation3 + $0x1f] sm:$0x1] %vm976_vm12, %v4812_v1 }
 0x216   : > { %v951_v32 = vpop.permute.xlu0 %950 }
 0x217   : > { %969 = vst.msk [vmem:[#allocation3 + $0x48] sm:$0xff] %vm944_vm7, %v951_v32  ;;  %v1129_v33 = vpop.permute.xlu1 %1128 }
 0x218   : > { %980 = vst.msk [vmem:[#allocation3 + $0x4f] sm:$0x1] %vm976_vm12, %v4812_v1 }
 0x21a   : > { %v997_v34 = vpop.permute.xlu0 %996 }
 0x21b   : > { %1016 = vst.msk [vmem:[#allocation3 + $0x48] sm:$0x7f] %vm1013_vm14, %v997_v34  ;;  %v1088_v35 = vpop.permute.xlu1 %1087 }
 0x21c   : > { %1025 = vst.msk [vmem:[#allocation3 + $0x48] sm:$0x1] %vm1021_vm13, %v4812_v1 }
 0x21d   : > { %1110 = vst.msk [vmem:[#allocation3 + $0x38] sm:$0x7f] %vm1107_vm15, %v1088_v35 }
 0x21e   : > { %1120 = vst.msk [vmem:[#allocation3 + $0x38] sm:$0x1] %vm976_vm12, %v4812_v1  ;;  %v993_v36 = vpop.permute.xlu0 %992 }
 0x21f   : > { %1014 = vst.msk [vmem:[#allocation3 + $0x18] sm:$0x7f] %vm1013_vm14, %v993_v36  ;;  %v1162_v37 = vpop.permute.xlu1 %1161 }
 0x220   : > { %1023 = vst.msk [vmem:[#allocation3 + $0x18] sm:$0x1] %vm1021_vm13, %v4812_v1 }
 0x222   : > { %v1090_v38 = vpop.permute.xlu0 %1089 }
 0x223   : > { %1111 = vst.msk [vmem:[#allocation3 + $0x50] sm:$0x7f] %vm1107_vm15, %v1090_v38  ;;  %v1037_v39 = vpop.permute.xlu1 %1036 }
 0x224   : > { %1121 = vst.msk [vmem:[#allocation3 + $0x50] sm:$0x1] %vm976_vm12, %v4812_v1 }
 0x226   : > { %v1039_v40 = vpop.permute.xlu0 %1038 }
 0x227   : > { %1060 = vst.msk [vmem:[#allocation3 + $0x48] sm:$0xfe] %vm1056_vm0, %v1039_v40  ;;  %v953_v41 = vpop.permute.xlu1 %952 }
 0x228   : > { %970 = vst.msk [vmem:[#allocation3 + $0x60] sm:$0xff] %vm944_vm7, %v953_v41 }
 0x229   : > { %981 = vst.msk [vmem:[#allocation3 + $0x67] sm:$0x1] %vm976_vm12, %v4812_v1 }
 0x22a   : > { %v1086_v42 = vpop.permute.xlu0 %1085 }
 0x22b   : > { %1109 = vst.msk [vmem:[#allocation3 + $0x20] sm:$0x7f] %vm1107_vm15, %v1086_v42  ;;  %v1084_v43 = vpop.permute.xlu1 %1083 }
 0x22c   : > { %1119 = vst.msk [vmem:[#allocation3 + $0x20] sm:$0x1] %vm976_vm12, %v4812_v1 }
 0x22d   : > { %1149 = vst.msk [vmem:[#allocation3 + $0x20] sm:$0xfe] %vm1147_vm1, %v1129_v33 }
 0x22e   : > { %1108 = vst.msk [vmem:[#allocation3 + $0x8] sm:$0x7f] %vm1107_vm15, %v1084_v43  ;;  %v1127_v44 = vpop.permute.xlu0 %1126  ;;  %v1218_v16 = vld [vmem:[#allocation3 + $0x48] sm:$0xff]  ;;  %v4722_v43 = vld [vmem:[%s6398_s5 + $0x40] sm:$0xff]  }
 0x22f   : > { %1179 = vst.msk [vmem:[#allocation3 + $0x20] sm:$0xff] %vm1155_vm5, %v1160_v30  ;;  %v1158_v45 = vpop.permute.xlu1 %1157  ;;  %4461 = vmatprep.subr.bf16.mxu0 %v4722_v43 }
 0x230   : > { %1118 = vst.msk [vmem:[#allocation3 + $0x8] sm:$0x1] %vm976_vm12, %v4812_v1 }
 0x231   : > { %1148 = vst.msk [vmem:[#allocation3 + $0x8] sm:$0xfe] %vm1147_vm1, %v1127_v44  ;;  %v4723_v44 = vld [vmem:[%s6398_s5] sm:$0xff]  }
 0x232   : > { %1178 = vst.msk [vmem:[#allocation3 + $0x8] sm:$0xff] %vm1155_vm5, %v1158_v45  ;;  %v1035_v46 = vpop.permute.xlu0 %1034  ;;  %v4724_v45 = vld [vmem:[%s6398_s5 + $0x48] sm:$0xff]   ;;  %4462 = vmatpush3.bf16.msra.mxu0 %v4723_v44 }
 0x233   : > { %1058 = vst.msk [vmem:[#allocation3 + $0x18] sm:$0xfe] %vm1056_vm0, %v1035_v46  ;;  %v1033_v47 = vpop.permute.xlu1 %1032  ;;  %v4725_v46 = vld [vmem:[%s6398_s5 + $0x8] sm:$0xff]   ;;  %4463 = vmatprep.subr.bf16.mxu0 %v4724_v45 }
 0x234   : > { %1057 = vst.msk [vmem:[#allocation3] sm:$0xfe] %vm1056_vm0, %v1033_v47  ;;  %v4726_v47 = vld [vmem:[%s6398_s5 + $0x50] sm:$0xff]  }
 0x236   : > { %v1213_v50 = vld [vmem:[#allocation3 + $0x20] sm:$0xff]  ;;  %4464 = vmatpush3.bf16.msra.mxu0 %v4725_v46 }
 0x237   : > { %v949_v48 = vpop.permute.xlu1 %948  ;;  %4465 = vmatprep.subr.bf16.mxu0 %v4726_v47 }
 0x238   : > { %968 = vst.msk [vmem:[#allocation3 + $0x30] sm:$0xff] %vm944_vm7, %v949_v48  ;;  %v4727_v48 = vld [vmem:[%s6398_s5 + $0x10] sm:$0xff]  }
 0x239   : > { %v1210_v49 = vld [vmem:[#allocation3 + $0x8] sm:$0xff]  ;;  %979 = vst.msk [vmem:[#allocation3 + $0x37] sm:$0x1] %vm976_vm12, %v4812_v1 }
 0x23a   : > { %v1234_v51 = vpack.c.bf16 %v1213_v50, %v1210_v49  ;;  %v1212_v52 = vld [vmem:[#allocation3 + $0x18] sm:$0xff]  ;;  %4466 = vmatpush3.bf16.msra.mxu0 %v4727_v48 }
 0x23b   : > { %v1131_v53 = vpop.permute.xlu1 %1130  ;;  %v1209_v54 = vld [vmem:[#allocation3] sm:$0xff]  ;;  %v4728_v49 = vld [vmem:[%s6398_s5 + $0x58] sm:$0xff]  }
 0x23c   : > { %1440 = vmatprep.mubr.bf16.mxu1 %v1234_v51  ;;  %1150 = vst.msk [vmem:[#allocation3 + $0x38] sm:$0xfe] %vm1147_vm1, %v1131_v53  ;;  %v1233_v55 = vpack.c.bf16 %v1212_v52, %v1209_v54  ;;  %v4729_v50 = vld [vmem:[%s6398_s5 + $0x18] sm:$0xff]   ;;  %4467 = vmatprep.subr.bf16.mxu0 %v4728_v49  ;;  %v4730_v51 = vld [vmem:[%s6398_s5 + $0x60] sm:$0xff]   ;;  %v4732_v54 = vld [vmem:[%s6398_s5 + $0x68] sm:$0xff]  }
 0x23d   : > { %1180 = vst.msk [vmem:[#allocation3 + $0x38] sm:$0xff] %vm1155_vm5, %v1162_v37  ;;  %v4731_v52 = vld [vmem:[%s6398_s5 + $0x20] sm:$0xff]  }
 0x23e   : > { %1441 = vmatmul.mubr.bf16.vlgmr.msra.gmra.mrb[0].mxu1 %v1233_v55  ;;  %4468 = vmatpush3.bf16.msra.mxu0 %v4729_v50  ;;  %v5651_v55 = vld [vmem:[%s6397_s4] ss:$0 sm:$0xff] }
 0x23f   : > { %v999_v56 = vpop.permute.xlu1 %998  ;;  %4469 = vmatprep.subr.bf16.mxu0 %v4730_v51 }
 0x240   : > { %1017 = vst.msk [vmem:[#allocation3 + $0x60] sm:$0x7f] %vm1013_vm14, %v999_v56 }
 0x241   : > { %1026 = vst.msk [vmem:[#allocation3 + $0x60] sm:$0x1] %vm1021_vm13, %v4812_v1 }
 0x242   : > { %4470 = vmatpush3.bf16.msra.mxu0 %v4731_v52 }
 0x243   : > { %v995_v57 = vpop.permute.xlu1 %994  ;;  %4471 = vmatprep.subr.bf16.mxu0 %v4732_v54 }
 0x244   : > { %1015 = vst.msk [vmem:[#allocation3 + $0x30] sm:$0x7f] %vm1013_vm14, %v995_v57  ;;  %v1216_v13 = vld [vmem:[#allocation3 + $0x38] sm:$0xff]  ;;  %v4733_v57 = vld [vmem:[%s6398_s5 + $0x28] sm:$0xff]  }
 0x245   : > { %1024 = vst.msk [vmem:[#allocation3 + $0x30] sm:$0x1] %vm1021_vm13, %v4812_v1 }
 0x246   : > { %1059 = vst.msk [vmem:[#allocation3 + $0x30] sm:$0xfe] %vm1056_vm0, %v1037_v39  ;;  %4472 = vmatpush3.bf16.msra.mxu0 %v4733_v57 }
 0x24d   : > { %v1215_v12 = vld [vmem:[#allocation3 + $0x30] sm:$0xff] }
 0x24e   : > { %v1168_v58 = vpop.permute.xlu0 %1167  ;;  %v1236_v17 = vpack.c.bf16 %v1218_v16, %v1215_v12  ;;  %v4741_v16 = vld [vmem:[%s6398_s5 + $0x88] sm:$0xff]  }
 0x251   : > { %v1092_v59 = vpop.permute.xlu1 %1091 }
 0x252   : > { %1112 = vst.msk [vmem:[#allocation3 + $0x68] sm:$0x7f] %vm1107_vm15, %v1092_v59  ;;  %v959_v60 = vpop.permute.xlu0 %958 }
 0x253   : > { %1122 = vst.msk [vmem:[#allocation3 + $0x68] sm:$0x1] %vm976_vm12, %v4812_v1 }
 0x254   : > { %973 = vst.msk [vmem:[#allocation3 + $0xa8] sm:$0xff] %vm944_vm7, %v959_v60 }
 0x255   : > { %984 = vst.msk [vmem:[#allocation3 + $0xaf] sm:$0x1] %vm976_vm12, %v4812_v1  ;;  %v1166_v61 = vpop.permute.xlu1 %1165 }
 0x256   : > { %v1164_v62 = vpop.permute.xlu0 %1163 }
 0x259   : > { %v1041_v63 = vpop.permute.xlu1 %1040 }
 0x25a   : > { %1061 = vst.msk [vmem:[#allocation3 + $0x60] sm:$0xfe] %vm1056_vm0, %v1041_v63  ;;  %v955_v0 = vpop.permute.xlu0 %954  ;;  %v4734_v63 = vld [vmem:[%s6398_s5 + $0x70] sm:$0xff]  }
 0x25b   : > { %971 = vst.msk [vmem:[#allocation3 + $0x78] sm:$0xff] %vm944_vm7, %v955_v0  ;;  %v4735_v0 = vld [vmem:[%s6398_s5 + $0x30] sm:$0xff]   ;;  %4473 = vmatprep.subr.bf16.mxu0 %v4734_v63 }
 0x25c   : > { %982 = vst.msk [vmem:[#allocation3 + $0x7f] sm:$0x1] %vm976_vm12, %v4812_v1  ;;  %4474 = vmatpush3.bf16.msra.mxu0 %v4735_v0 }
 0x25d   : > { %v957_v2 = vpop.permute.xlu1 %956 }
 0x25e   : > { %972 = vst.msk [vmem:[#allocation3 + $0x90] sm:$0xff] %vm944_vm7, %v957_v2  ;;  %v1137_v3 = vpop.permute.xlu0 %1136  ;;  %vm1640_vm7 = vcmask 522240  }
 0x25f   : > { %983 = vst.msk [vmem:[#allocation3 + $0x97] sm:$0x1] %vm976_vm12, %v4812_v1 }
 0x261   : > { %v1098_v4 = vpop.permute.xlu1 %1097  ;;  %v1221_v28 = vld [vmem:[#allocation3 + $0x60] sm:$0xff] }
 0x262   : > { %1115 = vst.msk [vmem:[#allocation3 + $0xb0] sm:$0x7f] %vm1107_vm15, %v1098_v4  ;;  %v1096_v5 = vpop.permute.xlu0 %1095  ;;  %v4736_v4 = vld [vmem:[%s6398_s5 + $0x78] sm:$0xff]  }
 0x263   : > { %1117 = vst.msk [vmem:[#allocation3 + $0xb0] sm:$0xff] %vm974_vm11, %v4812_v1  ;;  %4475 = vmatprep.subr.bf16.mxu0 %v4736_v4  ;;  %vm2506_vm11 = vcmask 64512  }
 0x264   : > { %1114 = vst.msk [vmem:[#allocation3 + $0x98] sm:$0x7f] %vm1107_vm15, %v1096_v5  ;;  %v4737_v5 = vld [vmem:[%s6398_s5 + $0x38] sm:$0xff]  }
 0x265   : > { %1125 = vst.msk [vmem:[#allocation3 + $0xb0] sm:$0x1] %vm976_vm12, %v4812_v1  ;;  %1124 = vst.msk [vmem:[#allocation3 + $0x98] sm:$0x1] %vm976_vm12, %v4812_v1  ;;  %v1135_v6 = vpop.permute.xlu1 %1134  ;;  %4476 = vmatpush3.bf16.msra.mxu0 %v4737_v5 }
 0x266   : > { %1156 = vst.msk [vmem:[#allocation3 + $0xb0] sm:$0xff] %vm1155_vm5, %v4812_v1  ;;  %v1133_v7 = vpop.permute.xlu0 %1132 }
 0x267   : > { %1152 = vst.msk [vmem:[#allocation3 + $0x68] sm:$0xfe] %vm1147_vm1, %v1135_v6  ;;  %1151 = vst.msk [vmem:[#allocation3 + $0x50] sm:$0xfe] %vm1147_vm1, %v1133_v7 }
 0x268   : > { %1182 = vst.msk [vmem:[#allocation3 + $0x68] sm:$0xff] %vm1155_vm5, %v1166_v61  ;;  %1181 = vst.msk [vmem:[#allocation3 + $0x50] sm:$0xff] %vm1155_vm5, %v1164_v62 }
 0x269   : > { %v1139_v8 = vpop.permute.xlu1 %1138 }
 0x26a   : > { %1154 = vst.msk [vmem:[#allocation3 + $0x98] sm:$0xfe] %vm1147_vm1, %v1139_v8  ;;  %v1001_v9 = vpop.permute.xlu0 %1000 }
 0x26b   : > { %1018 = vst.msk [vmem:[#allocation3 + $0x78] sm:$0x7f] %vm1013_vm14, %v1001_v9 }
 0x26c   : > { %1027 = vst.msk [vmem:[#allocation3 + $0x78] sm:$0x1] %vm1021_vm13, %v4812_v1 }
 0x26d   : > { %v1005_v10 = vpop.permute.xlu1 %1004  ;;  %v1231_v26 = vld [vmem:[#allocation3 + $0xb0] sm:$0xff] }
 0x26e   : > { %1020 = vst.msk [vmem:[#allocation3 + $0xa8] sm:$0x7f] %vm1013_vm14, %v1005_v10  ;;  %v1094_v11 = vpop.permute.xlu0 %1093 }
 0x26f   : > { %1029 = vst.msk [vmem:[#allocation3 + $0xa8] sm:$0x1] %vm1021_vm13, %v4812_v1  ;;  %v1219_v14 = vld [vmem:[#allocation3 + $0x50] sm:$0xff]  ;;  %v1222_v20 = vld [vmem:[#allocation3 + $0x68] sm:$0xff] }
 0x270   : > { %1113 = vst.msk [vmem:[#allocation3 + $0x80] sm:$0x7f] %vm1107_vm15, %v1094_v11  ;;  %v1237_v15 = vpack.c.bf16 %v1219_v14, %v1216_v13  ;;  %v4738_v13 = vld [vmem:[%s6398_s5 + $0xc0] sm:$0xff]  }
 0x271   : > { %1123 = vst.msk [vmem:[#allocation3 + $0x80] sm:$0x1] %vm976_vm12, %v4812_v1  ;;  %v1045_v24 = vpop.permute.xlu1 %1044  ;;  %v4739_v14 = vld [vmem:[%s6398_s5 + $0x80] sm:$0xff]   ;;  %4501 = vmatprep.subr.bf16.mxu1 %v4738_v13 }
 0x272   : > { %1153 = vst.msk [vmem:[#allocation3 + $0x80] sm:$0xfe] %vm1147_vm1, %v1137_v3  ;;  %v1170_v18 = vpop.permute.xlu0 %1169  ;;  %1448 = vmatprep.mubr.bf16.mxu1 %v1237_v15  ;;  %v4740_v15 = vld [vmem:[%s6398_s5 + $0xc8] sm:$0xff]   ;;  %4502 = vmatpush3.bf16.msra.mxu1 %v4739_v14 }
 0x273   : > { %1183 = vst.msk [vmem:[#allocation3 + $0x80] sm:$0xff] %vm1155_vm5, %v1168_v58  ;;  %1184 = vst.msk [vmem:[#allocation3 + $0x98] sm:$0xff] %vm1155_vm5, %v1170_v18  ;;  %1449 = vmatmul.mubr.bf16.gmra.mrb[4].mxu1 %v1236_v17  ;;  %4503 = vmatprep.subr.bf16.mxu1 %v4740_v15  ;;  %v4742_v17 = vld [vmem:[%s6398_s5 + $0xd0] sm:$0xff]  }
 0x274   : > { %v4743_v18 = vld [vmem:[%s6398_s5 + $0x90] sm:$0xff]  }
 0x276   : > { %v1043_v19 = vpop.permute.xlu0 %1042  ;;  %4504 = vmatpush3.bf16.msra.mxu1 %v4741_v16 }
 0x277   : > { %1062 = vst.msk [vmem:[#allocation3 + $0x78] sm:$0xfe] %vm1056_vm0, %v1043_v19  ;;  %4505 = vmatprep.subr.bf16.mxu1 %v4742_v17  ;;  %v4744_v19 = vld [vmem:[%s6398_s5 + $0xd8] sm:$0xff]  }
 0x27a   : > { %v1225_v21 = vld [vmem:[#allocation3 + $0x80] sm:$0xff]  ;;  %v1003_v23 = vpop.permute.xlu0 %1002  ;;  %v1228_v25 = vld [vmem:[#allocation3 + $0x98] sm:$0xff]  ;;  %4506 = vmatpush3.bf16.msra.mxu1 %v4743_v18 }
 0x27b   : > { %v1240_v22 = vpack.c.bf16 %v1225_v21, %v1222_v20  ;;  %1019 = vst.msk [vmem:[#allocation3 + $0x90] sm:$0x7f] %vm1013_vm14, %v1003_v23  ;;  %v1243_v31 = vpack.c.bf16 %v1231_v26, %v1228_v25  ;;  %v4745_v20 = vld [vmem:[%s6398_s5 + $0x98] sm:$0xff]   ;;  %4507 = vmatprep.subr.bf16.mxu1 %v4744_v19  ;;  %v4746_v21 = vld [vmem:[%s6398_s5 + $0xe0] sm:$0xff]   ;;  %v4748_v23 = vld [vmem:[%s6398_s5 + $0xe8] sm:$0xff]  }
 0x27c   : > { %1028 = vst.msk [vmem:[#allocation3 + $0x90] sm:$0x1] %vm1021_vm13, %v4812_v1  ;;  %v4750_v25 = vld [vmem:[%s6398_s5 + $0xf0] sm:$0xff]  }
 0x27d   : > { %1456 = vmatprep.mubr.bf16.mxu1 %v1240_v22  ;;  %1063 = vst.msk [vmem:[#allocation3 + $0x90] sm:$0xfe] %vm1056_vm0, %v1045_v24  ;;  %v4747_v22 = vld [vmem:[%s6398_s5 + $0xa0] sm:$0xff]   ;;  %v4749_v24 = vld [vmem:[%s6398_s5 + $0xa8] sm:$0xff]   ;;  %v4751_v26 = vld [vmem:[%s6398_s5 + $0xb0] sm:$0xff]  }
 0x27e   : > { %v1047_v27 = vpop.permute.xlu0 %1046  ;;  %v1224_v29 = vld [vmem:[#allocation3 + $0x78] sm:$0xff]  ;;  %4508 = vmatpush3.bf16.msra.mxu1 %v4745_v20 }
 0x27f   : > { %1064 = vst.msk [vmem:[#allocation3 + $0xa8] sm:$0xfe] %vm1056_vm0, %v1047_v27  ;;  %v1239_v30 = vpack.c.bf16 %v1224_v29, %v1221_v28  ;;  %4509 = vmatprep.subr.bf16.mxu1 %v4746_v21  ;;  %v1788_v21 = vld [vmem:[#allocation4] sm:$0xff] }
 0x281   : > { %1457 = vmatmul.mubr.bf16.gmra.mrb[8].mxu1 %v1239_v30 }
 0x282   : > { %1464 = vmatprep.mubr.bf16.mxu1 %v1243_v31  ;;  %4510 = vmatpush3.bf16.msra.mxu1 %v4747_v22  ;;  %v4752_v31 = vld [vmem:[%s6398_s5 + $0xf8] sm:$0xff]  }
 0x283   : > { %4511 = vmatprep.subr.bf16.mxu1 %v4748_v23 }
 0x284   : > { %v1227_v32 = vld [vmem:[#allocation3 + $0x90] sm:$0xff] }
 0x286   : > { %v1230_v33 = vld [vmem:[#allocation3 + $0xa8] sm:$0xff]  ;;  %4512 = vmatpush3.bf16.msra.mxu1 %v4749_v24 }
 0x287   : > { %v1242_v34 = vpack.c.bf16 %v1230_v33, %v1227_v32  ;;  %4513 = vmatprep.subr.bf16.mxu1 %v4750_v25  ;;  %v4753_v33 = vld [vmem:[%s6398_s5 + $0xb8] sm:$0xff]  }
 0x289   : > { %1465 = vmatmul.mubr.bf16.gmra.mrb[12].mxu1 %v1242_v34 }
 0x28a   : > { %4514 = vmatpush3.bf16.msra.mxu1 %v4751_v26 }
 0x28b   : > { %4515 = vmatprep.subr.bf16.mxu1 %v4752_v31 }
 0x28e   : > { %4516 = vmatpush3.bf16.msra.mxu1 %v4753_v33 }
 0x2bc   : > { %v5597_v35 = vpop.f32.mrb[8].mxu0 }
 0x2bd   : > { %v1507_v36 = vpop.f32.mrb[9].mxu0 }
 0x2be   : > { %v5599_v37 = vpop.f32.mrb[10].mxu0 }
 0x2bf   : > { %v1510_v38 = vpop.f32.mrb[11].mxu0 }
 0x2c4   : > { %v5601_v39 = vpop.f32.mrb[12].mxu0 }
 0x2c5   : > { %v5603_v40 = vpop.f32.mrb[13].mxu0 }
 0x2c6   : > { %v5605_v41 = vpop.f32.mrb[14].mxu0 }
 0x2c7   : > { %v5607_v42 = vpop.f32.mrb[15].mxu0 }
 0x311   : > { %v4431_v53 = vpop.f32.mrb[0].mxu1 }
 0x312   : > { %v4432_v56 = vpop.f32.mrb[1].mxu1 }
 0x313   : > { %v4433_v58 = vadd.f32 %v4432_v56, %v4431_v53  ;;  %v4434_v59 = vpop.f32.mrb[2].mxu1 }
 0x314   : > { %v4435_v60 = vpop.f32.mrb[3].mxu1 }
 0x315   : > { %v1443_v61 = vadd.f32 %v4433_v58, %v5651_v55  ;;  %v4436_v62 = vadd.f32 %v4435_v60, %v4434_v59 }
 0x317   : > { %v1508_v2 = vadd.f32 %v1507_v36, %v1443_v61  ;;  %v1446_v3 = vadd.f32 %v4436_v62, %v5651_v55 }
 0x319   : > { %v1538_v6 = vmax.f32 %v1508_v2, 0.0  ;;  %v1511_v7 = vadd.f32 %v1510_v38, %v1446_v3 }
 0x31b   : > { %v1539_v8 = vmax.f32 %v1511_v7, 0.0  ;;  %1589 = vrot.lane.b32.xlu1 %v1538_v6, %s4822_s21  ;;  %v1564_v9 = vrot.slane %v1538_v6, 7  ;;  %v1626_v10 = vrot.slane %v1538_v6, 1  ;;  %1692 = vst.msk [vmem:[#allocation4 + $0x10] sm:$0xff] %vm1546_vm2, %v1538_v6 }
 0x31c   : > { %1700 = vst.msk [vmem:[#allocation4 + $0x17] sm:$0x1] %vm1648_vm6, %v4812_v1 }
 0x31d   : > { %1591 = vrot.lane.b32.xlu0 %v1539_v8, %s4822_s21  ;;  %v1565_v11 = vrot.slane %v1539_v8, 7  ;;  %v1627_v12 = vrot.slane %v1539_v8, 1  ;;  %1641 = vst.msk [vmem:[#allocation4 + $0x30] sm:$0x7f] %vm1640_vm7, %v1626_v10 }
 0x31e   : > { %1580 = vst.msk [vmem:[#allocation4 + $0x28] sm:$0xfe] %vm1579_vm8, %v1564_v9 }
 0x31f   : > { %1693 = vst.msk [vmem:[#allocation4 + $0x38] sm:$0xff] %vm1546_vm2, %v1539_v8  ;;  %1659 = vrot.lane.b32.xlu1 %v1564_v9, %s4822_s21 }
 0x320   : > { %1650 = vst.msk [vmem:[#allocation4 + $0x30] sm:$0x1] %vm1648_vm6, %v4812_v1  ;;  %1701 = vst.msk [vmem:[#allocation4 + $0x3f] sm:$0x1] %vm1648_vm6, %v4812_v1 }
 0x321   : > { %1781 = vst.msk [vmem:[#allocation4 + $0x20] sm:$0x7f] %vm1640_vm7, %v1627_v12  ;;  %1642 = vst.msk [vmem:[#allocation4 + $0x58] sm:$0x7f] %vm1640_vm7, %v1627_v12  ;;  %1661 = vrot.lane.b32.xlu0 %v1565_v11, %s4822_s21 }
 0x322   : > { %1581 = vst.msk [vmem:[#allocation4 + $0x50] sm:$0xfe] %vm1579_vm8, %v1565_v11  ;;  %1753 = vst.msk [vmem:[#allocation4 + $0x18] sm:$0xfe] %vm1579_vm8, %v1565_v11 }
 0x323   : > { %1651 = vst.msk [vmem:[#allocation4 + $0x58] sm:$0x1] %vm1648_vm6, %v4812_v1  ;;  %1711 = vrot.lane.b32.xlu1 %v1627_v12, %s4822_s21 }
 0x325   : > { %1709 = vrot.lane.b32.xlu0 %v1626_v10, %s4822_s21 }
 0x346   : > { %v4437_v27 = vpop.f32.mrb[4].mxu1 }
 0x347   : > { %v4438_v28 = vpop.f32.mrb[5].mxu1 }
 0x348   : > { %v4439_v29 = vadd.f32 %v4438_v28, %v4437_v27  ;;  %v4440_v30 = vpop.f32.mrb[6].mxu1  ;;  %v4755_v27 = vld [vmem:[%s6398_s5 + $0x108] sm:$0xff]   ;;  %v4756_v28 = vld [vmem:[%s6398_s5 + $0x110] sm:$0xff]  }
 0x349   : > { %v4441_v32 = vpop.f32.mrb[7].mxu1 }
 0x34a   : > { %v1451_v34 = vadd.f32 %v4439_v29, %v5651_v55  ;;  %v4442_v36 = vadd.f32 %v4441_v32, %v4440_v30  ;;  %v4757_v29 = vld [vmem:[%s6398_s5 + $0x118] sm:$0xff]  }
 0x34c   : > { %v1516_v38 = vadd.f32 %v5597_v35, %v1451_v34  ;;  %v1454_v43 = vadd.f32 %v4442_v36, %v5651_v55  ;;  %v5753_v35 = vld [vmem:[%s6398_s5 + $0x100] sm:$0xff]  }
 0x34d   : > { %4631 = vmatprep.subr.bf16.mxu0 %v5753_v35 }
 0x34e   : > { %v1540_v44 = vmax.f32 %v1516_v38, 0.0  ;;  %v1519_v45 = vadd.f32 %v5599_v37, %v1454_v43 }
 0x350   : > { %v1541_v46 = vmax.f32 %v1519_v45, 0.0  ;;  %1593 = vrot.lane.b32.xlu1 %v1540_v44, %s4822_s21  ;;  %v1566_v47 = vrot.slane %v1540_v44, 7  ;;  %v5745_v48 = vrot.slane %v1540_v44, 1  ;;  %1694 = vst.msk [vmem:[#allocation4 + $0x60] sm:$0xff] %vm1546_vm2, %v1540_v44 }
 0x351   : > { %1702 = vst.msk [vmem:[#allocation4 + $0x67] sm:$0x1] %vm1648_vm6, %v4812_v1 }
 0x352   : > { %1663 = vrot.lane.b32.xlu0 %v1566_v47, %s4822_s21  ;;  %v1567_v49 = vrot.slane %v1541_v46, 7  ;;  %1782 = vst.msk [vmem:[#allocation4 + $0x48] sm:$0x7f] %vm1640_vm7, %v5745_v48  ;;  %1643 = vst.msk [vmem:[#allocation4 + $0x80] sm:$0x7f] %vm1640_vm7, %v5745_v48  ;;  %v1629_v37 = vrot.slane %v1541_v46, 1 }
 0x353   : > { %1582 = vst.msk [vmem:[#allocation4 + $0x78] sm:$0xfe] %vm1579_vm8, %v1566_v47  ;;  %1754 = vst.msk [vmem:[#allocation4 + $0x40] sm:$0xfe] %vm1579_vm8, %v1566_v47 }
 0x354   : > { %1695 = vst.msk [vmem:[#allocation4 + $0x88] sm:$0xff] %vm1546_vm2, %v1541_v46  ;;  %v4443_v50 = vpop.f32.mrb[8].mxu1  ;;  %1665 = vrot.lane.b32.xlu1 %v1567_v49, %s4822_s21 }
 0x355   : > { %1652 = vst.msk [vmem:[#allocation4 + $0x80] sm:$0x1] %vm1648_vm6, %v4812_v1  ;;  %1703 = vst.msk [vmem:[#allocation4 + $0x8f] sm:$0x1] %vm1648_vm6, %v4812_v1  ;;  %v4444_v51 = vpop.f32.mrb[9].mxu1 }
 0x356   : > { %1783 = vst.msk [vmem:[#allocation4 + $0x70] sm:$0x7f] %vm1640_vm7, %v1629_v37  ;;  %1644 = vst.msk [vmem:[#allocation4 + $0xa8] sm:$0x7f] %vm1640_vm7, %v1629_v37  ;;  %v4445_v52 = vadd.f32 %v4444_v51, %v4443_v50  ;;  %v4446_v53 = vpop.f32.mrb[10].mxu1  ;;  %1595 = vrot.lane.b32.xlu0 %v1541_v46, %s4822_s21 }
 0x357   : > { %1583 = vst.msk [vmem:[#allocation4 + $0xa0] sm:$0xfe] %vm1579_vm8, %v1567_v49  ;;  %1755 = vst.msk [vmem:[#allocation4 + $0x68] sm:$0xfe] %vm1579_vm8, %v1567_v49  ;;  %v4447_v54 = vpop.f32.mrb[11].mxu1 }
 0x358   : > { %1653 = vst.msk [vmem:[#allocation4 + $0xa8] sm:$0x1] %vm1648_vm6, %v4812_v1  ;;  %v1459_v56 = vadd.f32 %v4445_v52, %v5651_v55  ;;  %v4448_v57 = vadd.f32 %v4447_v54, %v4446_v53 }
 0x35a   : > { %v1524_v58 = vadd.f32 %v5603_v40, %v1459_v56  ;;  %v1462_v59 = vadd.f32 %v4448_v57, %v5651_v55 }
 0x35c   : > { %v1542_v60 = vmax.f32 %v1524_v58, 0.0  ;;  %v1527_v61 = vadd.f32 %v5607_v42, %v1462_v59  ;;  %v4449_v62 = vpop.f32.mrb[12].mxu1 }
 0x35d   : > { %v4450_v63 = vpop.f32.mrb[13].mxu1 }
 0x35e   : > { %v1543_v0 = vmax.f32 %v1527_v61, 0.0  ;;  %v4451_v2 = vadd.f32 %v4450_v63, %v4449_v62  ;;  %v4452_v3 = vpop.f32.mrb[14].mxu1  ;;  %1597 = vrot.lane.b32.xlu1 %v1542_v60, %s4822_s21  ;;  %v1568_v4 = vrot.slane %v1542_v60, 7  ;;  %v1630_v5 = vrot.slane %v1542_v60, 1  ;;  %1696 = vst.msk [vmem:[#allocation4 + $0xb0] sm:$0xff] %vm1546_vm2, %v1542_v60 }
 0x35f   : > { %v4453_v6 = vpop.f32.mrb[15].mxu1  ;;  %1704 = vst.msk [vmem:[#allocation4 + $0xb7] sm:$0x1] %vm1648_vm6, %v4812_v1 }
 0x360   : > { %v1467_v40 = vadd.f32 %v4451_v2, %v5651_v55  ;;  %v4454_v7 = vadd.f32 %v4453_v6, %v4452_v3  ;;  %1667 = vrot.lane.b32.xlu0 %v1568_v4, %s4822_s21  ;;  %v1569_v42 = vrot.slane %v1543_v0, 7  ;;  %1784 = vst.msk [vmem:[#allocation4 + $0x98] sm:$0x7f] %vm1640_vm7, %v1630_v5  ;;  %1645 = vst.msk [vmem:[#allocation4 + $0xd0] sm:$0x7f] %vm1640_vm7, %v1630_v5  ;;  %v1631_v8 = vrot.slane %v1543_v0, 1 }
 0x361   : > { %1584 = vst.msk [vmem:[#allocation4 + $0xc8] sm:$0xfe] %vm1579_vm8, %v1568_v4  ;;  %1756 = vst.msk [vmem:[#allocation4 + $0x90] sm:$0xfe] %vm1579_vm8, %v1568_v4 }
 0x362   : > { %1697 = vst.msk [vmem:[#allocation4 + $0xd8] sm:$0xff] %vm1546_vm2, %v1543_v0  ;;  %v1532_v9 = vadd.f32 %v5601_v39, %v1467_v40  ;;  %v1470_v10 = vadd.f32 %v4454_v7, %v5651_v55  ;;  %1669 = vrot.lane.b32.xlu1 %v1569_v42, %s4822_s21 }
 0x363   : > { %1654 = vst.msk [vmem:[#allocation4 + $0xd0] sm:$0x1] %vm1648_vm6, %v4812_v1  ;;  %1705 = vst.msk [vmem:[#allocation4 + $0xdf] sm:$0x1] %vm1648_vm6, %v4812_v1 }
 0x364   : > { %1785 = vst.msk [vmem:[#allocation4 + $0xc0] sm:$0x7f] %vm1640_vm7, %v1631_v8  ;;  %1646 = vst.msk [vmem:[#allocation4 + $0xf8] sm:$0x7f] %vm1640_vm7, %v1631_v8  ;;  %v1544_v11 = vmax.f32 %v1532_v9, 0.0  ;;  %v1535_v12 = vadd.f32 %v5605_v41, %v1470_v10  ;;  %1713 = vrot.lane.b32.xlu0 %v5745_v48, %s4822_s21 }
 0x365   : > { %1585 = vst.msk [vmem:[#allocation4 + $0xf0] sm:$0xfe] %vm1579_vm8, %v1569_v42  ;;  %1757 = vst.msk [vmem:[#allocation4 + $0xb8] sm:$0xfe] %vm1579_vm8, %v1569_v42 }
 0x366   : > { %1655 = vst.msk [vmem:[#allocation4 + $0xf8] sm:$0x1] %vm1648_vm6, %v4812_v1  ;;  %v1545_v39 = vmax.f32 %v1535_v12, 0.0  ;;  %1715 = vrot.lane.b32.xlu1 %v1629_v37, %s4822_s21  ;;  %v1570_v55 = vrot.slane %v1544_v11, 7  ;;  %v1632_v13 = vrot.slane %v1544_v11, 1 }
 0x367   : > { %1698 = vst.msk [vmem:[#allocation4 + $0x100] sm:$0xff] %vm1546_vm2, %v1544_v11 }
 0x368   : > { %1706 = vst.msk [vmem:[#allocation4 + $0x107] sm:$0x1] %vm1648_vm6, %v4812_v1  ;;  %1671 = vrot.lane.b32.xlu0 %v1570_v55, %s4822_s21  ;;  %v1658_v14 = vrot.slane %v1545_v39, 7  ;;  %v1708_v41 = vrot.slane %v1545_v39, 1 }
 0x369   : > { %1786 = vst.msk [vmem:[#allocation4 + $0xe8] sm:$0x7f] %vm1640_vm7, %v1632_v13  ;;  %1647 = vst.msk [vmem:[#allocation4 + $0x120] sm:$0x7f] %vm1640_vm7, %v1632_v13 }
 0x36a   : > { %1586 = vst.msk [vmem:[#allocation4 + $0x118] sm:$0xfe] %vm1579_vm8, %v1570_v55  ;;  %1758 = vst.msk [vmem:[#allocation4 + $0xe0] sm:$0xfe] %vm1579_vm8, %v1570_v55  ;;  %1673 = vrot.lane.b32.xlu1 %v1658_v14, %s4822_s21  ;;  %v1797_v55 = vld [vmem:[#allocation4 + $0x48] sm:$0xff] }
 0x36b   : > { %1699 = vst.msk [vmem:[#allocation4 + $0x128] sm:$0xff] %vm1546_vm2, %v1545_v39 }
 0x36c   : > { %1656 = vst.msk [vmem:[#allocation4 + $0x120] sm:$0x1] %vm1648_vm6, %v4812_v1  ;;  %1707 = vst.msk [vmem:[#allocation4 + $0x12f] sm:$0x1] %vm1648_vm6, %v4812_v1  ;;  %1599 = vrot.lane.b32.xlu0 %v1543_v0, %s4822_s21 }
 0x36d   : > { %1787 = vst.msk [vmem:[#allocation4 + $0x110] sm:$0x7f] %vm1640_vm7, %v1708_v41 }
 0x36e   : > { %1759 = vst.msk [vmem:[#allocation4 + $0x108] sm:$0xfe] %vm1579_vm8, %v1658_v14  ;;  %1601 = vrot.lane.b32.xlu1 %v1544_v11, %s4822_s21 }
 0x370   : > { %1717 = vrot.lane.b32.xlu0 %v1630_v5, %s4822_s21 }
 0x372   : > { %1719 = vrot.lane.b32.xlu1 %v1631_v8, %s4822_s21 }
 0x374   : > { %1761 = vrot.lane.b32.xlu0 %v1545_v39, %s4822_s21 }
 0x376   : > { %1721 = vrot.lane.b32.xlu1 %v1632_v13, %s4822_s21 }
 0x378   : > { %1723 = vrot.lane.b32.xlu0 %v1708_v41, %s4822_s21 }
 0x38d   : > { %v1590_v15 = vpop.permute.xlu1 %1589 }
 0x38e   : > { %1610 = vst.msk [vmem:[#allocation4 + $0x28] sm:$0xff] %vm1587_vm4, %v1590_v15 }
 0x38f   : > { %v1592_v16 = vpop.permute.xlu0 %1591 }
 0x390   : > { %1611 = vst.msk [vmem:[#allocation4 + $0x50] sm:$0xff] %vm1587_vm4, %v1592_v16  ;;  %1764 = vst.msk [vmem:[#allocation4 + $0x18] sm:$0xff] %vm1587_vm4, %v1592_v16 }
 0x391   : > { %v1660_v17 = vpop.permute.xlu1 %1659 }
 0x392   : > { %1684 = vst.msk [vmem:[#allocation4 + $0x8] sm:$0xfe] %vm1683_vm9, %v1660_v17 }
 0x393   : > { %v1662_v18 = vpop.permute.xlu0 %1661 }
 0x394   : > { %1685 = vst.msk [vmem:[#allocation4 + $0x30] sm:$0xfe] %vm1683_vm9, %v1662_v18  ;;  %v1792_v18 = vld [vmem:[#allocation4 + $0x20] sm:$0xff] }
 0x395   : > { %v1712_v19 = vpop.permute.xlu1 %1711  ;;  %v1793_v22 = vld [vmem:[#allocation4 + $0x28] sm:$0xff] }
 0x396   : > { %1735 = vst.msk [vmem:[#allocation4 + $0x38] sm:$0x7f] %vm1733_vm10, %v1712_v19  ;;  %v1828_v26 = vpack.c.bf16 %v1793_v22, %v1788_v21 }
 0x397   : > { %v1710_v20 = vpop.permute.xlu0 %1709  ;;  %v1791_v36 = vld [vmem:[#allocation4 + $0x18] sm:$0xff]  ;;  %v1798_v49 = vld [vmem:[#allocation4 + $0x50] sm:$0xff] }
 0x398   : > { %1734 = vst.msk [vmem:[#allocation4 + $0x10] sm:$0x7f] %vm1733_vm10, %v1710_v20  ;;  %v1832_v20 = vpack.c.bf16 %v1797_v55, %v1792_v18 }
 0x399   : > { %v1789_v23 = vld [vmem:[#allocation4 + $0x8] sm:$0xff] }
 0x39b   : > { %v1794_v24 = vld [vmem:[#allocation4 + $0x30] sm:$0xff] }
 0x39c   : > { %v1829_v25 = vpack.c.bf16 %v1794_v24, %v1789_v23  ;;  %v1826_v23 = vld [vmem:[#allocation4 + $0x130] sm:$0xff] }
 0x39d   : > { %v1795_v44 = vld [vmem:[#allocation4 + $0x38] sm:$0xff] }
 0x39e   : > { %2187 = vmatprep.mubr.bf16.mxu0 %v1829_v25 }
 0x39f   : > { %2188 = vmatmul.mubr.bf16.vlgmr.msra.gmra.mrb[16].mxu0 %v1828_v26  ;;  %v1790_v34 = vld [vmem:[#allocation4 + $0x10] sm:$0xff]  ;;  %v1807_v26 = vld [vmem:[#allocation4 + $0x98] sm:$0xff] }
 0x3a0   : > { %4632 = vmatpush3.bf16.msra.mxu0 %v5753_v35  ;;  %v1830_v45 = vpack.c.bf16 %v1795_v44, %v1790_v34 }
 0x3a1   : > { %4633 = vmatprep.subr.bf16.mxu0 %v4755_v27 }
 0x3a4   : > { %4634 = vmatpush3.bf16.msra.mxu0 %v4755_v27 }
 0x3a5   : > { %4635 = vmatprep.subr.bf16.mxu0 %v4756_v28 }
 0x3a8   : > { %4636 = vmatpush3.bf16.msra.mxu0 %v4756_v28  ;;  %v1817_v28 = vld [vmem:[#allocation4 + $0xe8] sm:$0xff] }
 0x3a9   : > { %4637 = vmatprep.subr.bf16.mxu0 %v4757_v29 }
 0x3ac   : > { %4638 = vmatpush3.bf16.msra.mxu0 %v4757_v29  ;;  %v1802_v29 = vld [vmem:[#allocation4 + $0x70] sm:$0xff] }
 0x3c2   : > { %v1594_v30 = vpop.permute.xlu1 %1593 }
 0x3c3   : > { %1612 = vst.msk [vmem:[#allocation4 + $0x78] sm:$0xff] %vm1587_vm4, %v1594_v30  ;;  %1765 = vst.msk [vmem:[#allocation4 + $0x40] sm:$0xff] %vm1587_vm4, %v1594_v30  ;;  %v1837_v30 = vpack.c.bf16 %v1807_v26, %v1802_v29 }
 0x3c4   : > { %v1664_v31 = vpop.permute.xlu0 %1663 }
 0x3c5   : > { %1686 = vst.msk [vmem:[#allocation4 + $0x58] sm:$0xfe] %vm1683_vm9, %v1664_v31  ;;  %v1812_v31 = vld [vmem:[#allocation4 + $0xc0] sm:$0xff] }
 0x3c6   : > { %v1666_v32 = vpop.permute.xlu1 %1665 }
 0x3c7   : > { %1687 = vst.msk [vmem:[#allocation4 + $0x80] sm:$0xfe] %vm1683_vm9, %v1666_v32  ;;  %v1842_v32 = vpack.c.bf16 %v1817_v28, %v1812_v31 }
 0x3c8   : > { %v1596_v33 = vpop.permute.xlu0 %1595 }
 0x3c9   : > { %1613 = vst.msk [vmem:[#allocation4 + $0xa0] sm:$0xff] %vm1587_vm4, %v1596_v33  ;;  %1766 = vst.msk [vmem:[#allocation4 + $0x68] sm:$0xff] %vm1587_vm4, %v1596_v33 }
 0x3ca   : > { %v1796_v38 = vld [vmem:[#allocation4 + $0x40] sm:$0xff]  ;;  %v1803_v46 = vld [vmem:[#allocation4 + $0x78] sm:$0xff] }
 0x3cb   : > { %v1831_v43 = vpack.c.bf16 %v1796_v38, %v1791_v36  ;;  %v1833_v50 = vpack.c.bf16 %v1803_v46, %v1798_v49  ;;  %v1822_v38 = vld [vmem:[#allocation4 + $0x110] sm:$0xff]  ;;  %v4759_v46 = vld [vmem:[%s6400_s7 + $0x8] sm:$0xff]  }
 0x3cc   : > { %v1799_v47 = vld [vmem:[#allocation4 + $0x58] sm:$0xff]  ;;  %v4763_v49 = vld [vmem:[%s6400_s7 + $0x28] sm:$0xff]  }
 0x3cd   : > { %2252 = vmatprep.mubr.bf16.mxu1 %v1831_v43  ;;  %v1827_v43 = vld [vmem:[#allocation4 + $0x138] sm:$0xff] }
 0x3ce   : > { %2253 = vmatmul.mubr.bf16.vlgmr.msra.gmra.mrb[16].mxu1 %v1830_v45  ;;  %v1804_v48 = vld [vmem:[#allocation4 + $0x80] sm:$0xff]  ;;  %v1847_v44 = vpack.c.bf16 %v1827_v43, %v1822_v38 }
 0x3cf   : > { %v1834_v35 = vpack.c.bf16 %v1804_v48, %v1799_v47  ;;  %v4758_v45 = vld [vmem:[%s6400_s7] sm:$0xff]   ;;  %v4760_v47 = vld [vmem:[%s6400_s7 + $0x10] sm:$0xff]   ;;  %v4761_v48 = vld [vmem:[%s6400_s7 + $0x18] sm:$0xff]  }
 0x3d0   : > { %v1598_v37 = vpop.permute.xlu1 %1597  ;;  %v1801_v56 = vld [vmem:[#allocation4 + $0x68] sm:$0xff]  ;;  %v1808_v2 = vld [vmem:[#allocation4 + $0xa0] sm:$0xff]  ;;  %4647 = vmatprep.subr.bf16.mxu1 %v4758_v45 }
 0x3d1   : > { %1614 = vst.msk [vmem:[#allocation4 + $0xc8] sm:$0xff] %vm1587_vm4, %v1598_v37  ;;  %1767 = vst.msk [vmem:[#allocation4 + $0x90] sm:$0xff] %vm1587_vm4, %v1598_v37  ;;  %2195 = vmatprep.mubr.bf16.mxu0 %v1834_v35  ;;  %4648 = vmatpush3.bf16.msra.mxu1 %v4758_v45  ;;  %v4762_v35 = vld [vmem:[%s6400_s7 + $0x20] sm:$0xff]   ;;  %v4764_v37 = vld [vmem:[%s6400_s7 + $0x30] sm:$0xff]  }
 0x3d2   : > { %v1668_v51 = vpop.permute.xlu0 %1667  ;;  %2196 = vmatmul.mubr.bf16.gmra.mrb[20].mxu0 %v1833_v50  ;;  %4649 = vmatprep.subr.bf16.mxu1 %v4759_v46  ;;  %v4765_v50 = vld [vmem:[%s6400_s7 + $0x38] sm:$0xff]  }
 0x3d3   : > { %1688 = vst.msk [vmem:[#allocation4 + $0xa8] sm:$0xfe] %vm1683_vm9, %v1668_v51 }
 0x3d4   : > { %v1670_v52 = vpop.permute.xlu1 %1669 }
 0x3d5   : > { %1689 = vst.msk [vmem:[#allocation4 + $0xd0] sm:$0xfe] %vm1683_vm9, %v1670_v52  ;;  %4650 = vmatpush3.bf16.msra.mxu1 %v4759_v46 }
 0x3d6   : > { %v1714_v53 = vpop.permute.xlu0 %1713  ;;  %4651 = vmatprep.subr.bf16.mxu1 %v4760_v47 }
 0x3d7   : > { %1736 = vst.msk [vmem:[#allocation4 + $0x60] sm:$0x7f] %vm1733_vm10, %v1714_v53 }
 0x3d8   : > { %v1716_v54 = vpop.permute.xlu1 %1715  ;;  %v1806_v57 = vld [vmem:[#allocation4 + $0x90] sm:$0xff]  ;;  %v1813_v60 = vld [vmem:[#allocation4 + $0xc8] sm:$0xff] }
 0x3d9   : > { %1737 = vst.msk [vmem:[#allocation4 + $0x88] sm:$0x7f] %vm1733_vm10, %v1716_v54  ;;  %v1836_v58 = vpack.c.bf16 %v1806_v57, %v1801_v56  ;;  %v1838_v4 = vpack.c.bf16 %v1813_v60, %v1808_v2  ;;  %4652 = vmatpush3.bf16.msra.mxu1 %v4760_v47 }
 0x3da   : > { %v1672_v59 = vpop.permute.xlu0 %1671  ;;  %v1809_v62 = vld [vmem:[#allocation4 + $0xa8] sm:$0xff]  ;;  %4653 = vmatprep.subr.bf16.mxu1 %v4761_v48 }
 0x3db   : > { %1690 = vst.msk [vmem:[#allocation4 + $0xf8] sm:$0xfe] %vm1683_vm9, %v1672_v59  ;;  %2260 = vmatprep.mubr.bf16.mxu1 %v1836_v58  ;;  %v5902_v58 = vld [vmem:[%s6399_s6] ss:$0 sm:$0xff] }
 0x3dc   : > { %v1674_v61 = vpop.permute.xlu1 %1673  ;;  %v1814_v63 = vld [vmem:[#allocation4 + $0xd0] sm:$0xff] }
 0x3dd   : > { %1691 = vst.msk [vmem:[#allocation4 + $0x120] sm:$0xfe] %vm1683_vm9, %v1674_v61  ;;  %v1839_v0 = vpack.c.bf16 %v1814_v63, %v1809_v62  ;;  %4654 = vmatpush3.bf16.msra.mxu1 %v4761_v48 }
 0x3de   : > { %v1600_v3 = vpop.permute.xlu0 %1599  ;;  %v1800_v6 = vld [vmem:[#allocation4 + $0x60] sm:$0xff]  ;;  %4655 = vmatprep.subr.bf16.mxu1 %v4762_v35 }
 0x3df   : > { %1615 = vst.msk [vmem:[#allocation4 + $0xf0] sm:$0xff] %vm1587_vm4, %v1600_v3  ;;  %1768 = vst.msk [vmem:[#allocation4 + $0xb8] sm:$0xff] %vm1587_vm4, %v1600_v3  ;;  %2203 = vmatprep.mubr.bf16.mxu0 %v1839_v0 }
 0x3e0   : > { %v1602_v5 = vpop.permute.xlu1 %1601  ;;  %2204 = vmatmul.mubr.bf16.gmra.mrb[24].mxu0 %v1838_v4  ;;  %v1805_v40 = vld [vmem:[#allocation4 + $0x88] sm:$0xff] }
 0x3e1   : > { %1616 = vst.msk [vmem:[#allocation4 + $0x118] sm:$0xff] %vm1587_vm4, %v1602_v5  ;;  %1769 = vst.msk [vmem:[#allocation4 + $0xe0] sm:$0xff] %vm1587_vm4, %v1602_v5  ;;  %v1835_v7 = vpack.c.bf16 %v1805_v40, %v1800_v6  ;;  %4656 = vmatpush3.bf16.msra.mxu1 %v4762_v35 }
 0x3e2   : > { %v1718_v42 = vpop.permute.xlu0 %1717  ;;  %v1819_v9 = vld [vmem:[#allocation4 + $0xf8] sm:$0xff]  ;;  %4657 = vmatprep.subr.bf16.mxu1 %v4763_v49 }
 0x3e3   : > { %1738 = vst.msk [vmem:[#allocation4 + $0xb0] sm:$0x7f] %vm1733_vm10, %v1718_v42  ;;  %2261 = vmatmul.mubr.bf16.gmra.mrb[20].mxu1 %v1835_v7 }
 0x3e4   : > { %v1720_v8 = vpop.permute.xlu1 %1719  ;;  %v1824_v10 = vld [vmem:[#allocation4 + $0x120] sm:$0xff] }
 0x3e5   : > { %1739 = vst.msk [vmem:[#allocation4 + $0xd8] sm:$0x7f] %vm1733_vm10, %v1720_v8  ;;  %v1844_v11 = vpack.c.bf16 %v1824_v10, %v1819_v9  ;;  %4658 = vmatpush3.bf16.msra.mxu1 %v4763_v49 }
 0x3e6   : > { %v1762_v12 = vpop.permute.xlu0 %1761  ;;  %v1818_v39 = vld [vmem:[#allocation4 + $0xf0] sm:$0xff]  ;;  %v1811_v41 = vld [vmem:[#allocation4 + $0xb8] sm:$0xff]  ;;  %4659 = vmatprep.subr.bf16.mxu1 %v4764_v37 }
 0x3e7   : > { %1770 = vst.msk [vmem:[#allocation4 + $0x108] sm:$0xff] %vm1587_vm4, %v1762_v12  ;;  %2211 = vmatprep.mubr.bf16.mxu0 %v1844_v11 }
 0x3e8   : > { %v1722_v13 = vpop.permute.xlu1 %1721  ;;  %v1823_v14 = vld [vmem:[#allocation4 + $0x118] sm:$0xff]  ;;  %v1816_v15 = vld [vmem:[#allocation4 + $0xe0] sm:$0xff] }
 0x3e9   : > { %1740 = vst.msk [vmem:[#allocation4 + $0x100] sm:$0x7f] %vm1733_vm10, %v1722_v13  ;;  %v1843_v16 = vpack.c.bf16 %v1823_v14, %v1818_v39  ;;  %v1841_v17 = vpack.c.bf16 %v1816_v15, %v1811_v41  ;;  %4660 = vmatpush3.bf16.msra.mxu1 %v4764_v37 }
 0x3ea   : > { %v1724_v19 = vpop.permute.xlu0 %1723  ;;  %v1810_v21 = vld [vmem:[#allocation4 + $0xb0] sm:$0xff]  ;;  %4661 = vmatprep.subr.bf16.mxu1 %v4765_v50 }
 0x3eb   : > { %1741 = vst.msk [vmem:[#allocation4 + $0x128] sm:$0x7f] %vm1733_vm10, %v1724_v19  ;;  %2212 = vmatmul.mubr.bf16.gmra.mrb[28].mxu0 %v1843_v16  ;;  %2268 = vmatprep.mubr.bf16.mxu1 %v1841_v17 }
 0x3ec   : > { %4639 = vmatprep.mubr.msk.bf16.mxu0 %vm1546_vm2, %v1832_v20  ;;  %v1815_v22 = vld [vmem:[#allocation4 + $0xd8] sm:$0xff] }
 0x3ed   : > { %v1840_v24 = vpack.c.bf16 %v1815_v22, %v1810_v21  ;;  %4662 = vmatpush3.bf16.msra.mxu1 %v4765_v50 }
 0x3ee   : > { %v1821_v25 = vld [vmem:[#allocation4 + $0x108] sm:$0xff] }
 0x3ef   : > { %2269 = vmatmul.mubr.bf16.gmra.mrb[24].mxu1 %v1840_v24  ;;  %v1846_v27 = vpack.c.bf16 %v1826_v23, %v1821_v25 }
 0x3f0   : > { %v1820_v34 = vld [vmem:[#allocation4 + $0x100] sm:$0xff] }
 0x3f1   : > { %2276 = vmatprep.mubr.bf16.mxu1 %v1846_v27 }
 0x3f2   : > { %v1825_v33 = vld [vmem:[#allocation4 + $0x128] sm:$0xff] }
 0x3f3   : > { %4640 = vmatmul.mubr.msk.bf16.vlgmr.msra.gmra.mrb[32].mxu0 %vm1546_vm2, %v1837_v30  ;;  %v1845_v36 = vpack.c.bf16 %v1825_v33, %v1820_v34 }
 0x3f4   : > { %4643 = vmatprep.mubr.msk.bf16.mxu0 %vm1546_vm2, %v1842_v32 }
 0x3f7   : > { %2277 = vmatmul.mubr.bf16.gmra.mrb[28].mxu1 %v1845_v36 }
 0x3fb   : > { %4644 = vmatmul.mubr.msk.bf16.gmra.mrb[36].mxu0 %vm1546_vm2, %v1847_v44 }
 0x472   : > { %v4477_v51 = vpop.f32.mrb[16].mxu0 }
 0x473   : > { %v4478_v52 = vpop.f32.mrb[17].mxu0 }
 0x474   : > { %v4479_v53 = vadd.f32 %v4478_v52, %v4477_v51  ;;  %v4480_v54 = vpop.f32.mrb[18].mxu0 }
 0x475   : > { %v4481_v56 = vpop.f32.mrb[19].mxu0 }
 0x476   : > { %v4482_v57 = vadd.f32 %v4481_v56, %v4480_v54  ;;  %v2190_v61 = vadd.f32 %v4479_v53, %v5902_v58 }
 0x478   : > { %v2193_v2 = vadd.f32 %v4482_v57, %v5902_v58 }
 0x4a1   : > { %v4517_v59 = vpop.f32.mrb[16].mxu1 }
 0x4a2   : > { %v4518_v60 = vpop.f32.mrb[17].mxu1 }
 0x4a3   : > { %v4519_v62 = vadd.f32 %v4518_v60, %v4517_v59  ;;  %v4520_v63 = vpop.f32.mrb[18].mxu1 }
 0x4a4   : > { %v4521_v0 = vpop.f32.mrb[19].mxu1 }
 0x4a5   : > { %v4522_v3 = vadd.f32 %v4521_v0, %v4520_v63  ;;  %v4483_v4 = vpop.f32.mrb[20].mxu0  ;;  %v2255_v5 = vadd.f32 %v4519_v62, %v2190_v61 }
 0x4a6   : > { %v4484_v6 = vpop.f32.mrb[21].mxu0 }
 0x4a7   : > { %v4485_v40 = vadd.f32 %v4484_v6, %v4483_v4  ;;  %v4486_v7 = vpop.f32.mrb[22].mxu0  ;;  %v2258_v42 = vadd.f32 %v4522_v3, %v2193_v2 }
 0x4a8   : > { %v4487_v8 = vpop.f32.mrb[23].mxu0 }
 0x4a9   : > { %v4488_v9 = vadd.f32 %v4487_v8, %v4486_v7  ;;  %v2198_v15 = vadd.f32 %v4485_v40, %v5902_v58 }
 0x4ab   : > { %v2201_v19 = vadd.f32 %v4488_v9, %v5902_v58 }
 0x4b3   : > { %v4489_v10 = vpop.f32.mrb[24].mxu0 }
 0x4b4   : > { %v4490_v11 = vpop.f32.mrb[25].mxu0 }
 0x4b5   : > { %v4491_v12 = vadd.f32 %v4490_v11, %v4489_v10  ;;  %v4492_v39 = vpop.f32.mrb[26].mxu0 }
 0x4b6   : > { %v4493_v55 = vpop.f32.mrb[27].mxu0  ;;  %v4523_v13 = vpop.f32.mrb[20].mxu1 }
 0x4b7   : > { %v4494_v14 = vadd.f32 %v4493_v55, %v4492_v39  ;;  %v4524_v41 = vpop.f32.mrb[21].mxu1  ;;  %v2206_v31 = vadd.f32 %v4491_v12, %v5902_v58 }
 0x4b8   : > { %v4525_v16 = vadd.f32 %v4524_v41, %v4523_v13  ;;  %v4526_v17 = vpop.f32.mrb[22].mxu1  ;;  %v4303_v41 = vld [vmem:[%s6401_s8] ss:$0 sm:$0xff] }
 0x4b9   : > { %v4527_v18 = vpop.f32.mrb[23].mxu1  ;;  %v2209_v36 = vadd.f32 %v4494_v14, %v5902_v58 }
 0x4ba   : > { %v4528_v20 = vadd.f32 %v4527_v18, %v4526_v17  ;;  %v2263_v21 = vadd.f32 %v4525_v16, %v2198_v15  ;;  %v2516_v18 = vlaneseq }
 0x4bc   : > { %v2266_v22 = vadd.f32 %v4528_v20, %v2201_v19  ;;  %v4823_v19 = vmov 1966171168   ;;  %vm5928_vm12 = vcmp.lt.s32.totalorder %v2516_v18, 8  ;;  %vm2540_vm13 = vcmp.ge.s32.totalorder %v2516_v18, 8 }
 0x4bd   : > { %v2531_v20 = vunpack.c.l.s4 %v4823_v19  ;;  %vm2541_vm14 = vcmp.lt.s32.totalorder %v2516_v18, 16  ;;  %vm2563_vm0 = vcmp.ge.s32.totalorder %v2516_v18, 16  ;;  %vm2564_vm1 = vcmp.lt.s32.totalorder %v2516_v18, 24 }
 0x4be   : > { %v4495_v23 = vpop.f32.mrb[28].mxu0  ;;  %vm6155_vm15 = vmand %vm2540_vm13, %vm2541_vm14  ;;  %vm2586_vm2 = vcmp.ge.s32.totalorder %v2516_v18, 24  ;;  %vm2587_vm4 = vcmp.lt.s32.totalorder %v2516_v18, 32  ;;  %vm2609_vm7 = vcmp.ge.s32.totalorder %v2516_v18, 32  ;;  %vm2610_vm8 = vcmp.lt.s32.totalorder %v2516_v18, 40 }
 0x4bf   : > { %v4496_v24 = vpop.f32.mrb[29].mxu0  ;;  %vm6169_vm5 = vmand %vm2563_vm0, %vm2564_vm1  ;;  %vm2632_vm10 = vcmp.ge.s32.totalorder %v2516_v18, 40  ;;  %vm2655_vm13 = vcmp.ge.s32.totalorder %v2516_v18, 48  ;;  %vm2656_vm14 = vcmp.lt.s32.totalorder %v2516_v18, 56  ;;  %vm2678_vm1 = vcmp.ge.s32.totalorder %v2516_v18, 56 }
 0x4c0   : > { %v4497_v25 = vadd.f32 %v4496_v24, %v4495_v23  ;;  %v4498_v26 = vpop.f32.mrb[30].mxu0  ;;  %vm6183_vm6 = vmand %vm2586_vm2, %vm2587_vm4  ;;  %vm2679_vm2 = vcmp.lt.s32.totalorder %v2516_v18, 64 }
 0x4c1   : > { %v4499_v27 = vpop.f32.mrb[31].mxu0  ;;  %vm6194_vm9 = vmand %vm2609_vm7, %vm2610_vm8  ;;  %vm2701_vm7 = vcmp.ge.s32.totalorder %v2516_v18, 64  ;;  %vm2702_vm8 = vcmp.lt.s32.totalorder %v2516_v18, 72 }
 0x4c2   : > { %v4500_v28 = vadd.f32 %v4499_v27, %v4498_v26  ;;  %v4529_v29 = vpop.f32.mrb[24].mxu1  ;;  %v2214_v56 = vadd.f32 %v4497_v25, %v5902_v58  ;;  %vm6214_vm0 = vmand %vm2655_vm13, %vm2656_vm14  ;;  %vm2725_vm13 = vcmp.lt.s32.totalorder %v2516_v18, 80 }
 0x4c3   : > { %v4530_v30 = vpop.f32.mrb[25].mxu1  ;;  %vm6224_vm4 = vmand %vm2678_vm1, %vm2679_vm2  ;;  %vm2747_vm1 = vcmp.ge.s32.totalorder %v2516_v18, 80  ;;  %vm2748_vm2 = vcmp.lt.s32.totalorder %v2516_v18, 88 }
 0x4c4   : > { %v4531_v32 = vadd.f32 %v4530_v30, %v4529_v29  ;;  %v4532_v33 = vpop.f32.mrb[26].mxu1  ;;  %v2217_v0 = vadd.f32 %v4500_v28, %v5902_v58  ;;  %v2532_v29 = vunpack.c.0.s8 %v2531_v20  ;;  %v5917_v30 = vshrl.u32 %v2516_v18, 7 }
 0x4c5   : > { %v4533_v34 = vpop.f32.mrb[27].mxu1 }
 0x4c6   : > { %v4534_v38 = vadd.f32 %v4533_v34, %v4532_v33  ;;  %v4641_v43 = vpop.f32.mrb[32].mxu0  ;;  %v2271_v44 = vadd.f32 %v4531_v32, %v2206_v31 }
 0x4c7   : > { %v2328_v45 = vadd.f32 %v4641_v43, %v2263_v21  ;;  %v2319_v46 = vpop.f32.mrb[33].mxu0 }
 0x4c8   : > { %v2320_v47 = vadd.f32 %v2319_v46, %v2255_v5  ;;  %v4642_v48 = vpop.f32.mrb[34].mxu0  ;;  %v2274_v35 = vadd.f32 %v4534_v38, %v2209_v36  ;;  %v5923_v36 = vsub.s32 %v2532_v29, %v5917_v30 }
 0x4c9   : > { %v2331_v49 = vadd.f32 %v4642_v48, %v2266_v22  ;;  %v2322_v37 = vpop.f32.mrb[35].mxu0  ;;  %v2352_v52 = vmax.f32 %v2328_v45, 0.0 }
 0x4ca   : > { %v2323_v50 = vadd.f32 %v2322_v37, %v2258_v42  ;;  %v4535_v51 = vpop.f32.mrb[28].mxu1  ;;  %v2350_v57 = vmax.f32 %v2320_v47, 0.0 }
 0x4cb   : > { %v2353_v53 = vmax.f32 %v2331_v49, 0.0  ;;  %v4536_v54 = vpop.f32.mrb[29].mxu1 }
 0x4cc   : > { %v2351_v59 = vmax.f32 %v2323_v50, 0.0  ;;  %v4537_v60 = vadd.f32 %v4536_v54, %v4535_v51  ;;  %v4538_v61 = vpop.f32.mrb[30].mxu1 }
 0x4cd   : > { %v2359_v62 = vpack.c.bf16 %v2353_v53, %v2352_v52  ;;  %v4539_v63 = vpop.f32.mrb[31].mxu1 }
 0x4ce   : > { %v2358_v2 = vpack.c.bf16 %v2351_v59, %v2350_v57  ;;  %v4540_v3 = vadd.f32 %v4539_v63, %v4538_v61  ;;  %v2279_v4 = vadd.f32 %v4537_v60, %v2214_v56  ;;  %v4645_v5 = vpop.f32.mrb[36].mxu0 }
 0x4cf   : > { %v2335_v6 = vpop.f32.mrb[37].mxu0 }
 0x4d0   : > { %v2344_v40 = vadd.f32 %v4645_v5, %v2279_v4  ;;  %v2336_v7 = vadd.f32 %v2335_v6, %v2271_v44  ;;  %v2282_v42 = vadd.f32 %v4540_v3, %v2217_v0  ;;  %v4646_v8 = vpop.f32.mrb[38].mxu0  ;;  %4663 = vmatprep.mubr.bf16.mxu1 %v2358_v2 }
 0x4d1   : > { %v2338_v9 = vpop.f32.mrb[39].mxu0  ;;  %4664 = vmatmul.mubr.bf16.vlgmr.msra.gmra.mrb[32].mxu1 %v2359_v62 }
 0x4d2   : > { %v2347_v10 = vadd.f32 %v4646_v8, %v2282_v42  ;;  %v2339_v11 = vadd.f32 %v2338_v9, %v2274_v35  ;;  %v2356_v12 = vmax.f32 %v2344_v40, 0.0  ;;  %v2354_v39 = vmax.f32 %v2336_v7, 0.0 }
 0x4d4   : > { %v2357_v55 = vmax.f32 %v2347_v10, 0.0  ;;  %v2355_v13 = vmax.f32 %v2339_v11, 0.0 }
 0x4d6   : > { %v2361_v14 = vpack.c.bf16 %v2357_v55, %v2356_v12  ;;  %v2360_v58 = vpack.c.bf16 %v2355_v13, %v2354_v39 }
 0x4d8   : > { %4667 = vmatprep.mubr.bf16.mxu1 %v2360_v58 }
 0x4d9   : > { %4668 = vmatmul.mubr.bf16.gmra.mrb[36].mxu1 %v2361_v14 }
 0x5a4   : > { %v4665_v15 = vpop.f32.mrb[32].mxu1 }
 0x5a5   : > { %v2476_v16 = vadd.f32 %v4665_v15, %v4303_v41  ;;  %v2467_v17 = vpop.f32.mrb[33].mxu1 }
 0x5a6   : > { %v2468_v21 = vadd.f32 %v4303_v41, %v2467_v17  ;;  %v4666_v22 = vpop.f32.mrb[34].mxu1 }
 0x5a7   : > { %v2500_v23 = vmax.f32 %v2476_v16, 0.0  ;;  %v2479_v24 = vadd.f32 %v4666_v22, %v4303_v41  ;;  %v2470_v25 = vpop.f32.mrb[35].mxu1 }
 0x5a8   : > { %v2498_v26 = vmax.f32 %v2468_v21, 0.0  ;;  %v2471_v27 = vadd.f32 %v4303_v41, %v2470_v25 }
 0x5a9   : > { %2509 = vst.msk [vmem:[#allocation5 + $0x10] sm:$0xff] %vm2506_vm11, %v2500_v23  ;;  %v2501_v28 = vmax.f32 %v2479_v24, 0.0 }
 0x5aa   : > { %2507 = vst.msk [vmem:[#allocation5] sm:$0xff] %vm2506_vm11, %v2498_v26  ;;  %v2499_v31 = vmax.f32 %v2471_v27, 0.0 }
 0x5ab   : > { %2510 = vst.msk [vmem:[#allocation5 + $0x18] sm:$0xff] %vm2506_vm11, %v2501_v28 }
 0x5ac   : > { %2508 = vst.msk [vmem:[#allocation5 + $0x8] sm:$0xff] %vm2506_vm11, %v2499_v31  ;;  %v4669_v32 = vpop.f32.mrb[36].mxu1 }
 0x5ad   : > { %v2492_v33 = vadd.f32 %v4669_v32, %v4303_v41  ;;  %v2483_v34 = vpop.f32.mrb[37].mxu1 }
 0x5ae   : > { %v2484_v38 = vadd.f32 %v4303_v41, %v2483_v34  ;;  %v4670_v43 = vpop.f32.mrb[38].mxu1 }
 0x5af   : > { %v2504_v44 = vmax.f32 %v2492_v33, 0.0  ;;  %v2495_v45 = vadd.f32 %v4670_v43, %v4303_v41  ;;  %v2486_v46 = vpop.f32.mrb[39].mxu1 }
 0x5b0   : > { %v2502_v47 = vmax.f32 %v2484_v38, 0.0  ;;  %v2487_v48 = vadd.f32 %v4303_v41, %v2486_v46  ;;  %v4327_v35 = vld.sshfl [vmem:[#allocation5 + $0x11] sm:$0x1 pattern:$0x75316420] }
 0x5b1   : > { %2513 = vst.msk [vmem:[#allocation5 + $0x30] sm:$0xff] %vm2506_vm11, %v2504_v44  ;;  %v2505_v49 = vmax.f32 %v2495_v45, 0.0  ;;  %v2883_v37 = vrot.slane %v4327_v35, %v5923_v36  ;;  %v4312_v50 = vld.sshfl [vmem:[#allocation5 + $0x1] sm:$0x1 pattern:$0x75316420] }
 0x5b2   : > { %2511 = vst.msk [vmem:[#allocation5 + $0x20] sm:$0xff] %vm2506_vm11, %v2502_v47  ;;  %v2503_v52 = vmax.f32 %v2487_v48, 0.0  ;;  %v2536_v53 = vrot.slane %v4312_v50, %v5923_v36  ;;  %v4328_v54 = vld.sshfl [vmem:[#allocation5 + $0x12] sm:$0x1 pattern:$0x75316420] }
 0x5b3   : > { %2514 = vst.msk [vmem:[#allocation5 + $0x38] sm:$0xff] %vm2506_vm11, %v2505_v49  ;;  %2884 = vrot.lane.b32.xlu0 %v2883_v37, %s4814_s16  ;;  %v4313_v56 = vld.sshfl [vmem:[#allocation5 + $0x2] sm:$0x1 pattern:$0x75316420]  ;;  %v2903_v60 = vrot.slane %v4328_v54, %v5923_v36 }
 0x5b4   : > { %v2866_v57 = vld [vmem:[#allocation5 + $0x10] sm:$0x1]  ;;  %2512 = vst.msk [vmem:[#allocation5 + $0x28] sm:$0xff] %vm2506_vm11, %v2503_v52  ;;  %2537 = vrot.lane.b32.xlu1 %v2536_v53, %s4814_s16  ;;  %v2515_v59 = vld [vmem:[#allocation5] sm:$0x1]  ;;  %v2559_v61 = vrot.slane %v4313_v56, %v5923_v36  ;;  %vm2633_vm11 = vcmp.lt.s32.totalorder %v2516_v18, 48 }
 0x5b5   : > { %2867 = vst.msk [vmem:[#allocation6 + $0x1] sm:$0x1] %vm5928_vm12, %v2866_v57  ;;  %2520 = vst.msk [vmem:[#allocation6] sm:$0x1] %vm5928_vm12, %v2515_v59 }
 0x5b6   : > { %v4329_v62 = vld.sshfl [vmem:[#allocation5 + $0x13] sm:$0x1 pattern:$0x75316420] }
 0x5b7   : > { %2904 = vrot.lane.b32.xlu0 %v2903_v60, %s4816_s18  ;;  %v4314_v63 = vld.sshfl [vmem:[#allocation5 + $0x3] sm:$0x1 pattern:$0x75316420]  ;;  %v2923_v2 = vrot.slane %v4329_v62, %v5923_v36 }
 0x5b8   : > { %2560 = vrot.lane.b32.xlu1 %v2559_v61, %s4816_s18  ;;  %v3470_v0 = vld [vmem:[#allocation5 + $0x30] sm:$0x1]  ;;  %v2582_v4 = vrot.slane %v4314_v63, %v5923_v36  ;;  %v4330_v5 = vld.sshfl [vmem:[#allocation5 + $0x14] sm:$0x1 pattern:$0x75316420] }
 0x5b9   : > { %3471 = vst.msk [vmem:[#allocation6 + $0x3] sm:$0x1] %vm5928_vm12, %v3470_v0  ;;  %v3168_v3 = vld [vmem:[#allocation5 + $0x20] sm:$0x1]  ;;  %v2943_v40 = vrot.slane %v4330_v5, %v5923_v36 }
 0x5ba   : > { %3169 = vst.msk [vmem:[#allocation6 + $0x2] sm:$0x1] %vm5928_vm12, %v3168_v3  ;;  %v4315_v6 = vld.sshfl [vmem:[#allocation5 + $0x4] sm:$0x1 pattern:$0x75316420]  ;;  %vm6204_vm12 = vmand %vm2632_vm10, %vm2633_vm11 }
 0x5bb   : > { %2924 = vrot.lane.b32.xlu0 %v2923_v2, %s4818_s20  ;;  %v2605_v7 = vrot.slane %v4315_v6, %v5923_v36  ;;  %v4331_v42 = vld.sshfl [vmem:[#allocation5 + $0x15] sm:$0x1 pattern:$0x75316420]  ;;  %vm6234_vm10 = vmand %vm2701_vm7, %vm2702_vm8  ;;  %vm2724_vm11 = vcmp.ge.s32.totalorder %v2516_v18, 72  ;;  %vm2770_vm8 = vcmp.ge.s32.totalorder %v2516_v18, 88 }
 0x5bc   : > { %2583 = vrot.lane.b32.xlu1 %v2582_v4, %s4818_s20  ;;  %v4316_v8 = vld.sshfl [vmem:[#allocation5 + $0x5] sm:$0x1 pattern:$0x75316420]  ;;  %v2963_v9 = vrot.slane %v4331_v42, %v5923_v36  ;;  %vm6244_vm14 = vmand %vm2724_vm11, %vm2725_vm13  ;;  %vm2771_vm11 = vcmp.lt.s32.totalorder %v2516_v18, 96 }
 0x5bd   : > { %v2628_v10 = vrot.slane %v4316_v8, %v5923_v36  ;;  %v4332_v11 = vld.sshfl [vmem:[#allocation5 + $0x16] sm:$0x1 pattern:$0x75316420]  ;;  %vm6254_vm7 = vmand %vm2747_vm1, %vm2748_vm2  ;;  %vm2793_vm1 = vcmp.ge.s32.totalorder %v2516_v18, 96  ;;  %vm2794_vm2 = vcmp.lt.s32.totalorder %v2516_v18, 104 }
 0x5be   : > { %v4317_v12 = vld.sshfl [vmem:[#allocation5 + $0x6] sm:$0x1 pattern:$0x75316420]  ;;  %v2983_v39 = vrot.slane %v4332_v11, %v5923_v36  ;;  %vm6264_vm13 = vmand %vm2770_vm8, %vm2771_vm11  ;;  %vm2816_vm8 = vcmp.ge.s32.totalorder %v2516_v18, 104  ;;  %vm2817_vm11 = vcmp.lt.s32.totalorder %v2516_v18, 112 }
 0x5bf   : > { %2944 = vrot.lane.b32.xlu0 %v2943_v40, %s4820_s29  ;;  %v2651_v55 = vrot.slane %v4317_v12, %v5923_v36  ;;  %v4333_v13 = vld.sshfl [vmem:[#allocation5 + $0x17] sm:$0x1 pattern:$0x75316420]  ;;  %vm6274_vm3 = vmand %vm2793_vm1, %vm2794_vm2  ;;  %vm2839_vm1 = vcmp.ge.s32.totalorder %v2516_v18, 112  ;;  %vm2840_vm2 = vcmp.lt.s32.totalorder %v2516_v18, 120 }
 0x5c0   : > { %2606 = vrot.lane.b32.xlu1 %v2605_v7, %s4820_s29  ;;  %v4318_v14 = vld.sshfl [vmem:[#allocation5 + $0x7] sm:$0x1 pattern:$0x75316420]  ;;  %v3003_v58 = vrot.slane %v4333_v13, %v5923_v36 }
 0x5c1   : > { %v2674_v41 = vrot.slane %v4318_v14, %v5923_v36  ;;  %v4334_v15 = vld.sshfl [vmem:[#allocation5 + $0x18] sm:$0x1 pattern:$0x75316420] }
 0x5c2   : > { %v4319_v16 = vld.sshfl [vmem:[#allocation5 + $0x8] sm:$0x1 pattern:$0x75316420]  ;;  %v3023_v17 = vrot.slane %v4334_v15, %v5923_v36 }
 0x5c3   : > { %2964 = vrot.lane.b32.xlu0 %v2963_v9, %s4824_s14  ;;  %v2697_v19 = vrot.slane %v4319_v16, %v5923_v36  ;;  %v4335_v20 = vld.sshfl [vmem:[#allocation5 + $0x19] sm:$0x1 pattern:$0x75316420] }
 0x5c4   : > { %2629 = vrot.lane.b32.xlu1 %v2628_v10, %s4824_s14  ;;  %v4320_v21 = vld.sshfl [vmem:[#allocation5 + $0x9] sm:$0x1 pattern:$0x75316420]  ;;  %v3043_v22 = vrot.slane %v4335_v20, %v5923_v36  ;;  %v4768_v20 = vld [vmem:[%s6402_s9] sm:$0xff]  }
 0x5c5   : > { %v2720_v23 = vrot.slane %v4320_v21, %v5923_v36  ;;  %v4336_v24 = vld.sshfl [vmem:[#allocation5 + $0x1a] sm:$0x1 pattern:$0x75316420]  ;;  %v4769_v21 = vld [vmem:[%s6402_s9 + $0x80] sm:$0xff]  }
 0x5c6   : > { %v4321_v25 = vld.sshfl [vmem:[#allocation5 + $0xa] sm:$0x1 pattern:$0x75316420]  ;;  %v3063_v26 = vrot.slane %v4336_v24, %v5923_v36 }
 0x5c7   : > { %2984 = vrot.lane.b32.xlu0 %v2983_v39, %s4825_s15  ;;  %v2743_v27 = vrot.slane %v4321_v25, %v5923_v36  ;;  %v4337_v28 = vld.sshfl [vmem:[#allocation5 + $0x1b] sm:$0x1 pattern:$0x75316420] }
 0x5c8   : > { %2652 = vrot.lane.b32.xlu1 %v2651_v55, %s4825_s15  ;;  %v4322_v29 = vld.sshfl [vmem:[#allocation5 + $0xb] sm:$0x1 pattern:$0x75316420]  ;;  %v3083_v31 = vrot.slane %v4337_v28, %v5923_v36 }
 0x5c9   : > { %v2766_v32 = vrot.slane %v4322_v29, %v5923_v36  ;;  %v4338_v33 = vld.sshfl [vmem:[#allocation5 + $0x1c] sm:$0x1 pattern:$0x75316420]  ;;  %v4772_v28 = vld [vmem:[%s6402_s9 + $0x8] sm:$0xff]  }
 0x5ca   : > { %v4323_v34 = vld.sshfl [vmem:[#allocation5 + $0xc] sm:$0x1 pattern:$0x75316420]  ;;  %v3103_v38 = vrot.slane %v4338_v33, %v5923_v36 }
 0x5cb   : > { %3004 = vrot.lane.b32.xlu0 %v3003_v58, %s4826_s17  ;;  %v2789_v43 = vrot.slane %v4323_v34, %v5923_v36  ;;  %v4339_v44 = vld.sshfl [vmem:[#allocation5 + $0x1d] sm:$0x1 pattern:$0x75316420]  ;;  %v4773_v29 = vld [vmem:[%s6402_s9 + $0x88] sm:$0xff]  }
 0x5cc   : > { %2675 = vrot.lane.b32.xlu1 %v2674_v41, %s4826_s17  ;;  %v4324_v45 = vld.sshfl [vmem:[#allocation5 + $0xd] sm:$0x1 pattern:$0x75316420]  ;;  %v3123_v46 = vrot.slane %v4339_v44, %v5923_v36  ;;  %v4776_v44 = vld [vmem:[%s6402_s9 + $0x10] sm:$0xff]  }
 0x5cd   : > { %v2812_v47 = vrot.slane %v4324_v45, %v5923_v36  ;;  %v4340_v48 = vld.sshfl [vmem:[#allocation5 + $0x1e] sm:$0x1 pattern:$0x75316420]  ;;  %v4777_v45 = vld [vmem:[%s6402_s9 + $0x90] sm:$0xff]  }
 0x5ce   : > { %v4325_v35 = vld.sshfl [vmem:[#allocation5 + $0xe] sm:$0x1 pattern:$0x75316420]  ;;  %v3143_v49 = vrot.slane %v4340_v48, %v5923_v36 }
 0x5cf   : > { %3024 = vrot.lane.b32.xlu0 %v3023_v17, %s4822_s21  ;;  %v2835_v37 = vrot.slane %v4325_v35, %v5923_v36  ;;  %v4341_v50 = vld.sshfl [vmem:[#allocation5 + $0x1f] sm:$0x1 pattern:$0x75316420]  ;;  %v4766_v17 = vld [vmem:[%s6402_s9 + $0x40] sm:$0xff]  }
 0x5d0   : > { %2698 = vrot.lane.b32.xlu1 %v2697_v19, %s4822_s21  ;;  %v4326_v51 = vld.sshfl [vmem:[#allocation5 + $0xf] sm:$0x1 pattern:$0x75316420]  ;;  %v3163_v52 = vrot.slane %v4341_v50, %v5923_v36  ;;  %v4767_v19 = vld [vmem:[%s6402_s9 + $0xc0] sm:$0xff]   ;;  %4561 = vmatprep.subr.bf16.mxu0 %v4766_v17  ;;  %v4780_v50 = vld [vmem:[%s6402_s9 + $0x18] sm:$0xff]  }
 0x5d1   : > { %v2858_v53 = vrot.slane %v4326_v51, %v5923_v36  ;;  %v4357_v54 = vld.sshfl [vmem:[#allocation5 + $0x31] sm:$0x1 pattern:$0x75316420]  ;;  %4583 = vmatprep.subr.bf16.mxu1 %v4767_v19  ;;  %4562 = vmatpush3.bf16.msra.mxu0 %v4768_v20  ;;  %v4781_v51 = vld [vmem:[%s6402_s9 + $0x98] sm:$0xff]  }
 0x5d2   : > { %v4342_v56 = vld.sshfl [vmem:[#allocation5 + $0x21] sm:$0x1 pattern:$0x75316420]  ;;  %v3487_v57 = vrot.slane %v4357_v54, %v5923_v36  ;;  %4584 = vmatpush3.bf16.msra.mxu1 %v4769_v21 }
 0x5d3   : > { %3044 = vrot.lane.b32.xlu0 %v3043_v22, %s4827_s19  ;;  %v3185_v59 = vrot.slane %v4342_v56, %v5923_v36  ;;  %v4358_v60 = vld.sshfl [vmem:[#allocation5 + $0x32] sm:$0x1 pattern:$0x75316420] }
 0x5d4   : > { %2721 = vrot.lane.b32.xlu1 %v2720_v23, %s4827_s19  ;;  %v4343_v61 = vld.sshfl [vmem:[#allocation5 + $0x22] sm:$0x1 pattern:$0x75316420]  ;;  %v3507_v62 = vrot.slane %v4358_v60, %v5923_v36 }
 0x5d5   : > { %v3205_v63 = vrot.slane %v4343_v61, %v5923_v36  ;;  %v4359_v0 = vld.sshfl [vmem:[#allocation5 + $0x33] sm:$0x1 pattern:$0x75316420]  ;;  %v4784_v60 = vld [vmem:[%s6402_s9 + $0x20] sm:$0xff]  }
 0x5d6   : > { %v4344_v2 = vld.sshfl [vmem:[#allocation5 + $0x23] sm:$0x1 pattern:$0x75316420]  ;;  %v3527_v3 = vrot.slane %v4359_v0, %v5923_v36 }
 0x5d7   : > { %3064 = vrot.lane.b32.xlu0 %v3063_v26, %s4828_s22  ;;  %v3225_v4 = vrot.slane %v4344_v2, %v5923_v36  ;;  %v4360_v5 = vld.sshfl [vmem:[#allocation5 + $0x34] sm:$0x1 pattern:$0x75316420]  ;;  %v4770_v26 = vld [vmem:[%s6402_s9 + $0x48] sm:$0xff]   ;;  %v4785_v61 = vld [vmem:[%s6402_s9 + $0xa0] sm:$0xff]  }
 0x5d8   : > { %2744 = vrot.lane.b32.xlu1 %v2743_v27, %s4828_s22  ;;  %v4345_v6 = vld.sshfl [vmem:[#allocation5 + $0x24] sm:$0x1 pattern:$0x75316420]  ;;  %v3547_v40 = vrot.slane %v4360_v5, %v5923_v36  ;;  %v4771_v27 = vld [vmem:[%s6402_s9 + $0xc8] sm:$0xff]   ;;  %4563 = vmatprep.subr.bf16.mxu0 %v4770_v26 }
 0x5d9   : > { %v3245_v7 = vrot.slane %v4345_v6, %v5923_v36  ;;  %v4361_v42 = vld.sshfl [vmem:[#allocation5 + $0x35] sm:$0x1 pattern:$0x75316420]  ;;  %4585 = vmatprep.subr.bf16.mxu1 %v4771_v27  ;;  %4564 = vmatpush3.bf16.msra.mxu0 %v4772_v28  ;;  %v4788_v5 = vld [vmem:[%s6402_s9 + $0x28] sm:$0xff]  }
 0x5da   : > { %v4346_v8 = vld.sshfl [vmem:[#allocation5 + $0x25] sm:$0x1 pattern:$0x75316420]  ;;  %v3567_v9 = vrot.slane %v4361_v42, %v5923_v36  ;;  %4586 = vmatpush3.bf16.msra.mxu1 %v4773_v29  ;;  %v4789_v6 = vld [vmem:[%s6402_s9 + $0xa8] sm:$0xff]  }
 0x5db   : > { %3084 = vrot.lane.b32.xlu0 %v3083_v31, %s4829_s23  ;;  %v3265_v10 = vrot.slane %v4346_v8, %v5923_v36  ;;  %v4362_v11 = vld.sshfl [vmem:[#allocation5 + $0x36] sm:$0x1 pattern:$0x75316420] }
 0x5dc   : > { %2767 = vrot.lane.b32.xlu1 %v2766_v32, %s4829_s23  ;;  %v4347_v12 = vld.sshfl [vmem:[#allocation5 + $0x26] sm:$0x1 pattern:$0x75316420]  ;;  %v3587_v39 = vrot.slane %v4362_v11, %v5923_v36  ;;  %v4793_v11 = vld [vmem:[%s6402_s9 + $0xb0] sm:$0xff]  }
 0x5dd   : > { %v3285_v55 = vrot.slane %v4347_v12, %v5923_v36  ;;  %v4363_v13 = vld.sshfl [vmem:[#allocation5 + $0x37] sm:$0x1 pattern:$0x75316420] }
 0x5de   : > { %v4348_v14 = vld.sshfl [vmem:[#allocation5 + $0x27] sm:$0x1 pattern:$0x75316420]  ;;  %v3607_v58 = vrot.slane %v4363_v13, %v5923_v36 }
 0x5df   : > { %3104 = vrot.lane.b32.xlu0 %v3103_v38, %s4821_s26  ;;  %v4364_v41 = vld.sshfl [vmem:[#allocation5 + $0x38] sm:$0x1 pattern:$0x75316420]  ;;  %v3305_v15 = vrot.slane %v4348_v14, %v5923_v36  ;;  %v4774_v38 = vld [vmem:[%s6402_s9 + $0x50] sm:$0xff]  }
 0x5e0   : > { %2790 = vrot.lane.b32.xlu1 %v2789_v43, %s4821_s26  ;;  %v4349_v16 = vld.sshfl [vmem:[#allocation5 + $0x28] sm:$0x1 pattern:$0x75316420]  ;;  %v3627_v22 = vrot.slane %v4364_v41, %v5923_v36  ;;  %v4775_v43 = vld [vmem:[%s6402_s9 + $0xd0] sm:$0xff]   ;;  %4565 = vmatprep.subr.bf16.mxu0 %v4774_v38  ;;  %v4796_v41 = vld [vmem:[%s6402_s9 + $0x38] sm:$0xff]  }
 0x5e1   : > { %v4365_v23 = vld.sshfl [vmem:[#allocation5 + $0x39] sm:$0x1 pattern:$0x75316420]  ;;  %v3325_v24 = vrot.slane %v4349_v16, %v5923_v36  ;;  %4587 = vmatprep.subr.bf16.mxu1 %v4775_v43  ;;  %4566 = vmatpush3.bf16.msra.mxu0 %v4776_v44  ;;  %v3776_v43 = vsub.s32 0, %v5917_v30 }
 0x5e2   : > { %v4350_v25 = vld.sshfl [vmem:[#allocation5 + $0x29] sm:$0x1 pattern:$0x75316420]  ;;  %v3647_v31 = vrot.slane %v4365_v23, %v5923_v36  ;;  %4588 = vmatpush3.bf16.msra.mxu1 %v4777_v45 }
 0x5e3   : > { %3124 = vrot.lane.b32.xlu0 %v3123_v46, %s4830_s24  ;;  %v4366_v32 = vld.sshfl [vmem:[#allocation5 + $0x3a] sm:$0x1 pattern:$0x75316420]  ;;  %v3345_v33 = vrot.slane %v4350_v25, %v5923_v36 }
 0x5e4   : > { %2813 = vrot.lane.b32.xlu1 %v2812_v47, %s4830_s24  ;;  %v4351_v34 = vld.sshfl [vmem:[#allocation5 + $0x2a] sm:$0x1 pattern:$0x75316420]  ;;  %v3667_v46 = vrot.slane %v4366_v32, %v5923_v36 }
 0x5e5   : > { %v4367_v47 = vld.sshfl [vmem:[#allocation5 + $0x3b] sm:$0x1 pattern:$0x75316420]  ;;  %v3365_v48 = vrot.slane %v4351_v34, %v5923_v36 }
 0x5e6   : > { %v4352_v35 = vld.sshfl [vmem:[#allocation5 + $0x2b] sm:$0x1 pattern:$0x75316420] }
 0x5e7   : > { %3144 = vrot.lane.b32.xlu0 %v3143_v49, %s4831_s25  ;;  %v4778_v49 = vld [vmem:[%s6402_s9 + $0x58] sm:$0xff]   ;;  %v3385_v54 = vrot.slane %v4352_v35, %v5923_v36  ;;  %v4353_v56 = vld.sshfl [vmem:[#allocation5 + $0x2c] sm:$0x1 pattern:$0x75316420] }
 0x5e8   : > { %2836 = vrot.lane.b32.xlu1 %v2835_v37, %s4831_s25  ;;  %v4779_v37 = vld [vmem:[%s6402_s9 + $0xd8] sm:$0xff]   ;;  %4567 = vmatprep.subr.bf16.mxu0 %v4778_v49  ;;  %v3405_v0 = vrot.slane %v4353_v56, %v5923_v36  ;;  %v4354_v2 = vld.sshfl [vmem:[#allocation5 + $0x2d] sm:$0x1 pattern:$0x75316420] }
 0x5e9   : > { %4589 = vmatprep.subr.bf16.mxu1 %v4779_v37  ;;  %4568 = vmatpush3.bf16.msra.mxu0 %v4780_v50  ;;  %v3425_v8 = vrot.slane %v4354_v2, %v5923_v36  ;;  %v4355_v12 = vld.sshfl [vmem:[#allocation5 + $0x2e] sm:$0x1 pattern:$0x75316420] }
 0x5ea   : > { %4590 = vmatpush3.bf16.msra.mxu1 %v4781_v51  ;;  %v3445_v14 = vrot.slane %v4355_v12, %v5923_v36  ;;  %v4356_v17 = vld.sshfl [vmem:[#allocation5 + $0x2f] sm:$0x1 pattern:$0x75316420] }
 0x5eb   : > { %3164 = vrot.lane.b32.xlu0 %v3163_v52, %s6407_s12  ;;  %v3687_v52 = vrot.slane %v4367_v47, %v5923_v36 }
 0x5ec   : > { %2859 = vrot.lane.b32.xlu1 %v2858_v53, %s6407_s12  ;;  %v4368_v53 = vld.sshfl [vmem:[#allocation5 + $0x3c] sm:$0x1 pattern:$0x75316420]  ;;  %s438_s12 = scalar_lea.vmem %s6406_s13, %s6457_s28 }
 0x5ef   : > { %3488 = vrot.lane.b32.xlu0 %v3487_v57, %s4814_s16  ;;  %v4782_v57 = vld [vmem:[%s6402_s9 + $0x60] sm:$0xff]  }
 0x5f0   : > { %3186 = vrot.lane.b32.xlu1 %v3185_v59, %s4814_s16  ;;  %v4783_v59 = vld [vmem:[%s6402_s9 + $0xe0] sm:$0xff]   ;;  %4569 = vmatprep.subr.bf16.mxu0 %v4782_v57  ;;  %v6439_v57 = vmov 0 }
 0x5f1   : > { %4591 = vmatprep.subr.bf16.mxu1 %v4783_v59  ;;  %4570 = vmatpush3.bf16.msra.mxu0 %v4784_v60  ;;  %v6440_v57 = vsel %vm6264_vm13, 4294967295, %v6439_v57 }
 0x5f2   : > { %4592 = vmatpush3.bf16.msra.mxu1 %v4785_v61  ;;  %v6441_v61 = vmov 0 }
 0x5f3   : > { %3508 = vrot.lane.b32.xlu0 %v3507_v62, %s4816_s18  ;;  %v3707_v62 = vrot.slane %v4368_v53, %v5923_v36  ;;  %v6437_v53 = vmov 0  ;;  %v6442_v61 = vsel %vm6274_vm3, 4294967295, %v6441_v61 }
 0x5f4   : > { %3206 = vrot.lane.b32.xlu1 %v3205_v63, %s4816_s18  ;;  %v4369_v63 = vld.sshfl [vmem:[#allocation5 + $0x3d] sm:$0x1 pattern:$0x75316420]  ;;  %v6438_v53 = vsel %vm6254_vm7, 4294967295, %v6437_v53 }
 0x5f5   : > { %v3727_v42 = vrot.slane %v4369_v63, %v5923_v36 }
 0x5f7   : > { %3528 = vrot.lane.b32.xlu0 %v3527_v3, %s4818_s20  ;;  %v4786_v3 = vld [vmem:[%s6402_s9 + $0x68] sm:$0xff]  }
 0x5f8   : > { %3226 = vrot.lane.b32.xlu1 %v3225_v4, %s4818_s20  ;;  %v4787_v4 = vld [vmem:[%s6402_s9 + $0xe8] sm:$0xff]   ;;  %4571 = vmatprep.subr.bf16.mxu0 %v4786_v3 }
 0x5f9   : > { %4593 = vmatprep.subr.bf16.mxu1 %v4787_v4  ;;  %4572 = vmatpush3.bf16.msra.mxu0 %v4788_v5 }
 0x5fa   : > { %4594 = vmatpush3.bf16.msra.mxu1 %v4789_v6 }
 0x5fb   : > { %3548 = vrot.lane.b32.xlu0 %v3547_v40, %s4820_s29  ;;  %v4790_v40 = vld [vmem:[%s6402_s9 + $0x70] sm:$0xff]  }
 0x5fc   : > { %3246 = vrot.lane.b32.xlu1 %v3245_v7, %s4820_s29  ;;  %v4791_v7 = vld [vmem:[%s6402_s9 + $0xf0] sm:$0xff]   ;;  %4573 = vmatprep.subr.bf16.mxu0 %v4790_v40 }
 0x5fd   : > { %4595 = vmatprep.subr.bf16.mxu1 %v4791_v7 }
 0x5fe   : > { %4596 = vmatpush3.bf16.msra.mxu1 %v4793_v11 }
 0x5ff   : > { %3568 = vrot.lane.b32.xlu0 %v3567_v9, %s4824_s14  ;;  %v4370_v9 = vld.sshfl [vmem:[#allocation5 + $0x3e] sm:$0x1 pattern:$0x75316420] }
 0x600   : > { %3266 = vrot.lane.b32.xlu1 %v3265_v10, %s4824_s14  ;;  %v4792_v10 = vld [vmem:[%s6402_s9 + $0x30] sm:$0xff]   ;;  %v3747_v13 = vrot.slane %v4370_v9, %v5923_v36 }
 0x601   : > { %4574 = vmatpush3.bf16.msra.mxu0 %v4792_v10 }
 0x603   : > { %3588 = vrot.lane.b32.xlu0 %v3587_v39, %s4825_s15  ;;  %v4794_v39 = vld [vmem:[%s6402_s9 + $0x78] sm:$0xff]  }
 0x604   : > { %3286 = vrot.lane.b32.xlu1 %v3285_v55, %s4825_s15  ;;  %v4795_v55 = vld [vmem:[%s6402_s9 + $0xf8] sm:$0xff]   ;;  %4575 = vmatprep.subr.bf16.mxu0 %v4794_v39 }
 0x605   : > { %4597 = vmatprep.subr.bf16.mxu1 %v4795_v55  ;;  %4576 = vmatpush3.bf16.msra.mxu0 %v4796_v41 }
 0x607   : > { %3608 = vrot.lane.b32.xlu0 %v3607_v58, %s4826_s17  ;;  %v4371_v58 = vld.sshfl [vmem:[#allocation5 + $0x3f] sm:$0x1 pattern:$0x75316420] }
 0x608   : > { %3306 = vrot.lane.b32.xlu1 %v3305_v15, %s4826_s17  ;;  %v4797_v15 = vld [vmem:[%s6402_s9 + $0xb8] sm:$0xff]   ;;  %v3767_v20 = vrot.slane %v4371_v58, %v5923_v36 }
 0x609   : > { %4598 = vmatpush3.bf16.msra.mxu1 %v4797_v15 }
 0x60b   : > { %3628 = vrot.lane.b32.xlu0 %v3627_v22, %s4822_s21  ;;  %v3465_v22 = vrot.slane %v4356_v17, %v5923_v36  ;;  %v4404_v36 = vld [vmem:[%s6404_s11] ss:$0 sm:$0xff] }
 0x60c   : > { %3326 = vrot.lane.b32.xlu1 %v3325_v24, %s4822_s21 }
 0x60f   : > { %3648 = vrot.lane.b32.xlu0 %v3647_v31, %s4827_s19 }
 0x610   : > { %3346 = vrot.lane.b32.xlu1 %v3345_v33, %s4827_s19 }
 0x613   : > { %3668 = vrot.lane.b32.xlu0 %v3667_v46, %s4828_s22 }
 0x614   : > { %3366 = vrot.lane.b32.xlu1 %v3365_v48, %s4828_s22 }
 0x617   : > { %3688 = vrot.lane.b32.xlu0 %v3687_v52, %s4829_s23 }
 0x618   : > { %3386 = vrot.lane.b32.xlu1 %v3385_v54, %s4829_s23 }
 0x61b   : > { %3708 = vrot.lane.b32.xlu0 %v3707_v62, %s4821_s26 }
 0x61c   : > { %3406 = vrot.lane.b32.xlu1 %v3405_v0, %s4821_s26 }
 0x61f   : > { %3728 = vrot.lane.b32.xlu0 %v3727_v42, %s4830_s24 }
 0x620   : > { %3426 = vrot.lane.b32.xlu1 %v3425_v8, %s4830_s24 }
 0x623   : > { %3748 = vrot.lane.b32.xlu0 %v3747_v13, %s4831_s25 }
 0x624   : > { %3446 = vrot.lane.b32.xlu1 %v3445_v14, %s4831_s25  ;;  %s6420_s25 = smov 120  }
 0x625   : > { %v2885_v19 = vpop.permute.xlu0 %2884 }
 0x626   : > { %2887 = vst.msk [vmem:[#allocation6 + $0x1] sm:$0x1] %vm6155_vm15, %v2885_v19  ;;  %v2538_v21 = vpop.permute.xlu1 %2537 }
 0x627   : > { %2543 = vst.msk [vmem:[#allocation6] sm:$0x1] %vm6155_vm15, %v2538_v21  ;;  %3768 = vrot.lane.b32.xlu0 %v3767_v20, %s6420_s25 }
 0x628   : > { %3466 = vrot.lane.b32.xlu1 %v3465_v22, %s6420_s25 }
 0x629   : > { %v2905_v24 = vpop.permute.xlu0 %2904 }
 0x62a   : > { %2907 = vst.msk [vmem:[#allocation6 + $0x1] sm:$0x1] %vm6169_vm5, %v2905_v24  ;;  %v2561_v25 = vpop.permute.xlu1 %2560 }
 0x62b   : > { %2566 = vst.msk [vmem:[#allocation6] sm:$0x1] %vm6169_vm5, %v2561_v25 }
 0x62c   : > { %4154 = vrot.lane.b32.xlu1 %v4404_v36, %s4822_s21 }
 0x62d   : > { %v2925_v27 = vpop.permute.xlu0 %2924 }
 0x62e   : > { %2927 = vst.msk [vmem:[#allocation6 + $0x1] sm:$0x1] %vm6183_vm6, %v2925_v27  ;;  %v2584_v28 = vpop.permute.xlu1 %2583 }
 0x62f   : > { %2589 = vst.msk [vmem:[#allocation6] sm:$0x1] %vm6183_vm6, %v2584_v28 }
 0x631   : > { %v2945_v31 = vpop.permute.xlu0 %2944 }
 0x632   : > { %2947 = vst.msk [vmem:[#allocation6 + $0x1] sm:$0x1] %vm6194_vm9, %v2945_v31  ;;  %v2607_v32 = vpop.permute.xlu1 %2606 }
 0x633   : > { %2612 = vst.msk [vmem:[#allocation6] sm:$0x1] %vm6194_vm9, %v2607_v32 }
 0x635   : > { %v2965_v34 = vpop.permute.xlu0 %2964 }
 0x636   : > { %2967 = vst.msk [vmem:[#allocation6 + $0x1] sm:$0x1] %vm6204_vm12, %v2965_v34  ;;  %v2630_v38 = vpop.permute.xlu1 %2629  ;;  %v3780_v34 = vsub.s32 1, %v5917_v30 }
 0x637   : > { %2635 = vst.msk [vmem:[#allocation6] sm:$0x1] %vm6204_vm12, %v2630_v38  ;;  %v3788_v38 = vsub.s32 3, %v5917_v30 }
 0x639   : > { %v2985_v44 = vpop.permute.xlu0 %2984 }
 0x63a   : > { %2987 = vst.msk [vmem:[#allocation6 + $0x1] sm:$0x1] %vm6214_vm0, %v2985_v44  ;;  %v2653_v45 = vpop.permute.xlu1 %2652  ;;  %v3784_v44 = vsub.s32 2, %v5917_v30 }
 0x63b   : > { %2658 = vst.msk [vmem:[#allocation6] sm:$0x1] %vm6214_vm0, %v2653_v45 }
 0x63d   : > { %v3005_v47 = vpop.permute.xlu0 %3004 }
 0x63e   : > { %3007 = vst.msk [vmem:[#allocation6 + $0x1] sm:$0x1] %vm6224_vm4, %v3005_v47  ;;  %v2676_v48 = vpop.permute.xlu1 %2675 }
 0x63f   : > { %2681 = vst.msk [vmem:[#allocation6] sm:$0x1] %vm6224_vm4, %v2676_v48 }
 0x641   : > { %v3025_v49 = vpop.permute.xlu0 %3024 }
 0x642   : > { %3027 = vst.msk [vmem:[#allocation6 + $0x1] sm:$0x1] %vm6234_vm10, %v3025_v49  ;;  %v2699_v37 = vpop.permute.xlu1 %2698 }
 0x643   : > { %2704 = vst.msk [vmem:[#allocation6] sm:$0x1] %vm6234_vm10, %v2699_v37 }
 0x645   : > { %v3045_v51 = vpop.permute.xlu0 %3044 }
 0x646   : > { %3047 = vst.msk [vmem:[#allocation6 + $0x1] sm:$0x1] %vm6244_vm14, %v3045_v51  ;;  %v2722_v52 = vpop.permute.xlu1 %2721 }
 0x647   : > { %2727 = vst.msk [vmem:[#allocation6] sm:$0x1] %vm6244_vm14, %v2722_v52 }
 0x649   : > { %v3065_v54 = vpop.permute.xlu0 %3064 }
 0x64a   : > { %3067 = vst.msk [vmem:[#allocation6 + $0x1] sm:$0x1] %vm6254_vm7, %v3065_v54  ;;  %v2745_v56 = vpop.permute.xlu1 %2744  ;;  %v3862_v54 = vld [vmem:[%s6403_s10] sm:$0x1] }
 0x64b   : > { %2750 = vst.msk [vmem:[#allocation6] sm:$0x1] %vm6254_vm7, %v2745_v56  ;;  %vm6284_vm7 = vmand %vm2816_vm8, %vm2817_vm11  ;;  %vm2862_vm8 = vcmp.ge.s32.totalorder %v2516_v18, 120  ;;  %vm2863_vm11 = vcmp.lt.s32.totalorder %v2516_v18, 128 }
 0x64d   : > { %v3085_v59 = vpop.permute.xlu0 %3084 }
 0x64e   : > { %3087 = vst.msk [vmem:[#allocation6 + $0x1] sm:$0x1] %vm6264_vm13, %v3085_v59  ;;  %v2768_v60 = vpop.permute.xlu1 %2767 }
 0x64f   : > { %2773 = vst.msk [vmem:[#allocation6] sm:$0x1] %vm6264_vm13, %v2768_v60  ;;  %vm6294_vm13 = vmand %vm2839_vm1, %vm2840_vm2 }
 0x651   : > { %v3105_v62 = vpop.permute.xlu0 %3104 }
 0x652   : > { %3107 = vst.msk [vmem:[#allocation6 + $0x1] sm:$0x1] %vm6274_vm3, %v3105_v62  ;;  %v2791_v63 = vpop.permute.xlu1 %2790 }
 0x653   : > { %2796 = vst.msk [vmem:[#allocation6] sm:$0x1] %vm6274_vm3, %v2791_v63  ;;  %vm6304_vm3 = vmand %vm2862_vm8, %vm2863_vm11 }
 0x655   : > { %v3125_v2 = vpop.permute.xlu0 %3124 }
 0x656   : > { %3127 = vst.msk [vmem:[#allocation6 + $0x1] sm:$0x1] %vm6284_vm7, %v3125_v2  ;;  %v2814_v3 = vpop.permute.xlu1 %2813 }
 0x657   : > { %2819 = vst.msk [vmem:[#allocation6] sm:$0x1] %vm6284_vm7, %v2814_v3 }
 0x659   : > { %v3145_v5 = vpop.permute.xlu0 %3144 }
 0x65a   : > { %3147 = vst.msk [vmem:[#allocation6 + $0x1] sm:$0x1] %vm6294_vm13, %v3145_v5  ;;  %v2837_v6 = vpop.permute.xlu1 %2836 }
 0x65b   : > { %2842 = vst.msk [vmem:[#allocation6] sm:$0x1] %vm6294_vm13, %v2837_v6 }
 0x65d   : > { %v3165_v7 = vpop.permute.xlu0 %3164 }
 0x65e   : > { %3167 = vst.msk [vmem:[#allocation6 + $0x1] sm:$0x1] %vm6304_vm3, %v3165_v7  ;;  %v2860_v42 = vpop.permute.xlu1 %2859 }
 0x65f   : > { %2865 = vst.msk [vmem:[#allocation6] sm:$0x1] %vm6304_vm3, %v2860_v42 }
 0x661   : > { %v3489_v18 = vpop.permute.xlu0 %3488 }
 0x662   : > { %3491 = vst.msk [vmem:[#allocation6 + $0x3] sm:$0x1] %vm6155_vm15, %v3489_v18  ;;  %v3187_v8 = vpop.permute.xlu1 %3186 }
 0x663   : > { %3189 = vst.msk [vmem:[#allocation6 + $0x2] sm:$0x1] %vm6155_vm15, %v3187_v8  ;;  %vm6449_vm15 = vnez %v6438_v53 }
 0x665   : > { %v3509_v9 = vpop.permute.xlu0 %3508 }
 0x666   : > { %3511 = vst.msk [vmem:[#allocation6 + $0x3] sm:$0x1] %vm6169_vm5, %v3509_v9  ;;  %v3207_v10 = vpop.permute.xlu1 %3206 }
 0x667   : > { %3209 = vst.msk [vmem:[#allocation6 + $0x2] sm:$0x1] %vm6169_vm5, %v3207_v10  ;;  %vm6450_vm5 = vnez %v6440_v57 }
 0x669   : > { %v3529_v11 = vpop.permute.xlu0 %3528 }
 0x66a   : > { %3531 = vst.msk [vmem:[#allocation6 + $0x3] sm:$0x1] %vm6183_vm6, %v3529_v11  ;;  %v3227_v12 = vpop.permute.xlu1 %3226  ;;  %v4165_v11 = vld [vmem:[#allocation7] sm:$0x1] }
 0x66b   : > { %3229 = vst.msk [vmem:[#allocation6 + $0x2] sm:$0x1] %vm6183_vm6, %v3227_v12  ;;  %vm6451_vm6 = vnez %v6442_v61 }
 0x66d   : > { %v3549_v39 = vpop.permute.xlu0 %3548 }
 0x66e   : > { %3551 = vst.msk [vmem:[#allocation6 + $0x3] sm:$0x1] %vm6194_vm9, %v3549_v39  ;;  %v3247_v55 = vpop.permute.xlu1 %3246 }
 0x66f   : > { %3249 = vst.msk [vmem:[#allocation6 + $0x2] sm:$0x1] %vm6194_vm9, %v3247_v55 }
 0x671   : > { %v3569_v13 = vpop.permute.xlu0 %3568 }
 0x672   : > { %3571 = vst.msk [vmem:[#allocation6 + $0x3] sm:$0x1] %vm6204_vm12, %v3569_v13  ;;  %v3267_v14 = vpop.permute.xlu1 %3266 }
 0x673   : > { %3269 = vst.msk [vmem:[#allocation6 + $0x2] sm:$0x1] %vm6204_vm12, %v3267_v14 }
 0x675   : > { %v3589_v58 = vpop.permute.xlu0 %3588 }
 0x676   : > { %3591 = vst.msk [vmem:[#allocation6 + $0x3] sm:$0x1] %vm6214_vm0, %v3589_v58  ;;  %v3287_v41 = vpop.permute.xlu1 %3286 }
 0x677   : > { %3289 = vst.msk [vmem:[#allocation6 + $0x2] sm:$0x1] %vm6214_vm0, %v3287_v41 }
 0x679   : > { %v3609_v15 = vpop.permute.xlu0 %3608 }
 0x67a   : > { %3611 = vst.msk [vmem:[#allocation6 + $0x3] sm:$0x1] %vm6224_vm4, %v3609_v15  ;;  %v3307_v16 = vpop.permute.xlu1 %3306 }
 0x67b   : > { %3309 = vst.msk [vmem:[#allocation6 + $0x2] sm:$0x1] %vm6224_vm4, %v3307_v16  ;;  %vm4173_vm4 = vcmask 524800  }
 0x67d   : > { %v3629_v17 = vpop.permute.xlu0 %3628 }
 0x67e   : > { %3631 = vst.msk [vmem:[#allocation6 + $0x3] sm:$0x1] %vm6234_vm10, %v3629_v17  ;;  %v3327_v19 = vpop.permute.xlu1 %3326 }
 0x67f   : > { %3329 = vst.msk [vmem:[#allocation6 + $0x2] sm:$0x1] %vm6234_vm10, %v3327_v19  ;;  %vm4175_vm10 = vcmask 1040904  }
 0x681   : > { %v3649_v20 = vpop.permute.xlu0 %3648 }
 0x682   : > { %3651 = vst.msk [vmem:[#allocation6 + $0x3] sm:$0x1] %vm6244_vm14, %v3649_v20  ;;  %v3347_v21 = vpop.permute.xlu1 %3346 }
 0x683   : > { %3349 = vst.msk [vmem:[#allocation6 + $0x2] sm:$0x1] %vm6244_vm14, %v3347_v21 }
 0x685   : > { %v3669_v22 = vpop.permute.xlu0 %3668 }
 0x686   : > { %3671 = vst.msk [vmem:[#allocation6 + $0x3] sm:$0x1] %vm6449_vm15, %v3669_v22  ;;  %v3367_v23 = vpop.permute.xlu1 %3366 }
 0x687   : > { %3369 = vst.msk [vmem:[#allocation6 + $0x2] sm:$0x1] %vm6449_vm15, %v3367_v23 }
 0x689   : > { %v3689_v24 = vpop.permute.xlu0 %3688 }
 0x68a   : > { %3691 = vst.msk [vmem:[#allocation6 + $0x3] sm:$0x1] %vm6450_vm5, %v3689_v24  ;;  %v3387_v36 = vpop.permute.xlu1 %3386 }
 0x68b   : > { %3389 = vst.msk [vmem:[#allocation6 + $0x2] sm:$0x1] %vm6450_vm5, %v3387_v36 }
 0x68d   : > { %v3709_v25 = vpop.permute.xlu0 %3708 }
 0x68e   : > { %3711 = vst.msk [vmem:[#allocation6 + $0x3] sm:$0x1] %vm6451_vm6, %v3709_v25  ;;  %v3407_v26 = vpop.permute.xlu1 %3406 }
 0x68f   : > { %3409 = vst.msk [vmem:[#allocation6 + $0x2] sm:$0x1] %vm6451_vm6, %v3407_v26 }
 0x691   : > { %v3729_v27 = vpop.permute.xlu0 %3728 }
 0x692   : > { %3731 = vst.msk [vmem:[#allocation6 + $0x3] sm:$0x1] %vm6284_vm7, %v3729_v27  ;;  %v3427_v28 = vpop.permute.xlu1 %3426 }
 0x693   : > { %3429 = vst.msk [vmem:[#allocation6 + $0x2] sm:$0x1] %vm6284_vm7, %v3427_v28 }
 0x695   : > { %v3749_v29 = vpop.permute.xlu0 %3748 }
 0x696   : > { %3751 = vst.msk [vmem:[#allocation6 + $0x3] sm:$0x1] %vm6294_vm13, %v3749_v29  ;;  %v3447_v31 = vpop.permute.xlu1 %3446 }
 0x697   : > { %3449 = vst.msk [vmem:[#allocation6 + $0x2] sm:$0x1] %vm6294_vm13, %v3447_v31 }
 0x699   : > { %v3769_v32 = vpop.permute.xlu0 %3768 }
 0x69a   : > { %3771 = vst.msk [vmem:[#allocation6 + $0x3] sm:$0x1] %vm6304_vm3, %v3769_v32  ;;  %v3467_v33 = vpop.permute.xlu1 %3466 }
 0x69b   : > { %3469 = vst.msk [vmem:[#allocation6 + $0x2] sm:$0x1] %vm6304_vm3, %v3467_v33  ;;  %vm6452_vm3 = vcmask 516096  }
 0x69c   : > { %vm6453_vm9 = vmmov %vm6452_vm3 }
 0x69d   : > { %vm6454_vm12 = vmmov %vm6452_vm3 }
 0x69e   : > { %v4155_v3 = vpop.permute.xlu1 %4154  ;;  %vm6455_vm0 = vmmov %vm6452_vm3 }
 0x6a2   : > { %v3772_v45 = vld [vmem:[#allocation6] sm:$0xf] }
 0x6a3   : > { %v3781_v46 = vrot.slane %v3772_v45, %v3780_v34  ;;  %v3789_v47 = vrot.slane %v3772_v45, %v3788_v38  ;;  %v3777_v48 = vrot.slane %v3772_v45, %v3776_v43  ;;  %v3785_v35 = vrot.slane %v3772_v45, %v3784_v44 }
 0x6a5   : > { %v3795_v49 = vpack.c.bf16 %v3781_v46, %v3781_v46  ;;  %v3797_v37 = vpack.c.bf16 %v3789_v47, %v3789_v47  ;;  %v3794_v50 = vpack.c.bf16 %v3777_v48, %v3777_v48  ;;  %v3796_v51 = vpack.c.bf16 %v3785_v35, %v3785_v35 }
 0x6a7   : > { %4087 = vmatprep.mubr.bf16.mxu0 %v3795_v49  ;;  %4127 = vmatprep.mubr.bf16.mxu1 %v3797_v37 }
 0x6a8   : > { %4088 = vmatmul.mubr.bf16.vlgmr.msra.gmra.mrb[40].mxu0 %v3794_v50  ;;  %4128 = vmatmul.mubr.bf16.vlgmr.msra.gmra.mrb[40].mxu1 %v3796_v51 }
 0x77b   : > { %v4577_v52 = vpop.f32.mrb[40].mxu0  ;;  %v4599_v53 = vpop.f32.mrb[40].mxu1 }
 0x77c   : > { %v4578_v30 = vpop.f32.mrb[41].mxu0  ;;  %v4600_v56 = vpop.f32.mrb[41].mxu1 }
 0x77d   : > { %v4579_v57 = vadd.f32 %v4578_v30, %v4577_v52  ;;  %v4601_v59 = vadd.f32 %v4600_v56, %v4599_v53  ;;  %v4580_v60 = vpop.f32.mrb[42].mxu0  ;;  %v4602_v61 = vpop.f32.mrb[42].mxu1 }
 0x77e   : > { %v4581_v62 = vpop.f32.mrb[43].mxu0  ;;  %v4603_v63 = vpop.f32.mrb[43].mxu1 }
 0x77f   : > { %v4090_v0 = vadd.f32 %v4579_v57, %v3862_v54 }
 0x781   : > { %v4130_v2 = vadd.f32 %v4601_v59, %v4090_v0 }
 0x783   : > { %v4147_v4 = vmax.f32 %v4130_v2, 0.0  ;;  %v4135_v5 = vsel %vm6452_vm3, %v4130_v2, -inf }
 0x784   : > { %4136 = vmax.xlane.f32.xlu1 %v4135_v5 }
 0x785   : > { %v4157_v6 = vmul.f32 %v4155_v3, %v4147_v4 }
 0x787   : > { %4159 = vrot.lane.b32.xlu0 %v4157_v6, %s4822_s21 }
 0x7f9   : > { %v4160_v40 = vpop.permute.xlu0 %4159 }
 0x7fa   : > { %v4162_v7 = vsel %vm6453_vm9, %v4160_v40, 0.0 }
 0x7fb   : > { %4163 = vadd.xlane.f32.xlu0 %v4162_v7 }
 0x811   : > { %v4137_v42 = vpop.xlane.xlu1 %4136 }
 0x812   : > { %v4138_v18 = vsub.f32 %v4130_v2, %v4137_v42 }
 0x814   : > { %v4139_v8 = vmul.f32 1.442695, %v4138_v18 }
 0x816   : > { %4798 = vpow2.f32 %v4139_v8 }
 0x820   : > { %v4799_v9 = vpop.eup %4798 }
 0x821   : > { %v4141_v10 = vsel %vm6454_vm12, %v4799_v9, 0.0 }
 0x822   : > { %4142 = vadd.xlane.f32.xlu0 %v4141_v10 }
 0x888   : > { %v4164_v12 = vpop.xlane.xlu0 %4163 }
 0x889   : > { %v4166_v39 = vadd.f32 %v4165_v11, %v4164_v12 }
 0x88b   : > { %4800 = vtanh.f32 %v4166_v39 }
 0x895   : > { %v4801_v55 = vpop.eup %4800 }
 0x896   : > { %4170 = vrot.lane.b32.xlu1 %v4801_v55, %s4822_s21 }
 0x8af   : > { %v4143_v13 = vpop.xlane.xlu0 %4142 }
 0x8b0   : > { %4802 = vlog2.f32 %v4143_v13 }
 0x8ba   : > { %v4803_v14 = vpop.eup %4802 }
 0x8bb   : > { %v4145_v58 = vmul.f32 0.6931472, %v4803_v14 }
 0x8bd   : > { %v4146_v41 = vsub.f32 %v4138_v18, %v4145_v58 }
 0x8bf   : > { %4168 = vst.msk [vmem:[%s438_s12] sm:$0x1] %vm6455_vm0, %v4146_v41 }
 0x908   : > { %v4171_v15 = vpop.permute.xlu1 %4170 }
 0x909   : > { %4174 = vst.msk [vmem:[%s438_s12] sm:$0x1] %vm4173_vm4, %v4171_v15 }
 0x90a   : > { %4176 = vst.msk [vmem:[%s438_s12] sm:$0x1] %vm4175_vm10, %v4812_v1 }
 0x90b PF: > { %s25_s27 = sadd.s32 1, %s4810_s27  }
 0x90c   : > { %p22_p4 = scmp.ge.s32.totalorder %s25_s27, 4  }
 0x90e   :  { %24 = sbr.rel (!%p22_p4) target bundleno = 3 (0x3), region = 108 }

</bundles_post_ra>
